<compile_context>
chip_gen: v7x
topology: tpu7x:2x2x1
jax: 0.10.0
libtpu: 0.0.40
codegen_flags: <defaults>
</compile_context>

<pallas_src>
import functools

import jax
import jax.numpy as jnp
from jax import lax
from jax.experimental import pallas as pl
from jax.experimental.pallas import tpu as pltpu


_VALID_KINDS = ('L1 Norm', 'L2 Norm', 'identical', 'Cosine')
_BCAST_CACHE_MAX_BYTES = 12 * 1024 * 1024   # VMEM headroom (v5e scoped 16 MiB)


def _round_up(a, m):
    return ((a + m - 1) // m) * m


def _mbd_kernel(mi_ref, mjt_ref, sqi_ref, sqjt_ref, out_ref, ob_s, bcast_s=None,
                *, kind, mean, n_valid, num_b, num_c, use_bcast_cache,
                needs_mask, mxu_dtype):
    """One (i_block, j_block) tile of the pairwise minibatch statistic.

    mi_ref   : (ti, B*C)  projection rows of the output row block (block index
                          is j-invariant, so Pallas keeps it resident over j)
    mjt_ref  : (B*C, tj)  transposed projection, column block j
    sqi_ref  : (ti, B)    per-(row, b) squared norms, row block i
    sqjt_ref : (B, tj)    per-(b, row) squared norms, column block j
    out_ref  : (ti, B)    o_b output rows
    ob_s     : (ti, B)    o_b accumulator over j blocks (VMEM scratch)
    bcast_s  : (B*C, ti, tj)  optional cache of lane-broadcasted mi columns
    """
    j = pl.program_id(1)
    num_j = pl.num_programs(1)
    ti = mi_ref.shape[0]
    tj = mjt_ref.shape[1]
    bc = num_b * num_c
    prec = lax.Precision.HIGHEST if mxu_dtype is None else None

    @pl.when(j == 0)
    def _init():
        ob_s[...] = jnp.zeros_like(ob_s)
        if use_bcast_cache:
            # Lane-broadcast of every (j-invariant) mi column, done once per
            # row block instead of once per grid step.
            mi0 = mi_ref[...]
            for k in range(bc):
                bcast_s[k] = jnp.broadcast_to(mi0[:, k:k + 1], (ti, tj))

    mjt = mjt_ref[...]                                          # (B*C, tj)

    if needs_mask:
        lane = lax.broadcasted_iota(jnp.int32, (1, tj), 1)
        jmask = ((j * tj + lane) < n_valid).astype(jnp.float32)  # (1, tj)

    if kind in ('Cosine', 'L2 Norm'):
        sqi = sqi_ref[...]                                      # (ti, B)
        sqjt = sqjt_ref[...]                                    # (B, tj)
    elif not use_bcast_cache:
        mi = mi_ref[...]                                        # (ti, B*C)

    for b in range(num_b):
        lo = b * num_c
        hi = lo + num_c
        if kind in ('Cosine', 'L2 Norm'):
            a = mi_ref[:, lo:hi]                                # (ti, C)
            w = mjt[lo:hi, :]                                   # (C, tj)
            if mxu_dtype is not None:
                a = a.astype(mxu_dtype)
                w = w.astype(mxu_dtype)
            dotp = jnp.dot(a, w, preferred_element_type=jnp.float32,
                           precision=prec)                      # MXU, (ti, tj)
            if kind == 'L2 Norm':
                sqd = sqi[:, b:b + 1] + sqjt[b:b + 1, :] - 2.0 * dotp
                e = jnp.exp(-jnp.maximum(sqd, 0.0))
            else:
                # Cosine: denominator clamp matches torch.nn.CosineSimilarity
                # (sim = x1.x2 / max(||x1||*||x2||, eps)).
                denom = jnp.maximum(
                    jnp.sqrt(sqi[:, b:b + 1]) * jnp.sqrt(sqjt[b:b + 1, :]),
                    1e-8)
                e = jnp.exp(-(dotp / denom))
        else:  # 'L1 Norm' / 'identical'
            acc = jnp.zeros((ti, tj), jnp.float32)
            for c in range(num_c):
                k = lo + c
                mik = bcast_s[k] if use_bcast_cache else mi[:, k:k + 1]
                acc = acc + jnp.abs(mik - mjt[k:k + 1, :])
            scale = 100.0 if kind == 'identical' else 1.0
            e = jnp.exp(acc * -scale)

        if needs_mask:
            e = e * jmask                       # zero the padded j columns
        # The PyTorch reference sums expnorm over the *other* pair index; all
        # supported metrics are symmetric in (i, j) so summing the lane (j)
        # axis here is equivalent.  Accumulate straight into column b.
        ob_s[:, b:b + 1] += jnp.sum(e, axis=1, keepdims=True)

    @pl.when(j == num_j - 1)
    def _finalize():
        ob = ob_s[...] - 1.0        # subtract the self term, exactly as torch
        if mean:
            ob = ob / float(n_valid - 1)
        out_ref[...] = ob.astype(out_ref.dtype)


def minibatch_discrimination(x, T, *, minibatch_kind='L1 Norm', mean=False,
                             min_row_blocks=1, mxu_input_dtype=None):
    """Forward pass of MinibatchDiscrimination: returns [x | o_b], shape (N, F+B).

    min_row_blocks : set to 2 on v7x so the "parallel" row axis actually
                     shards across both TensorCores.
    mxu_input_dtype: e.g. jnp.bfloat16 to feed the Cosine/L2 MXU matmuls in
                     bf16 (native rate on v6e/v7x); default keeps full f32.
    """
    if minibatch_kind not in _VALID_KINDS:
        raise ValueError(f"unknown Minibatch_kind: {minibatch_kind}")
    N, F = x.shape
    F2, B, C = T.shape
    assert F2 == F, (F2, F)
    BC = B * C

    # ---- projection + norms hoisted out of the kernel (one XLA matmul) ----
    t2d = T.reshape(F, BC).astype(jnp.float32)
    M = jnp.dot(x.astype(jnp.float32), t2d,
                precision=lax.Precision.HIGHEST)             # (N, B*C) f32
    sqn = jnp.sum(M.reshape(N, B, C) ** 2, axis=-1)          # (N, B)

    # ---- tile selection / padding ----
    Np8 = max(8, _round_up(N, 8))
    if Np8 <= 128:
        ti = tj = Np = Np8
    else:
        ti = tj = 128
        Np = _round_up(N, 128)
        # TODO(synk): ti=512+ with an inner 128x128 sub-tile loop would cut
        # the N^2-scaled M^T re-streaming and per-grid-step overhead further.
    if min_row_blocks > 1:              # v7x: give each TensorCore a row block
        t = ti
        while Np // t < min_row_blocks:
            nxt = t // 2
            if nxt < 8 or nxt % 8 or Np % nxt:
                break
            t = nxt
        ti = t
    needs_mask = Np != N

    if needs_mask:
        M = jnp.pad(M, ((0, Np - N), (0, 0)))
        sqn = jnp.pad(sqn, ((0, Np - N), (0, 0)))
    MT = M.T                                                 # (B*C, Np)
    sqnT = sqn.T                                             # (B, Np)

    grid = (Np // ti, Np // tj)
    use_bcast_cache = (
        minibatch_kind in ('L1 Norm', 'identical')
        and grid[1] > 1                                      # reuse across j blocks
        and BC * ti * tj * 4 <= _BCAST_CACHE_MAX_BYTES)

    kernel = functools.partial(
        _mbd_kernel, kind=minibatch_kind, mean=mean, n_valid=N,
        num_b=B, num_c=C, use_bcast_cache=use_bcast_cache,
        needs_mask=needs_mask, mxu_dtype=mxu_input_dtype)

    scratch = [pltpu.VMEM((ti, B), jnp.float32)]             # o_b accumulator
    if use_bcast_cache:
        scratch.append(pltpu.VMEM((BC, ti, tj), jnp.float32))

    o_b = pl.pallas_call(
        kernel,
        out_shape=jax.ShapeDtypeStruct((Np, B), jnp.float32),
        grid=grid,
        in_specs=[
            pl.BlockSpec((ti, BC), lambda i, j: (i, 0)),     # M, row block i
            pl.BlockSpec((BC, tj), lambda i, j: (0, j)),     # M^T, col block j
            pl.BlockSpec((ti, B), lambda i, j: (i, 0)),      # ||.||^2, rows i
            pl.BlockSpec((B, tj), lambda i, j: (0, j)),      # ||.||^2, rows j
        ],
        out_specs=pl.BlockSpec((ti, B), lambda i, j: (i, 0)),
        scratch_shapes=scratch,
        compiler_params=pltpu.CompilerParams(
            dimension_semantics=("parallel", "arbitrary")),
    )(M, MT, sqn, sqnT)

    # Fused epilogue moved to XLA per review: kernel output stays lane-simple,
    # the [x | o_b] concat is a single cheap XLA op.
    return jnp.concatenate([x, o_b[:N].astype(x.dtype)], axis=1)


def _reference(x, T, minibatch_kind='L1 Norm', mean=False):
    """Pure-JAX transcription of the PyTorch forward for correctness checks."""
    N, F = x.shape
    _, B, C = T.shape
    matrices = jnp.dot(x, T.reshape(F, B * C),
                       precision=lax.Precision.HIGHEST).reshape(N, B, C)
    M = matrices[None]                 # (1, N, B, C)
    M_T = matrices[:, None]            # (N, 1, B, C)
    if minibatch_kind == 'L1 Norm':
        expnorm = jnp.exp(-jnp.abs(M - M_T).sum(3))
    elif minibatch_kind == 'L2 Norm':
        expnorm = jnp.exp(-(jnp.abs(M - M_T) ** 2).sum(3))
    elif minibatch_kind == 'identical':
        expnorm = jnp.exp(-jnp.abs(M - M_T).sum(3) * 100)
    elif minibatch_kind == 'Cosine':
        dotp = (M * M_T).sum(3)
        denom = jnp.maximum(
            jnp.linalg.norm(M, axis=3) * jnp.linalg.norm(M_T, axis=3), 1e-8)
        expnorm = jnp.exp(-(dotp / denom))
    o_b = expnorm.sum(0) - 1
    if mean:
        o_b = o_b / (N - 1)
    return jnp.concatenate([x, o_b], axis=1)


if __name__ == "__main__":
    key = jax.random.PRNGKey(0)
    kx, kt, kx2 = jax.random.split(key, 3)

    # in_features, out_features, kernel_dims (as in the nn.Module ctor)
    in_features, out_features, kernel_dims = 32, 16, 8
    T = jax.random.normal(
        kt, (in_features, out_features, kernel_dims), dtype=jnp.float32)

    # per-kind tolerances: L2 uses the norm identity on the MXU (mild
    # cancellation near zero distances), Cosine sums ~N terms of O(1).
    tols = {'L1 Norm': 1e-4, 'identical': 1e-4, 'Cosine': 5e-4, 'L2 Norm': 1e-3}

    # small batch: single tile, no padding, all kinds
    x_small = jax.random.normal(kx, (8, in_features), dtype=jnp.float32)
    small_cases = [('L1 Norm', False), ('L2 Norm', False), ('identical', False),
                   ('Cosine', False), ('L1 Norm', True)]
    # ragged batch: padding + masking, 2x2 grid, broadcast cache, MXU paths
    x_big = jax.random.normal(kx2, (250, in_features), dtype=jnp.float32)
    big_cases = [('L1 Norm', False), ('L2 Norm', True), ('Cosine', False)]

    for x, cases in ((x_small, small_cases), (x_big, big_cases)):
        N = x.shape[0]
        for kind, use_mean in cases:
            out = jax.block_until_ready(
                minibatch_discrimination(x, T, minibatch_kind=kind,
                                         mean=use_mean))
            assert out.shape == (N, in_features + out_features), out.shape
            ref = _reference(x, T, kind, use_mean)
            tol = tols[kind]
            err = float(jnp.max(jnp.abs(out - ref)))
            assert jnp.allclose(out, ref, atol=tol, rtol=tol), \
                (kind, use_mean, N, err)

    print("KERNEL_OK")
</pallas_src>

<mosaic_0001>
module attributes {stable_mosaic.version = 11 : i64} {
  func.func @_mbd_kernel(%arg0: i32, %arg1: i32, %arg2: memref<8x128xf32, #tpu.memory_space<vmem>>, %arg3: memref<128x8xf32, #tpu.memory_space<vmem>>, %arg4: memref<8x16xf32, #tpu.memory_space<vmem>>, %arg5: memref<16x8xf32, #tpu.memory_space<vmem>>, %arg6: memref<8x16xf32, #tpu.memory_space<vmem>>, %arg7: memref<8x16xf32, #tpu.memory_space<vmem>>) attributes {dimension_semantics = [#tpu.dimension_semantics<parallel>, #tpu.dimension_semantics<arbitrary>], iteration_bounds = array<i64: 1, 1>, scalar_prefetch = 0 : i64, scratch_operands = 1 : i64, tpu.core_type = #tpu.core_type<tc>, window_params = [{transform_indices = @transform_0, window_bounds = array<i64: 8, 128>}, {transform_indices = @transform_1, window_bounds = array<i64: 128, 8>}, {transform_indices = @transform_2, window_bounds = array<i64: 8, 16>}, {transform_indices = @transform_3, window_bounds = array<i64: 16, 8>}, {transform_indices = @transform_4, window_bounds = array<i64: 8, 16>}]} {
    %c0_i32 = arith.constant 0 : i32
    %0 = arith.cmpi eq, %arg1, %c0_i32 : i32
    %1 = arith.extui %0 : i1 to i32
    %c0_i32_0 = arith.constant 0 : i32
    %2 = arith.cmpi ne, %1, %c0_i32_0 : i32
    scf.if %2 {
      %cst_102 = arith.constant 0.000000e+00 : f32
      %1048 = vector.broadcast %cst_102 : f32 to vector<8x16xf32>
      %c0_103 = arith.constant 0 : index
      %c0_104 = arith.constant 0 : index
      %1049 = vector.load %arg7[%c0_103, %c0_104] : memref<8x16xf32, #tpu.memory_space<vmem>>, vector<8x16xf32>
      tpu.vector_store %arg7[%c0_103, %c0_104], %1048 {strides = array<i32>} : memref<8x16xf32, #tpu.memory_space<vmem>>, vector<8x16xf32>,
    } else {
    }
    %c0 = arith.constant 0 : index
    %c0_1 = arith.constant 0 : index
    %3 = vector.load %arg3[%c0, %c0_1] : memref<128x8xf32, #tpu.memory_space<vmem>>, vector<128x8xf32>
    %c0_2 = arith.constant 0 : index
    %c0_3 = arith.constant 0 : index
    %4 = vector.load %arg2[%c0_2, %c0_3] : memref<8x128xf32, #tpu.memory_space<vmem>>, vector<8x128xf32>
    %cst = arith.constant 0.000000e+00 : f32
    %5 = vector.broadcast %cst : f32 to vector<8x8xf32>
    %6 = vector.extract_strided_slice %4 {offsets = [0, 0], sizes = [8, 1], strides = [1, 1]} : vector<8x128xf32> to vector<8x1xf32>
    %7 = vector.extract_strided_slice %3 {offsets = [0, 0], sizes = [1, 8], strides = [1, 1]} : vector<128x8xf32> to vector<1x8xf32>
    %8 = vector.broadcast %6 : vector<8x1xf32> to vector<8x8xf32>
    %9 = vector.broadcast %7 : vector<1x8xf32> to vector<8x8xf32>
    %10 = arith.subf %8, %9 : vector<8x8xf32>
    %11 = math.absf %10 : vector<8x8xf32>
    %12 = arith.addf %5, %11 : vector<8x8xf32>
    %13 = vector.extract_strided_slice %4 {offsets = [0, 1], sizes = [8, 1], strides = [1, 1]} : vector<8x128xf32> to vector<8x1xf32>
    %14 = vector.extract_strided_slice %3 {offsets = [1, 0], sizes = [1, 8], strides = [1, 1]} : vector<128x8xf32> to vector<1x8xf32>
    %15 = vector.broadcast %13 : vector<8x1xf32> to vector<8x8xf32>
    %16 = vector.broadcast %14 : vector<1x8xf32> to vector<8x8xf32>
    %17 = arith.subf %15, %16 : vector<8x8xf32>
    %18 = math.absf %17 : vector<8x8xf32>
    %19 = arith.addf %12, %18 : vector<8x8xf32>
    %20 = vector.extract_strided_slice %4 {offsets = [0, 2], sizes = [8, 1], strides = [1, 1]} : vector<8x128xf32> to vector<8x1xf32>
    %21 = vector.extract_strided_slice %3 {offsets = [2, 0], sizes = [1, 8], strides = [1, 1]} : vector<128x8xf32> to vector<1x8xf32>
    %22 = vector.broadcast %20 : vector<8x1xf32> to vector<8x8xf32>
    %23 = vector.broadcast %21 : vector<1x8xf32> to vector<8x8xf32>
    %24 = arith.subf %22, %23 : vector<8x8xf32>
    %25 = math.absf %24 : vector<8x8xf32>
    %26 = arith.addf %19, %25 : vector<8x8xf32>
    %27 = vector.extract_strided_slice %4 {offsets = [0, 3], sizes = [8, 1], strides = [1, 1]} : vector<8x128xf32> to vector<8x1xf32>
    %28 = vector.extract_strided_slice %3 {offsets = [3, 0], sizes = [1, 8], strides = [1, 1]} : vector<128x8xf32> to vector<1x8xf32>
    %29 = vector.broadcast %27 : vector<8x1xf32> to vector<8x8xf32>
    %30 = vector.broadcast %28 : vector<1x8xf32> to vector<8x8xf32>
    %31 = arith.subf %29, %30 : vector<8x8xf32>
    %32 = math.absf %31 : vector<8x8xf32>
    %33 = arith.addf %26, %32 : vector<8x8xf32>
    %34 = vector.extract_strided_slice %4 {offsets = [0, 4], sizes = [8, 1], strides = [1, 1]} : vector<8x128xf32> to vector<8x1xf32>
    %35 = vector.extract_strided_slice %3 {offsets = [4, 0], sizes = [1, 8], strides = [1, 1]} : vector<128x8xf32> to vector<1x8xf32>
    %36 = vector.broadcast %34 : vector<8x1xf32> to vector<8x8xf32>
    %37 = vector.broadcast %35 : vector<1x8xf32> to vector<8x8xf32>
    %38 = arith.subf %36, %37 : vector<8x8xf32>
    %39 = math.absf %38 : vector<8x8xf32>
    %40 = arith.addf %33, %39 : vector<8x8xf32>
    %41 = vector.extract_strided_slice %4 {offsets = [0, 5], sizes = [8, 1], strides = [1, 1]} : vector<8x128xf32> to vector<8x1xf32>
    %42 = vector.extract_strided_slice %3 {offsets = [5, 0], sizes = [1, 8], strides = [1, 1]} : vector<128x8xf32> to vector<1x8xf32>
    %43 = vector.broadcast %41 : vector<8x1xf32> to vector<8x8xf32>
    %44 = vector.broadcast %42 : vector<1x8xf32> to vector<8x8xf32>
    %45 = arith.subf %43, %44 : vector<8x8xf32>
    %46 = math.absf %45 : vector<8x8xf32>
    %47 = arith.addf %40, %46 : vector<8x8xf32>
    %48 = vector.extract_strided_slice %4 {offsets = [0, 6], sizes = [8, 1], strides = [1, 1]} : vector<8x128xf32> to vector<8x1xf32>
    %49 = vector.extract_strided_slice %3 {offsets = [6, 0], sizes = [1, 8], strides = [1, 1]} : vector<128x8xf32> to vector<1x8xf32>
    %50 = vector.broadcast %48 : vector<8x1xf32> to vector<8x8xf32>
    %51 = vector.broadcast %49 : vector<1x8xf32> to vector<8x8xf32>
    %52 = arith.subf %50, %51 : vector<8x8xf32>
    %53 = math.absf %52 : vector<8x8xf32>
    %54 = arith.addf %47, %53 : vector<8x8xf32>
    %55 = vector.extract_strided_slice %4 {offsets = [0, 7], sizes = [8, 1], strides = [1, 1]} : vector<8x128xf32> to vector<8x1xf32>
    %56 = vector.extract_strided_slice %3 {offsets = [7, 0], sizes = [1, 8], strides = [1, 1]} : vector<128x8xf32> to vector<1x8xf32>
    %57 = vector.broadcast %55 : vector<8x1xf32> to vector<8x8xf32>
    %58 = vector.broadcast %56 : vector<1x8xf32> to vector<8x8xf32>
    %59 = arith.subf %57, %58 : vector<8x8xf32>
    %60 = math.absf %59 : vector<8x8xf32>
    %61 = arith.addf %54, %60 : vector<8x8xf32>
    %cst_4 = arith.constant -1.000000e+00 : f32
    %62 = vector.broadcast %cst_4 : f32 to vector<8x8xf32>
    %63 = arith.mulf %61, %62 : vector<8x8xf32>
    %64 = math.exp %63 : vector<8x8xf32>
    %c0_5 = arith.constant 0 : index
    %c0_6 = arith.constant 0 : index
    %65 = vector.load %arg7[%c0_5, %c0_6] : memref<8x16xf32, #tpu.memory_space<vmem>>, vector<8x1xf32>
    %cst_7 = arith.constant dense<0.000000e+00> : vector<8xf32>
    %66 = vector.multi_reduction <add>, %64, %cst_7 [1] : vector<8x8xf32> to vector<8xf32>
    %67 = vector.shape_cast %66 : vector<8xf32> to vector<8x1xf32>
    %68 = arith.addf %65, %67 : vector<8x1xf32>
    %c0_8 = arith.constant 0 : index
    %c0_9 = arith.constant 0 : index
    %69 = vector.load %arg7[%c0_8, %c0_9] : memref<8x16xf32, #tpu.memory_space<vmem>>, vector<8x1xf32>
    tpu.vector_store %arg7[%c0_8, %c0_9], %68 {strides = array<i32>} : memref<8x16xf32, #tpu.memory_space<vmem>>, vector<8x1xf32>,
    %cst_10 = arith.constant 0.000000e+00 : f32
    %70 = vector.broadcast %cst_10 : f32 to vector<8x8xf32>
    %71 = vector.extract_strided_slice %4 {offsets = [0, 8], sizes = [8, 1], strides = [1, 1]} : vector<8x128xf32> to vector<8x1xf32>
    %72 = vector.extract_strided_slice %3 {offsets = [8, 0], sizes = [1, 8], strides = [1, 1]} : vector<128x8xf32> to vector<1x8xf32>
    %73 = vector.broadcast %71 : vector<8x1xf32> to vector<8x8xf32>
    %74 = vector.broadcast %72 : vector<1x8xf32> to vector<8x8xf32>
    %75 = arith.subf %73, %74 : vector<8x8xf32>
    %76 = math.absf %75 : vector<8x8xf32>
    %77 = arith.addf %70, %76 : vector<8x8xf32>
    %78 = vector.extract_strided_slice %4 {offsets = [0, 9], sizes = [8, 1], strides = [1, 1]} : vector<8x128xf32> to vector<8x1xf32>
    %79 = vector.extract_strided_slice %3 {offsets = [9, 0], sizes = [1, 8], strides = [1, 1]} : vector<128x8xf32> to vector<1x8xf32>
    %80 = vector.broadcast %78 : vector<8x1xf32> to vector<8x8xf32>
    %81 = vector.broadcast %79 : vector<1x8xf32> to vector<8x8xf32>
    %82 = arith.subf %80, %81 : vector<8x8xf32>
    %83 = math.absf %82 : vector<8x8xf32>
    %84 = arith.addf %77, %83 : vector<8x8xf32>
    %85 = vector.extract_strided_slice %4 {offsets = [0, 10], sizes = [8, 1], strides = [1, 1]} : vector<8x128xf32> to vector<8x1xf32>
    %86 = vector.extract_strided_slice %3 {offsets = [10, 0], sizes = [1, 8], strides = [1, 1]} : vector<128x8xf32> to vector<1x8xf32>
    %87 = vector.broadcast %85 : vector<8x1xf32> to vector<8x8xf32>
    %88 = vector.broadcast %86 : vector<1x8xf32> to vector<8x8xf32>
    %89 = arith.subf %87, %88 : vector<8x8xf32>
    %90 = math.absf %89 : vector<8x8xf32>
    %91 = arith.addf %84, %90 : vector<8x8xf32>
    %92 = vector.extract_strided_slice %4 {offsets = [0, 11], sizes = [8, 1], strides = [1, 1]} : vector<8x128xf32> to vector<8x1xf32>
    %93 = vector.extract_strided_slice %3 {offsets = [11, 0], sizes = [1, 8], strides = [1, 1]} : vector<128x8xf32> to vector<1x8xf32>
    %94 = vector.broadcast %92 : vector<8x1xf32> to vector<8x8xf32>
    %95 = vector.broadcast %93 : vector<1x8xf32> to vector<8x8xf32>
    %96 = arith.subf %94, %95 : vector<8x8xf32>
    %97 = math.absf %96 : vector<8x8xf32>
    %98 = arith.addf %91, %97 : vector<8x8xf32>
    %99 = vector.extract_strided_slice %4 {offsets = [0, 12], sizes = [8, 1], strides = [1, 1]} : vector<8x128xf32> to vector<8x1xf32>
    %100 = vector.extract_strided_slice %3 {offsets = [12, 0], sizes = [1, 8], strides = [1, 1]} : vector<128x8xf32> to vector<1x8xf32>
    %101 = vector.broadcast %99 : vector<8x1xf32> to vector<8x8xf32>
    %102 = vector.broadcast %100 : vector<1x8xf32> to vector<8x8xf32>
    %103 = arith.subf %101, %102 : vector<8x8xf32>
    %104 = math.absf %103 : vector<8x8xf32>
    %105 = arith.addf %98, %104 : vector<8x8xf32>
    %106 = vector.extract_strided_slice %4 {offsets = [0, 13], sizes = [8, 1], strides = [1, 1]} : vector<8x128xf32> to vector<8x1xf32>
    %107 = vector.extract_strided_slice %3 {offsets = [13, 0], sizes = [1, 8], strides = [1, 1]} : vector<128x8xf32> to vector<1x8xf32>
    %108 = vector.broadcast %106 : vector<8x1xf32> to vector<8x8xf32>
    %109 = vector.broadcast %107 : vector<1x8xf32> to vector<8x8xf32>
    %110 = arith.subf %108, %109 : vector<8x8xf32>
    %111 = math.absf %110 : vector<8x8xf32>
    %112 = arith.addf %105, %111 : vector<8x8xf32>
    %113 = vector.extract_strided_slice %4 {offsets = [0, 14], sizes = [8, 1], strides = [1, 1]} : vector<8x128xf32> to vector<8x1xf32>
    %114 = vector.extract_strided_slice %3 {offsets = [14, 0], sizes = [1, 8], strides = [1, 1]} : vector<128x8xf32> to vector<1x8xf32>
    %115 = vector.broadcast %113 : vector<8x1xf32> to vector<8x8xf32>
    %116 = vector.broadcast %114 : vector<1x8xf32> to vector<8x8xf32>
    %117 = arith.subf %115, %116 : vector<8x8xf32>
    %118 = math.absf %117 : vector<8x8xf32>
    %119 = arith.addf %112, %118 : vector<8x8xf32>
    %120 = vector.extract_strided_slice %4 {offsets = [0, 15], sizes = [8, 1], strides = [1, 1]} : vector<8x128xf32> to vector<8x1xf32>
    %121 = vector.extract_strided_slice %3 {offsets = [15, 0], sizes = [1, 8], strides = [1, 1]} : vector<128x8xf32> to vector<1x8xf32>
    %122 = vector.broadcast %120 : vector<8x1xf32> to vector<8x8xf32>
    %123 = vector.broadcast %121 : vector<1x8xf32> to vector<8x8xf32>
    %124 = arith.subf %122, %123 : vector<8x8xf32>
    %125 = math.absf %124 : vector<8x8xf32>
    %126 = arith.addf %119, %125 : vector<8x8xf32>
    %cst_11 = arith.constant -1.000000e+00 : f32
    %127 = vector.broadcast %cst_11 : f32 to vector<8x8xf32>
    %128 = arith.mulf %126, %127 : vector<8x8xf32>
    %129 = math.exp %128 : vector<8x8xf32>
    %c0_12 = arith.constant 0 : index
    %c1 = arith.constant 1 : index
    %130 = vector.load %arg7[%c0_12, %c1] : memref<8x16xf32, #tpu.memory_space<vmem>>, vector<8x1xf32>
    %cst_13 = arith.constant dense<0.000000e+00> : vector<8xf32>
    %131 = vector.multi_reduction <add>, %129, %cst_13 [1] : vector<8x8xf32> to vector<8xf32>
    %132 = vector.shape_cast %131 : vector<8xf32> to vector<8x1xf32>
    %133 = arith.addf %130, %132 : vector<8x1xf32>
    %c0_14 = arith.constant 0 : index
    %c1_15 = arith.constant 1 : index
    %134 = vector.load %arg7[%c0_14, %c1_15] : memref<8x16xf32, #tpu.memory_space<vmem>>, vector<8x1xf32>
    tpu.vector_store %arg7[%c0_14, %c1_15], %133 {strides = array<i32>} : memref<8x16xf32, #tpu.memory_space<vmem>>, vector<8x1xf32>,
    %cst_16 = arith.constant 0.000000e+00 : f32
    %135 = vector.broadcast %cst_16 : f32 to vector<8x8xf32>
    %136 = vector.extract_strided_slice %4 {offsets = [0, 16], sizes = [8, 1], strides = [1, 1]} : vector<8x128xf32> to vector<8x1xf32>
    %137 = vector.extract_strided_slice %3 {offsets = [16, 0], sizes = [1, 8], strides = [1, 1]} : vector<128x8xf32> to vector<1x8xf32>
    %138 = vector.broadcast %136 : vector<8x1xf32> to vector<8x8xf32>
    %139 = vector.broadcast %137 : vector<1x8xf32> to vector<8x8xf32>
    %140 = arith.subf %138, %139 : vector<8x8xf32>
    %141 = math.absf %140 : vector<8x8xf32>
    %142 = arith.addf %135, %141 : vector<8x8xf32>
    %143 = vector.extract_strided_slice %4 {offsets = [0, 17], sizes = [8, 1], strides = [1, 1]} : vector<8x128xf32> to vector<8x1xf32>
    %144 = vector.extract_strided_slice %3 {offsets = [17, 0], sizes = [1, 8], strides = [1, 1]} : vector<128x8xf32> to vector<1x8xf32>
    %145 = vector.broadcast %143 : vector<8x1xf32> to vector<8x8xf32>
    %146 = vector.broadcast %144 : vector<1x8xf32> to vector<8x8xf32>
    %147 = arith.subf %145, %146 : vector<8x8xf32>
    %148 = math.absf %147 : vector<8x8xf32>
    %149 = arith.addf %142, %148 : vector<8x8xf32>
    %150 = vector.extract_strided_slice %4 {offsets = [0, 18], sizes = [8, 1], strides = [1, 1]} : vector<8x128xf32> to vector<8x1xf32>
    %151 = vector.extract_strided_slice %3 {offsets = [18, 0], sizes = [1, 8], strides = [1, 1]} : vector<128x8xf32> to vector<1x8xf32>
    %152 = vector.broadcast %150 : vector<8x1xf32> to vector<8x8xf32>
    %153 = vector.broadcast %151 : vector<1x8xf32> to vector<8x8xf32>
    %154 = arith.subf %152, %153 : vector<8x8xf32>
    %155 = math.absf %154 : vector<8x8xf32>
    %156 = arith.addf %149, %155 : vector<8x8xf32>
    %157 = vector.extract_strided_slice %4 {offsets = [0, 19], sizes = [8, 1], strides = [1, 1]} : vector<8x128xf32> to vector<8x1xf32>
    %158 = vector.extract_strided_slice %3 {offsets = [19, 0], sizes = [1, 8], strides = [1, 1]} : vector<128x8xf32> to vector<1x8xf32>
    %159 = vector.broadcast %157 : vector<8x1xf32> to vector<8x8xf32>
    %160 = vector.broadcast %158 : vector<1x8xf32> to vector<8x8xf32>
    %161 = arith.subf %159, %160 : vector<8x8xf32>
    %162 = math.absf %161 : vector<8x8xf32>
    %163 = arith.addf %156, %162 : vector<8x8xf32>
    %164 = vector.extract_strided_slice %4 {offsets = [0, 20], sizes = [8, 1], strides = [1, 1]} : vector<8x128xf32> to vector<8x1xf32>
    %165 = vector.extract_strided_slice %3 {offsets = [20, 0], sizes = [1, 8], strides = [1, 1]} : vector<128x8xf32> to vector<1x8xf32>
    %166 = vector.broadcast %164 : vector<8x1xf32> to vector<8x8xf32>
    %167 = vector.broadcast %165 : vector<1x8xf32> to vector<8x8xf32>
    %168 = arith.subf %166, %167 : vector<8x8xf32>
    %169 = math.absf %168 : vector<8x8xf32>
    %170 = arith.addf %163, %169 : vector<8x8xf32>
    %171 = vector.extract_strided_slice %4 {offsets = [0, 21], sizes = [8, 1], strides = [1, 1]} : vector<8x128xf32> to vector<8x1xf32>
    %172 = vector.extract_strided_slice %3 {offsets = [21, 0], sizes = [1, 8], strides = [1, 1]} : vector<128x8xf32> to vector<1x8xf32>
    %173 = vector.broadcast %171 : vector<8x1xf32> to vector<8x8xf32>
    %174 = vector.broadcast %172 : vector<1x8xf32> to vector<8x8xf32>
    %175 = arith.subf %173, %174 : vector<8x8xf32>
    %176 = math.absf %175 : vector<8x8xf32>
    %177 = arith.addf %170, %176 : vector<8x8xf32>
    %178 = vector.extract_strided_slice %4 {offsets = [0, 22], sizes = [8, 1], strides = [1, 1]} : vector<8x128xf32> to vector<8x1xf32>
    %179 = vector.extract_strided_slice %3 {offsets = [22, 0], sizes = [1, 8], strides = [1, 1]} : vector<128x8xf32> to vector<1x8xf32>
    %180 = vector.broadcast %178 : vector<8x1xf32> to vector<8x8xf32>
    %181 = vector.broadcast %179 : vector<1x8xf32> to vector<8x8xf32>
    %182 = arith.subf %180, %181 : vector<8x8xf32>
    %183 = math.absf %182 : vector<8x8xf32>
    %184 = arith.addf %177, %183 : vector<8x8xf32>
    %185 = vector.extract_strided_slice %4 {offsets = [0, 23], sizes = [8, 1], strides = [1, 1]} : vector<8x128xf32> to vector<8x1xf32>
    %186 = vector.extract_strided_slice %3 {offsets = [23, 0], sizes = [1, 8], strides = [1, 1]} : vector<128x8xf32> to vector<1x8xf32>
    %187 = vector.broadcast %185 : vector<8x1xf32> to vector<8x8xf32>
    %188 = vector.broadcast %186 : vector<1x8xf32> to vector<8x8xf32>
    %189 = arith.subf %187, %188 : vector<8x8xf32>
    %190 = math.absf %189 : vector<8x8xf32>
    %191 = arith.addf %184, %190 : vector<8x8xf32>
    %cst_17 = arith.constant -1.000000e+00 : f32
    %192 = vector.broadcast %cst_17 : f32 to vector<8x8xf32>
    %193 = arith.mulf %191, %192 : vector<8x8xf32>
    %194 = math.exp %193 : vector<8x8xf32>
    %c0_18 = arith.constant 0 : index
    %c2 = arith.constant 2 : index
    %195 = vector.load %arg7[%c0_18, %c2] : memref<8x16xf32, #tpu.memory_space<vmem>>, vector<8x1xf32>
    %cst_19 = arith.constant dense<0.000000e+00> : vector<8xf32>
    %196 = vector.multi_reduction <add>, %194, %cst_19 [1] : vector<8x8xf32> to vector<8xf32>
    %197 = vector.shape_cast %196 : vector<8xf32> to vector<8x1xf32>
    %198 = arith.addf %195, %197 : vector<8x1xf32>
    %c0_20 = arith.constant 0 : index
    %c2_21 = arith.constant 2 : index
    %199 = vector.load %arg7[%c0_20, %c2_21] : memref<8x16xf32, #tpu.memory_space<vmem>>, vector<8x1xf32>
    tpu.vector_store %arg7[%c0_20, %c2_21], %198 {strides = array<i32>} : memref<8x16xf32, #tpu.memory_space<vmem>>, vector<8x1xf32>,
    %cst_22 = arith.constant 0.000000e+00 : f32
    %200 = vector.broadcast %cst_22 : f32 to vector<8x8xf32>
    %201 = vector.extract_strided_slice %4 {offsets = [0, 24], sizes = [8, 1], strides = [1, 1]} : vector<8x128xf32> to vector<8x1xf32>
    %202 = vector.extract_strided_slice %3 {offsets = [24, 0], sizes = [1, 8], strides = [1, 1]} : vector<128x8xf32> to vector<1x8xf32>
    %203 = vector.broadcast %201 : vector<8x1xf32> to vector<8x8xf32>
    %204 = vector.broadcast %202 : vector<1x8xf32> to vector<8x8xf32>
    %205 = arith.subf %203, %204 : vector<8x8xf32>
    %206 = math.absf %205 : vector<8x8xf32>
    %207 = arith.addf %200, %206 : vector<8x8xf32>
    %208 = vector.extract_strided_slice %4 {offsets = [0, 25], sizes = [8, 1], strides = [1, 1]} : vector<8x128xf32> to vector<8x1xf32>
    %209 = vector.extract_strided_slice %3 {offsets = [25, 0], sizes = [1, 8], strides = [1, 1]} : vector<128x8xf32> to vector<1x8xf32>
    %210 = vector.broadcast %208 : vector<8x1xf32> to vector<8x8xf32>
    %211 = vector.broadcast %209 : vector<1x8xf32> to vector<8x8xf32>
    %212 = arith.subf %210, %211 : vector<8x8xf32>
    %213 = math.absf %212 : vector<8x8xf32>
    %214 = arith.addf %207, %213 : vector<8x8xf32>
    %215 = vector.extract_strided_slice %4 {offsets = [0, 26], sizes = [8, 1], strides = [1, 1]} : vector<8x128xf32> to vector<8x1xf32>
    %216 = vector.extract_strided_slice %3 {offsets = [26, 0], sizes = [1, 8], strides = [1, 1]} : vector<128x8xf32> to vector<1x8xf32>
    %217 = vector.broadcast %215 : vector<8x1xf32> to vector<8x8xf32>
    %218 = vector.broadcast %216 : vector<1x8xf32> to vector<8x8xf32>
    %219 = arith.subf %217, %218 : vector<8x8xf32>
    %220 = math.absf %219 : vector<8x8xf32>
    %221 = arith.addf %214, %220 : vector<8x8xf32>
    %222 = vector.extract_strided_slice %4 {offsets = [0, 27], sizes = [8, 1], strides = [1, 1]} : vector<8x128xf32> to vector<8x1xf32>
    %223 = vector.extract_strided_slice %3 {offsets = [27, 0], sizes = [1, 8], strides = [1, 1]} : vector<128x8xf32> to vector<1x8xf32>
    %224 = vector.broadcast %222 : vector<8x1xf32> to vector<8x8xf32>
    %225 = vector.broadcast %223 : vector<1x8xf32> to vector<8x8xf32>
    %226 = arith.subf %224, %225 : vector<8x8xf32>
    %227 = math.absf %226 : vector<8x8xf32>
    %228 = arith.addf %221, %227 : vector<8x8xf32>
    %229 = vector.extract_strided_slice %4 {offsets = [0, 28], sizes = [8, 1], strides = [1, 1]} : vector<8x128xf32> to vector<8x1xf32>
    %230 = vector.extract_strided_slice %3 {offsets = [28, 0], sizes = [1, 8], strides = [1, 1]} : vector<128x8xf32> to vector<1x8xf32>
    %231 = vector.broadcast %229 : vector<8x1xf32> to vector<8x8xf32>
    %232 = vector.broadcast %230 : vector<1x8xf32> to vector<8x8xf32>
    %233 = arith.subf %231, %232 : vector<8x8xf32>
    %234 = math.absf %233 : vector<8x8xf32>
    %235 = arith.addf %228, %234 : vector<8x8xf32>
    %236 = vector.extract_strided_slice %4 {offsets = [0, 29], sizes = [8, 1], strides = [1, 1]} : vector<8x128xf32> to vector<8x1xf32>
    %237 = vector.extract_strided_slice %3 {offsets = [29, 0], sizes = [1, 8], strides = [1, 1]} : vector<128x8xf32> to vector<1x8xf32>
    %238 = vector.broadcast %236 : vector<8x1xf32> to vector<8x8xf32>
    %239 = vector.broadcast %237 : vector<1x8xf32> to vector<8x8xf32>
    %240 = arith.subf %238, %239 : vector<8x8xf32>
    %241 = math.absf %240 : vector<8x8xf32>
    %242 = arith.addf %235, %241 : vector<8x8xf32>
    %243 = vector.extract_strided_slice %4 {offsets = [0, 30], sizes = [8, 1], strides = [1, 1]} : vector<8x128xf32> to vector<8x1xf32>
    %244 = vector.extract_strided_slice %3 {offsets = [30, 0], sizes = [1, 8], strides = [1, 1]} : vector<128x8xf32> to vector<1x8xf32>
    %245 = vector.broadcast %243 : vector<8x1xf32> to vector<8x8xf32>
    %246 = vector.broadcast %244 : vector<1x8xf32> to vector<8x8xf32>
    %247 = arith.subf %245, %246 : vector<8x8xf32>
    %248 = math.absf %247 : vector<8x8xf32>
    %249 = arith.addf %242, %248 : vector<8x8xf32>
    %250 = vector.extract_strided_slice %4 {offsets = [0, 31], sizes = [8, 1], strides = [1, 1]} : vector<8x128xf32> to vector<8x1xf32>
    %251 = vector.extract_strided_slice %3 {offsets = [31, 0], sizes = [1, 8], strides = [1, 1]} : vector<128x8xf32> to vector<1x8xf32>
    %252 = vector.broadcast %250 : vector<8x1xf32> to vector<8x8xf32>
    %253 = vector.broadcast %251 : vector<1x8xf32> to vector<8x8xf32>
    %254 = arith.subf %252, %253 : vector<8x8xf32>
    %255 = math.absf %254 : vector<8x8xf32>
    %256 = arith.addf %249, %255 : vector<8x8xf32>
    %cst_23 = arith.constant -1.000000e+00 : f32
    %257 = vector.broadcast %cst_23 : f32 to vector<8x8xf32>
    %258 = arith.mulf %256, %257 : vector<8x8xf32>
    %259 = math.exp %258 : vector<8x8xf32>
    %c0_24 = arith.constant 0 : index
    %c3 = arith.constant 3 : index
    %260 = vector.load %arg7[%c0_24, %c3] : memref<8x16xf32, #tpu.memory_space<vmem>>, vector<8x1xf32>
    %cst_25 = arith.constant dense<0.000000e+00> : vector<8xf32>
    %261 = vector.multi_reduction <add>, %259, %cst_25 [1] : vector<8x8xf32> to vector<8xf32>
    %262 = vector.shape_cast %261 : vector<8xf32> to vector<8x1xf32>
    %263 = arith.addf %260, %262 : vector<8x1xf32>
    %c0_26 = arith.constant 0 : index
    %c3_27 = arith.constant 3 : index
    %264 = vector.load %arg7[%c0_26, %c3_27] : memref<8x16xf32, #tpu.memory_space<vmem>>, vector<8x1xf32>
    tpu.vector_store %arg7[%c0_26, %c3_27], %263 {strides = array<i32>} : memref<8x16xf32, #tpu.memory_space<vmem>>, vector<8x1xf32>,
    %cst_28 = arith.constant 0.000000e+00 : f32
    %265 = vector.broadcast %cst_28 : f32 to vector<8x8xf32>
    %266 = vector.extract_strided_slice %4 {offsets = [0, 32], sizes = [8, 1], strides = [1, 1]} : vector<8x128xf32> to vector<8x1xf32>
    %267 = vector.extract_strided_slice %3 {offsets = [32, 0], sizes = [1, 8], strides = [1, 1]} : vector<128x8xf32> to vector<1x8xf32>
    %268 = vector.broadcast %266 : vector<8x1xf32> to vector<8x8xf32>
    %269 = vector.broadcast %267 : vector<1x8xf32> to vector<8x8xf32>
    %270 = arith.subf %268, %269 : vector<8x8xf32>
    %271 = math.absf %270 : vector<8x8xf32>
    %272 = arith.addf %265, %271 : vector<8x8xf32>
    %273 = vector.extract_strided_slice %4 {offsets = [0, 33], sizes = [8, 1], strides = [1, 1]} : vector<8x128xf32> to vector<8x1xf32>
    %274 = vector.extract_strided_slice %3 {offsets = [33, 0], sizes = [1, 8], strides = [1, 1]} : vector<128x8xf32> to vector<1x8xf32>
    %275 = vector.broadcast %273 : vector<8x1xf32> to vector<8x8xf32>
    %276 = vector.broadcast %274 : vector<1x8xf32> to vector<8x8xf32>
    %277 = arith.subf %275, %276 : vector<8x8xf32>
    %278 = math.absf %277 : vector<8x8xf32>
    %279 = arith.addf %272, %278 : vector<8x8xf32>
    %280 = vector.extract_strided_slice %4 {offsets = [0, 34], sizes = [8, 1], strides = [1, 1]} : vector<8x128xf32> to vector<8x1xf32>
    %281 = vector.extract_strided_slice %3 {offsets = [34, 0], sizes = [1, 8], strides = [1, 1]} : vector<128x8xf32> to vector<1x8xf32>
    %282 = vector.broadcast %280 : vector<8x1xf32> to vector<8x8xf32>
    %283 = vector.broadcast %281 : vector<1x8xf32> to vector<8x8xf32>
    %284 = arith.subf %282, %283 : vector<8x8xf32>
    %285 = math.absf %284 : vector<8x8xf32>
    %286 = arith.addf %279, %285 : vector<8x8xf32>
    %287 = vector.extract_strided_slice %4 {offsets = [0, 35], sizes = [8, 1], strides = [1, 1]} : vector<8x128xf32> to vector<8x1xf32>
    %288 = vector.extract_strided_slice %3 {offsets = [35, 0], sizes = [1, 8], strides = [1, 1]} : vector<128x8xf32> to vector<1x8xf32>
    %289 = vector.broadcast %287 : vector<8x1xf32> to vector<8x8xf32>
    %290 = vector.broadcast %288 : vector<1x8xf32> to vector<8x8xf32>
    %291 = arith.subf %289, %290 : vector<8x8xf32>
    %292 = math.absf %291 : vector<8x8xf32>
    %293 = arith.addf %286, %292 : vector<8x8xf32>
    %294 = vector.extract_strided_slice %4 {offsets = [0, 36], sizes = [8, 1], strides = [1, 1]} : vector<8x128xf32> to vector<8x1xf32>
    %295 = vector.extract_strided_slice %3 {offsets = [36, 0], sizes = [1, 8], strides = [1, 1]} : vector<128x8xf32> to vector<1x8xf32>
    %296 = vector.broadcast %294 : vector<8x1xf32> to vector<8x8xf32>
    %297 = vector.broadcast %295 : vector<1x8xf32> to vector<8x8xf32>
    %298 = arith.subf %296, %297 : vector<8x8xf32>
    %299 = math.absf %298 : vector<8x8xf32>
    %300 = arith.addf %293, %299 : vector<8x8xf32>
    %301 = vector.extract_strided_slice %4 {offsets = [0, 37], sizes = [8, 1], strides = [1, 1]} : vector<8x128xf32> to vector<8x1xf32>
    %302 = vector.extract_strided_slice %3 {offsets = [37, 0], sizes = [1, 8], strides = [1, 1]} : vector<128x8xf32> to vector<1x8xf32>
    %303 = vector.broadcast %301 : vector<8x1xf32> to vector<8x8xf32>
    %304 = vector.broadcast %302 : vector<1x8xf32> to vector<8x8xf32>
    %305 = arith.subf %303, %304 : vector<8x8xf32>
    %306 = math.absf %305 : vector<8x8xf32>
    %307 = arith.addf %300, %306 : vector<8x8xf32>
    %308 = vector.extract_strided_slice %4 {offsets = [0, 38], sizes = [8, 1], strides = [1, 1]} : vector<8x128xf32> to vector<8x1xf32>
    %309 = vector.extract_strided_slice %3 {offsets = [38, 0], sizes = [1, 8], strides = [1, 1]} : vector<128x8xf32> to vector<1x8xf32>
    %310 = vector.broadcast %308 : vector<8x1xf32> to vector<8x8xf32>
    %311 = vector.broadcast %309 : vector<1x8xf32> to vector<8x8xf32>
    %312 = arith.subf %310, %311 : vector<8x8xf32>
    %313 = math.absf %312 : vector<8x8xf32>
    %314 = arith.addf %307, %313 : vector<8x8xf32>
    %315 = vector.extract_strided_slice %4 {offsets = [0, 39], sizes = [8, 1], strides = [1, 1]} : vector<8x128xf32> to vector<8x1xf32>
    %316 = vector.extract_strided_slice %3 {offsets = [39, 0], sizes = [1, 8], strides = [1, 1]} : vector<128x8xf32> to vector<1x8xf32>
    %317 = vector.broadcast %315 : vector<8x1xf32> to vector<8x8xf32>
    %318 = vector.broadcast %316 : vector<1x8xf32> to vector<8x8xf32>
    %319 = arith.subf %317, %318 : vector<8x8xf32>
    %320 = math.absf %319 : vector<8x8xf32>
    %321 = arith.addf %314, %320 : vector<8x8xf32>
    %cst_29 = arith.constant -1.000000e+00 : f32
    %322 = vector.broadcast %cst_29 : f32 to vector<8x8xf32>
    %323 = arith.mulf %321, %322 : vector<8x8xf32>
    %324 = math.exp %323 : vector<8x8xf32>
    %c0_30 = arith.constant 0 : index
    %c4 = arith.constant 4 : index
    %325 = vector.load %arg7[%c0_30, %c4] : memref<8x16xf32, #tpu.memory_space<vmem>>, vector<8x1xf32>
    %cst_31 = arith.constant dense<0.000000e+00> : vector<8xf32>
    %326 = vector.multi_reduction <add>, %324, %cst_31 [1] : vector<8x8xf32> to vector<8xf32>
    %327 = vector.shape_cast %326 : vector<8xf32> to vector<8x1xf32>
    %328 = arith.addf %325, %327 : vector<8x1xf32>
    %c0_32 = arith.constant 0 : index
    %c4_33 = arith.constant 4 : index
    %329 = vector.load %arg7[%c0_32, %c4_33] : memref<8x16xf32, #tpu.memory_space<vmem>>, vector<8x1xf32>
    tpu.vector_store %arg7[%c0_32, %c4_33], %328 {strides = array<i32>} : memref<8x16xf32, #tpu.memory_space<vmem>>, vector<8x1xf32>,
    %cst_34 = arith.constant 0.000000e+00 : f32
    %330 = vector.broadcast %cst_34 : f32 to vector<8x8xf32>
    %331 = vector.extract_strided_slice %4 {offsets = [0, 40], sizes = [8, 1], strides = [1, 1]} : vector<8x128xf32> to vector<8x1xf32>
    %332 = vector.extract_strided_slice %3 {offsets = [40, 0], sizes = [1, 8], strides = [1, 1]} : vector<128x8xf32> to vector<1x8xf32>
    %333 = vector.broadcast %331 : vector<8x1xf32> to vector<8x8xf32>
    %334 = vector.broadcast %332 : vector<1x8xf32> to vector<8x8xf32>
    %335 = arith.subf %333, %334 : vector<8x8xf32>
    %336 = math.absf %335 : vector<8x8xf32>
    %337 = arith.addf %330, %336 : vector<8x8xf32>
    %338 = vector.extract_strided_slice %4 {offsets = [0, 41], sizes = [8, 1], strides = [1, 1]} : vector<8x128xf32> to vector<8x1xf32>
    %339 = vector.extract_strided_slice %3 {offsets = [41, 0], sizes = [1, 8], strides = [1, 1]} : vector<128x8xf32> to vector<1x8xf32>
    %340 = vector.broadcast %338 : vector<8x1xf32> to vector<8x8xf32>
    %341 = vector.broadcast %339 : vector<1x8xf32> to vector<8x8xf32>
    %342 = arith.subf %340, %341 : vector<8x8xf32>
    %343 = math.absf %342 : vector<8x8xf32>
    %344 = arith.addf %337, %343 : vector<8x8xf32>
    %345 = vector.extract_strided_slice %4 {offsets = [0, 42], sizes = [8, 1], strides = [1, 1]} : vector<8x128xf32> to vector<8x1xf32>
    %346 = vector.extract_strided_slice %3 {offsets = [42, 0], sizes = [1, 8], strides = [1, 1]} : vector<128x8xf32> to vector<1x8xf32>
    %347 = vector.broadcast %345 : vector<8x1xf32> to vector<8x8xf32>
    %348 = vector.broadcast %346 : vector<1x8xf32> to vector<8x8xf32>
    %349 = arith.subf %347, %348 : vector<8x8xf32>
    %350 = math.absf %349 : vector<8x8xf32>
    %351 = arith.addf %344, %350 : vector<8x8xf32>
    %352 = vector.extract_strided_slice %4 {offsets = [0, 43], sizes = [8, 1], strides = [1, 1]} : vector<8x128xf32> to vector<8x1xf32>
    %353 = vector.extract_strided_slice %3 {offsets = [43, 0], sizes = [1, 8], strides = [1, 1]} : vector<128x8xf32> to vector<1x8xf32>
    %354 = vector.broadcast %352 : vector<8x1xf32> to vector<8x8xf32>
    %355 = vector.broadcast %353 : vector<1x8xf32> to vector<8x8xf32>
    %356 = arith.subf %354, %355 : vector<8x8xf32>
    %357 = math.absf %356 : vector<8x8xf32>
    %358 = arith.addf %351, %357 : vector<8x8xf32>
    %359 = vector.extract_strided_slice %4 {offsets = [0, 44], sizes = [8, 1], strides = [1, 1]} : vector<8x128xf32> to vector<8x1xf32>
    %360 = vector.extract_strided_slice %3 {offsets = [44, 0], sizes = [1, 8], strides = [1, 1]} : vector<128x8xf32> to vector<1x8xf32>
    %361 = vector.broadcast %359 : vector<8x1xf32> to vector<8x8xf32>
    %362 = vector.broadcast %360 : vector<1x8xf32> to vector<8x8xf32>
    %363 = arith.subf %361, %362 : vector<8x8xf32>
    %364 = math.absf %363 : vector<8x8xf32>
    %365 = arith.addf %358, %364 : vector<8x8xf32>
    %366 = vector.extract_strided_slice %4 {offsets = [0, 45], sizes = [8, 1], strides = [1, 1]} : vector<8x128xf32> to vector<8x1xf32>
    %367 = vector.extract_strided_slice %3 {offsets = [45, 0], sizes = [1, 8], strides = [1, 1]} : vector<128x8xf32> to vector<1x8xf32>
    %368 = vector.broadcast %366 : vector<8x1xf32> to vector<8x8xf32>
    %369 = vector.broadcast %367 : vector<1x8xf32> to vector<8x8xf32>
    %370 = arith.subf %368, %369 : vector<8x8xf32>
    %371 = math.absf %370 : vector<8x8xf32>
    %372 = arith.addf %365, %371 : vector<8x8xf32>
    %373 = vector.extract_strided_slice %4 {offsets = [0, 46], sizes = [8, 1], strides = [1, 1]} : vector<8x128xf32> to vector<8x1xf32>
    %374 = vector.extract_strided_slice %3 {offsets = [46, 0], sizes = [1, 8], strides = [1, 1]} : vector<128x8xf32> to vector<1x8xf32>
    %375 = vector.broadcast %373 : vector<8x1xf32> to vector<8x8xf32>
    %376 = vector.broadcast %374 : vector<1x8xf32> to vector<8x8xf32>
    %377 = arith.subf %375, %376 : vector<8x8xf32>
    %378 = math.absf %377 : vector<8x8xf32>
    %379 = arith.addf %372, %378 : vector<8x8xf32>
    %380 = vector.extract_strided_slice %4 {offsets = [0, 47], sizes = [8, 1], strides = [1, 1]} : vector<8x128xf32> to vector<8x1xf32>
    %381 = vector.extract_strided_slice %3 {offsets = [47, 0], sizes = [1, 8], strides = [1, 1]} : vector<128x8xf32> to vector<1x8xf32>
    %382 = vector.broadcast %380 : vector<8x1xf32> to vector<8x8xf32>
    %383 = vector.broadcast %381 : vector<1x8xf32> to vector<8x8xf32>
    %384 = arith.subf %382, %383 : vector<8x8xf32>
    %385 = math.absf %384 : vector<8x8xf32>
    %386 = arith.addf %379, %385 : vector<8x8xf32>
    %cst_35 = arith.constant -1.000000e+00 : f32
    %387 = vector.broadcast %cst_35 : f32 to vector<8x8xf32>
    %388 = arith.mulf %386, %387 : vector<8x8xf32>
    %389 = math.exp %388 : vector<8x8xf32>
    %c0_36 = arith.constant 0 : index
    %c5 = arith.constant 5 : index
    %390 = vector.load %arg7[%c0_36, %c5] : memref<8x16xf32, #tpu.memory_space<vmem>>, vector<8x1xf32>
    %cst_37 = arith.constant dense<0.000000e+00> : vector<8xf32>
    %391 = vector.multi_reduction <add>, %389, %cst_37 [1] : vector<8x8xf32> to vector<8xf32>
    %392 = vector.shape_cast %391 : vector<8xf32> to vector<8x1xf32>
    %393 = arith.addf %390, %392 : vector<8x1xf32>
    %c0_38 = arith.constant 0 : index
    %c5_39 = arith.constant 5 : index
    %394 = vector.load %arg7[%c0_38, %c5_39] : memref<8x16xf32, #tpu.memory_space<vmem>>, vector<8x1xf32>
    tpu.vector_store %arg7[%c0_38, %c5_39], %393 {strides = array<i32>} : memref<8x16xf32, #tpu.memory_space<vmem>>, vector<8x1xf32>,
    %cst_40 = arith.constant 0.000000e+00 : f32
    %395 = vector.broadcast %cst_40 : f32 to vector<8x8xf32>
    %396 = vector.extract_strided_slice %4 {offsets = [0, 48], sizes = [8, 1], strides = [1, 1]} : vector<8x128xf32> to vector<8x1xf32>
    %397 = vector.extract_strided_slice %3 {offsets = [48, 0], sizes = [1, 8], strides = [1, 1]} : vector<128x8xf32> to vector<1x8xf32>
    %398 = vector.broadcast %396 : vector<8x1xf32> to vector<8x8xf32>
    %399 = vector.broadcast %397 : vector<1x8xf32> to vector<8x8xf32>
    %400 = arith.subf %398, %399 : vector<8x8xf32>
    %401 = math.absf %400 : vector<8x8xf32>
    %402 = arith.addf %395, %401 : vector<8x8xf32>
    %403 = vector.extract_strided_slice %4 {offsets = [0, 49], sizes = [8, 1], strides = [1, 1]} : vector<8x128xf32> to vector<8x1xf32>
    %404 = vector.extract_strided_slice %3 {offsets = [49, 0], sizes = [1, 8], strides = [1, 1]} : vector<128x8xf32> to vector<1x8xf32>
    %405 = vector.broadcast %403 : vector<8x1xf32> to vector<8x8xf32>
    %406 = vector.broadcast %404 : vector<1x8xf32> to vector<8x8xf32>
    %407 = arith.subf %405, %406 : vector<8x8xf32>
    %408 = math.absf %407 : vector<8x8xf32>
    %409 = arith.addf %402, %408 : vector<8x8xf32>
    %410 = vector.extract_strided_slice %4 {offsets = [0, 50], sizes = [8, 1], strides = [1, 1]} : vector<8x128xf32> to vector<8x1xf32>
    %411 = vector.extract_strided_slice %3 {offsets = [50, 0], sizes = [1, 8], strides = [1, 1]} : vector<128x8xf32> to vector<1x8xf32>
    %412 = vector.broadcast %410 : vector<8x1xf32> to vector<8x8xf32>
    %413 = vector.broadcast %411 : vector<1x8xf32> to vector<8x8xf32>
    %414 = arith.subf %412, %413 : vector<8x8xf32>
    %415 = math.absf %414 : vector<8x8xf32>
    %416 = arith.addf %409, %415 : vector<8x8xf32>
    %417 = vector.extract_strided_slice %4 {offsets = [0, 51], sizes = [8, 1], strides = [1, 1]} : vector<8x128xf32> to vector<8x1xf32>
    %418 = vector.extract_strided_slice %3 {offsets = [51, 0], sizes = [1, 8], strides = [1, 1]} : vector<128x8xf32> to vector<1x8xf32>
    %419 = vector.broadcast %417 : vector<8x1xf32> to vector<8x8xf32>
    %420 = vector.broadcast %418 : vector<1x8xf32> to vector<8x8xf32>
    %421 = arith.subf %419, %420 : vector<8x8xf32>
    %422 = math.absf %421 : vector<8x8xf32>
    %423 = arith.addf %416, %422 : vector<8x8xf32>
    %424 = vector.extract_strided_slice %4 {offsets = [0, 52], sizes = [8, 1], strides = [1, 1]} : vector<8x128xf32> to vector<8x1xf32>
    %425 = vector.extract_strided_slice %3 {offsets = [52, 0], sizes = [1, 8], strides = [1, 1]} : vector<128x8xf32> to vector<1x8xf32>
    %426 = vector.broadcast %424 : vector<8x1xf32> to vector<8x8xf32>
    %427 = vector.broadcast %425 : vector<1x8xf32> to vector<8x8xf32>
    %428 = arith.subf %426, %427 : vector<8x8xf32>
    %429 = math.absf %428 : vector<8x8xf32>
    %430 = arith.addf %423, %429 : vector<8x8xf32>
    %431 = vector.extract_strided_slice %4 {offsets = [0, 53], sizes = [8, 1], strides = [1, 1]} : vector<8x128xf32> to vector<8x1xf32>
    %432 = vector.extract_strided_slice %3 {offsets = [53, 0], sizes = [1, 8], strides = [1, 1]} : vector<128x8xf32> to vector<1x8xf32>
    %433 = vector.broadcast %431 : vector<8x1xf32> to vector<8x8xf32>
    %434 = vector.broadcast %432 : vector<1x8xf32> to vector<8x8xf32>
    %435 = arith.subf %433, %434 : vector<8x8xf32>
    %436 = math.absf %435 : vector<8x8xf32>
    %437 = arith.addf %430, %436 : vector<8x8xf32>
    %438 = vector.extract_strided_slice %4 {offsets = [0, 54], sizes = [8, 1], strides = [1, 1]} : vector<8x128xf32> to vector<8x1xf32>
    %439 = vector.extract_strided_slice %3 {offsets = [54, 0], sizes = [1, 8], strides = [1, 1]} : vector<128x8xf32> to vector<1x8xf32>
    %440 = vector.broadcast %438 : vector<8x1xf32> to vector<8x8xf32>
    %441 = vector.broadcast %439 : vector<1x8xf32> to vector<8x8xf32>
    %442 = arith.subf %440, %441 : vector<8x8xf32>
    %443 = math.absf %442 : vector<8x8xf32>
    %444 = arith.addf %437, %443 : vector<8x8xf32>
    %445 = vector.extract_strided_slice %4 {offsets = [0, 55], sizes = [8, 1], strides = [1, 1]} : vector<8x128xf32> to vector<8x1xf32>
    %446 = vector.extract_strided_slice %3 {offsets = [55, 0], sizes = [1, 8], strides = [1, 1]} : vector<128x8xf32> to vector<1x8xf32>
    %447 = vector.broadcast %445 : vector<8x1xf32> to vector<8x8xf32>
    %448 = vector.broadcast %446 : vector<1x8xf32> to vector<8x8xf32>
    %449 = arith.subf %447, %448 : vector<8x8xf32>
    %450 = math.absf %449 : vector<8x8xf32>
    %451 = arith.addf %444, %450 : vector<8x8xf32>
    %cst_41 = arith.constant -1.000000e+00 : f32
    %452 = vector.broadcast %cst_41 : f32 to vector<8x8xf32>
    %453 = arith.mulf %451, %452 : vector<8x8xf32>
    %454 = math.exp %453 : vector<8x8xf32>
    %c0_42 = arith.constant 0 : index
    %c6 = arith.constant 6 : index
    %455 = vector.load %arg7[%c0_42, %c6] : memref<8x16xf32, #tpu.memory_space<vmem>>, vector<8x1xf32>
    %cst_43 = arith.constant dense<0.000000e+00> : vector<8xf32>
    %456 = vector.multi_reduction <add>, %454, %cst_43 [1] : vector<8x8xf32> to vector<8xf32>
    %457 = vector.shape_cast %456 : vector<8xf32> to vector<8x1xf32>
    %458 = arith.addf %455, %457 : vector<8x1xf32>
    %c0_44 = arith.constant 0 : index
    %c6_45 = arith.constant 6 : index
    %459 = vector.load %arg7[%c0_44, %c6_45] : memref<8x16xf32, #tpu.memory_space<vmem>>, vector<8x1xf32>
    tpu.vector_store %arg7[%c0_44, %c6_45], %458 {strides = array<i32>} : memref<8x16xf32, #tpu.memory_space<vmem>>, vector<8x1xf32>,
    %cst_46 = arith.constant 0.000000e+00 : f32
    %460 = vector.broadcast %cst_46 : f32 to vector<8x8xf32>
    %461 = vector.extract_strided_slice %4 {offsets = [0, 56], sizes = [8, 1], strides = [1, 1]} : vector<8x128xf32> to vector<8x1xf32>
    %462 = vector.extract_strided_slice %3 {offsets = [56, 0], sizes = [1, 8], strides = [1, 1]} : vector<128x8xf32> to vector<1x8xf32>
    %463 = vector.broadcast %461 : vector<8x1xf32> to vector<8x8xf32>
    %464 = vector.broadcast %462 : vector<1x8xf32> to vector<8x8xf32>
    %465 = arith.subf %463, %464 : vector<8x8xf32>
    %466 = math.absf %465 : vector<8x8xf32>
    %467 = arith.addf %460, %466 : vector<8x8xf32>
    %468 = vector.extract_strided_slice %4 {offsets = [0, 57], sizes = [8, 1], strides = [1, 1]} : vector<8x128xf32> to vector<8x1xf32>
    %469 = vector.extract_strided_slice %3 {offsets = [57, 0], sizes = [1, 8], strides = [1, 1]} : vector<128x8xf32> to vector<1x8xf32>
    %470 = vector.broadcast %468 : vector<8x1xf32> to vector<8x8xf32>
    %471 = vector.broadcast %469 : vector<1x8xf32> to vector<8x8xf32>
    %472 = arith.subf %470, %471 : vector<8x8xf32>
    %473 = math.absf %472 : vector<8x8xf32>
    %474 = arith.addf %467, %473 : vector<8x8xf32>
    %475 = vector.extract_strided_slice %4 {offsets = [0, 58], sizes = [8, 1], strides = [1, 1]} : vector<8x128xf32> to vector<8x1xf32>
    %476 = vector.extract_strided_slice %3 {offsets = [58, 0], sizes = [1, 8], strides = [1, 1]} : vector<128x8xf32> to vector<1x8xf32>
    %477 = vector.broadcast %475 : vector<8x1xf32> to vector<8x8xf32>
    %478 = vector.broadcast %476 : vector<1x8xf32> to vector<8x8xf32>
    %479 = arith.subf %477, %478 : vector<8x8xf32>
    %480 = math.absf %479 : vector<8x8xf32>
    %481 = arith.addf %474, %480 : vector<8x8xf32>
    %482 = vector.extract_strided_slice %4 {offsets = [0, 59], sizes = [8, 1], strides = [1, 1]} : vector<8x128xf32> to vector<8x1xf32>
    %483 = vector.extract_strided_slice %3 {offsets = [59, 0], sizes = [1, 8], strides = [1, 1]} : vector<128x8xf32> to vector<1x8xf32>
    %484 = vector.broadcast %482 : vector<8x1xf32> to vector<8x8xf32>
    %485 = vector.broadcast %483 : vector<1x8xf32> to vector<8x8xf32>
    %486 = arith.subf %484, %485 : vector<8x8xf32>
    %487 = math.absf %486 : vector<8x8xf32>
    %488 = arith.addf %481, %487 : vector<8x8xf32>
    %489 = vector.extract_strided_slice %4 {offsets = [0, 60], sizes = [8, 1], strides = [1, 1]} : vector<8x128xf32> to vector<8x1xf32>
    %490 = vector.extract_strided_slice %3 {offsets = [60, 0], sizes = [1, 8], strides = [1, 1]} : vector<128x8xf32> to vector<1x8xf32>
    %491 = vector.broadcast %489 : vector<8x1xf32> to vector<8x8xf32>
    %492 = vector.broadcast %490 : vector<1x8xf32> to vector<8x8xf32>
    %493 = arith.subf %491, %492 : vector<8x8xf32>
    %494 = math.absf %493 : vector<8x8xf32>
    %495 = arith.addf %488, %494 : vector<8x8xf32>
    %496 = vector.extract_strided_slice %4 {offsets = [0, 61], sizes = [8, 1], strides = [1, 1]} : vector<8x128xf32> to vector<8x1xf32>
    %497 = vector.extract_strided_slice %3 {offsets = [61, 0], sizes = [1, 8], strides = [1, 1]} : vector<128x8xf32> to vector<1x8xf32>
    %498 = vector.broadcast %496 : vector<8x1xf32> to vector<8x8xf32>
    %499 = vector.broadcast %497 : vector<1x8xf32> to vector<8x8xf32>
    %500 = arith.subf %498, %499 : vector<8x8xf32>
    %501 = math.absf %500 : vector<8x8xf32>
    %502 = arith.addf %495, %501 : vector<8x8xf32>
    %503 = vector.extract_strided_slice %4 {offsets = [0, 62], sizes = [8, 1], strides = [1, 1]} : vector<8x128xf32> to vector<8x1xf32>
    %504 = vector.extract_strided_slice %3 {offsets = [62, 0], sizes = [1, 8], strides = [1, 1]} : vector<128x8xf32> to vector<1x8xf32>
    %505 = vector.broadcast %503 : vector<8x1xf32> to vector<8x8xf32>
    %506 = vector.broadcast %504 : vector<1x8xf32> to vector<8x8xf32>
    %507 = arith.subf %505, %506 : vector<8x8xf32>
    %508 = math.absf %507 : vector<8x8xf32>
    %509 = arith.addf %502, %508 : vector<8x8xf32>
    %510 = vector.extract_strided_slice %4 {offsets = [0, 63], sizes = [8, 1], strides = [1, 1]} : vector<8x128xf32> to vector<8x1xf32>
    %511 = vector.extract_strided_slice %3 {offsets = [63, 0], sizes = [1, 8], strides = [1, 1]} : vector<128x8xf32> to vector<1x8xf32>
    %512 = vector.broadcast %510 : vector<8x1xf32> to vector<8x8xf32>
    %513 = vector.broadcast %511 : vector<1x8xf32> to vector<8x8xf32>
    %514 = arith.subf %512, %513 : vector<8x8xf32>
    %515 = math.absf %514 : vector<8x8xf32>
    %516 = arith.addf %509, %515 : vector<8x8xf32>
    %cst_47 = arith.constant -1.000000e+00 : f32
    %517 = vector.broadcast %cst_47 : f32 to vector<8x8xf32>
    %518 = arith.mulf %516, %517 : vector<8x8xf32>
    %519 = math.exp %518 : vector<8x8xf32>
    %c0_48 = arith.constant 0 : index
    %c7 = arith.constant 7 : index
    %520 = vector.load %arg7[%c0_48, %c7] : memref<8x16xf32, #tpu.memory_space<vmem>>, vector<8x1xf32>
    %cst_49 = arith.constant dense<0.000000e+00> : vector<8xf32>
    %521 = vector.multi_reduction <add>, %519, %cst_49 [1] : vector<8x8xf32> to vector<8xf32>
    %522 = vector.shape_cast %521 : vector<8xf32> to vector<8x1xf32>
    %523 = arith.addf %520, %522 : vector<8x1xf32>
    %c0_50 = arith.constant 0 : index
    %c7_51 = arith.constant 7 : index
    %524 = vector.load %arg7[%c0_50, %c7_51] : memref<8x16xf32, #tpu.memory_space<vmem>>, vector<8x1xf32>
    tpu.vector_store %arg7[%c0_50, %c7_51], %523 {strides = array<i32>} : memref<8x16xf32, #tpu.memory_space<vmem>>, vector<8x1xf32>,
    %cst_52 = arith.constant 0.000000e+00 : f32
    %525 = vector.broadcast %cst_52 : f32 to vector<8x8xf32>
    %526 = vector.extract_strided_slice %4 {offsets = [0, 64], sizes = [8, 1], strides = [1, 1]} : vector<8x128xf32> to vector<8x1xf32>
    %527 = vector.extract_strided_slice %3 {offsets = [64, 0], sizes = [1, 8], strides = [1, 1]} : vector<128x8xf32> to vector<1x8xf32>
    %528 = vector.broadcast %526 : vector<8x1xf32> to vector<8x8xf32>
    %529 = vector.broadcast %527 : vector<1x8xf32> to vector<8x8xf32>
    %530 = arith.subf %528, %529 : vector<8x8xf32>
    %531 = math.absf %530 : vector<8x8xf32>
    %532 = arith.addf %525, %531 : vector<8x8xf32>
    %533 = vector.extract_strided_slice %4 {offsets = [0, 65], sizes = [8, 1], strides = [1, 1]} : vector<8x128xf32> to vector<8x1xf32>
    %534 = vector.extract_strided_slice %3 {offsets = [65, 0], sizes = [1, 8], strides = [1, 1]} : vector<128x8xf32> to vector<1x8xf32>
    %535 = vector.broadcast %533 : vector<8x1xf32> to vector<8x8xf32>
    %536 = vector.broadcast %534 : vector<1x8xf32> to vector<8x8xf32>
    %537 = arith.subf %535, %536 : vector<8x8xf32>
    %538 = math.absf %537 : vector<8x8xf32>
    %539 = arith.addf %532, %538 : vector<8x8xf32>
    %540 = vector.extract_strided_slice %4 {offsets = [0, 66], sizes = [8, 1], strides = [1, 1]} : vector<8x128xf32> to vector<8x1xf32>
    %541 = vector.extract_strided_slice %3 {offsets = [66, 0], sizes = [1, 8], strides = [1, 1]} : vector<128x8xf32> to vector<1x8xf32>
    %542 = vector.broadcast %540 : vector<8x1xf32> to vector<8x8xf32>
    %543 = vector.broadcast %541 : vector<1x8xf32> to vector<8x8xf32>
    %544 = arith.subf %542, %543 : vector<8x8xf32>
    %545 = math.absf %544 : vector<8x8xf32>
    %546 = arith.addf %539, %545 : vector<8x8xf32>
    %547 = vector.extract_strided_slice %4 {offsets = [0, 67], sizes = [8, 1], strides = [1, 1]} : vector<8x128xf32> to vector<8x1xf32>
    %548 = vector.extract_strided_slice %3 {offsets = [67, 0], sizes = [1, 8], strides = [1, 1]} : vector<128x8xf32> to vector<1x8xf32>
    %549 = vector.broadcast %547 : vector<8x1xf32> to vector<8x8xf32>
    %550 = vector.broadcast %548 : vector<1x8xf32> to vector<8x8xf32>
    %551 = arith.subf %549, %550 : vector<8x8xf32>
    %552 = math.absf %551 : vector<8x8xf32>
    %553 = arith.addf %546, %552 : vector<8x8xf32>
    %554 = vector.extract_strided_slice %4 {offsets = [0, 68], sizes = [8, 1], strides = [1, 1]} : vector<8x128xf32> to vector<8x1xf32>
    %555 = vector.extract_strided_slice %3 {offsets = [68, 0], sizes = [1, 8], strides = [1, 1]} : vector<128x8xf32> to vector<1x8xf32>
    %556 = vector.broadcast %554 : vector<8x1xf32> to vector<8x8xf32>
    %557 = vector.broadcast %555 : vector<1x8xf32> to vector<8x8xf32>
    %558 = arith.subf %556, %557 : vector<8x8xf32>
    %559 = math.absf %558 : vector<8x8xf32>
    %560 = arith.addf %553, %559 : vector<8x8xf32>
    %561 = vector.extract_strided_slice %4 {offsets = [0, 69], sizes = [8, 1], strides = [1, 1]} : vector<8x128xf32> to vector<8x1xf32>
    %562 = vector.extract_strided_slice %3 {offsets = [69, 0], sizes = [1, 8], strides = [1, 1]} : vector<128x8xf32> to vector<1x8xf32>
    %563 = vector.broadcast %561 : vector<8x1xf32> to vector<8x8xf32>
    %564 = vector.broadcast %562 : vector<1x8xf32> to vector<8x8xf32>
    %565 = arith.subf %563, %564 : vector<8x8xf32>
    %566 = math.absf %565 : vector<8x8xf32>
    %567 = arith.addf %560, %566 : vector<8x8xf32>
    %568 = vector.extract_strided_slice %4 {offsets = [0, 70], sizes = [8, 1], strides = [1, 1]} : vector<8x128xf32> to vector<8x1xf32>
    %569 = vector.extract_strided_slice %3 {offsets = [70, 0], sizes = [1, 8], strides = [1, 1]} : vector<128x8xf32> to vector<1x8xf32>
    %570 = vector.broadcast %568 : vector<8x1xf32> to vector<8x8xf32>
    %571 = vector.broadcast %569 : vector<1x8xf32> to vector<8x8xf32>
    %572 = arith.subf %570, %571 : vector<8x8xf32>
    %573 = math.absf %572 : vector<8x8xf32>
    %574 = arith.addf %567, %573 : vector<8x8xf32>
    %575 = vector.extract_strided_slice %4 {offsets = [0, 71], sizes = [8, 1], strides = [1, 1]} : vector<8x128xf32> to vector<8x1xf32>
    %576 = vector.extract_strided_slice %3 {offsets = [71, 0], sizes = [1, 8], strides = [1, 1]} : vector<128x8xf32> to vector<1x8xf32>
    %577 = vector.broadcast %575 : vector<8x1xf32> to vector<8x8xf32>
    %578 = vector.broadcast %576 : vector<1x8xf32> to vector<8x8xf32>
    %579 = arith.subf %577, %578 : vector<8x8xf32>
    %580 = math.absf %579 : vector<8x8xf32>
    %581 = arith.addf %574, %580 : vector<8x8xf32>
    %cst_53 = arith.constant -1.000000e+00 : f32
    %582 = vector.broadcast %cst_53 : f32 to vector<8x8xf32>
    %583 = arith.mulf %581, %582 : vector<8x8xf32>
    %584 = math.exp %583 : vector<8x8xf32>
    %c0_54 = arith.constant 0 : index
    %c8 = arith.constant 8 : index
    %585 = vector.load %arg7[%c0_54, %c8] : memref<8x16xf32, #tpu.memory_space<vmem>>, vector<8x1xf32>
    %cst_55 = arith.constant dense<0.000000e+00> : vector<8xf32>
    %586 = vector.multi_reduction <add>, %584, %cst_55 [1] : vector<8x8xf32> to vector<8xf32>
    %587 = vector.shape_cast %586 : vector<8xf32> to vector<8x1xf32>
    %588 = arith.addf %585, %587 : vector<8x1xf32>
    %c0_56 = arith.constant 0 : index
    %c8_57 = arith.constant 8 : index
    %589 = vector.load %arg7[%c0_56, %c8_57] : memref<8x16xf32, #tpu.memory_space<vmem>>, vector<8x1xf32>
    tpu.vector_store %arg7[%c0_56, %c8_57], %588 {strides = array<i32>} : memref<8x16xf32, #tpu.memory_space<vmem>>, vector<8x1xf32>,
    %cst_58 = arith.constant 0.000000e+00 : f32
    %590 = vector.broadcast %cst_58 : f32 to vector<8x8xf32>
    %591 = vector.extract_strided_slice %4 {offsets = [0, 72], sizes = [8, 1], strides = [1, 1]} : vector<8x128xf32> to vector<8x1xf32>
    %592 = vector.extract_strided_slice %3 {offsets = [72, 0], sizes = [1, 8], strides = [1, 1]} : vector<128x8xf32> to vector<1x8xf32>
    %593 = vector.broadcast %591 : vector<8x1xf32> to vector<8x8xf32>
    %594 = vector.broadcast %592 : vector<1x8xf32> to vector<8x8xf32>
    %595 = arith.subf %593, %594 : vector<8x8xf32>
    %596 = math.absf %595 : vector<8x8xf32>
    %597 = arith.addf %590, %596 : vector<8x8xf32>
    %598 = vector.extract_strided_slice %4 {offsets = [0, 73], sizes = [8, 1], strides = [1, 1]} : vector<8x128xf32> to vector<8x1xf32>
    %599 = vector.extract_strided_slice %3 {offsets = [73, 0], sizes = [1, 8], strides = [1, 1]} : vector<128x8xf32> to vector<1x8xf32>
    %600 = vector.broadcast %598 : vector<8x1xf32> to vector<8x8xf32>
    %601 = vector.broadcast %599 : vector<1x8xf32> to vector<8x8xf32>
    %602 = arith.subf %600, %601 : vector<8x8xf32>
    %603 = math.absf %602 : vector<8x8xf32>
    %604 = arith.addf %597, %603 : vector<8x8xf32>
    %605 = vector.extract_strided_slice %4 {offsets = [0, 74], sizes = [8, 1], strides = [1, 1]} : vector<8x128xf32> to vector<8x1xf32>
    %606 = vector.extract_strided_slice %3 {offsets = [74, 0], sizes = [1, 8], strides = [1, 1]} : vector<128x8xf32> to vector<1x8xf32>
    %607 = vector.broadcast %605 : vector<8x1xf32> to vector<8x8xf32>
    %608 = vector.broadcast %606 : vector<1x8xf32> to vector<8x8xf32>
    %609 = arith.subf %607, %608 : vector<8x8xf32>
    %610 = math.absf %609 : vector<8x8xf32>
    %611 = arith.addf %604, %610 : vector<8x8xf32>
    %612 = vector.extract_strided_slice %4 {offsets = [0, 75], sizes = [8, 1], strides = [1, 1]} : vector<8x128xf32> to vector<8x1xf32>
    %613 = vector.extract_strided_slice %3 {offsets = [75, 0], sizes = [1, 8], strides = [1, 1]} : vector<128x8xf32> to vector<1x8xf32>
    %614 = vector.broadcast %612 : vector<8x1xf32> to vector<8x8xf32>
    %615 = vector.broadcast %613 : vector<1x8xf32> to vector<8x8xf32>
    %616 = arith.subf %614, %615 : vector<8x8xf32>
    %617 = math.absf %616 : vector<8x8xf32>
    %618 = arith.addf %611, %617 : vector<8x8xf32>
    %619 = vector.extract_strided_slice %4 {offsets = [0, 76], sizes = [8, 1], strides = [1, 1]} : vector<8x128xf32> to vector<8x1xf32>
    %620 = vector.extract_strided_slice %3 {offsets = [76, 0], sizes = [1, 8], strides = [1, 1]} : vector<128x8xf32> to vector<1x8xf32>
    %621 = vector.broadcast %619 : vector<8x1xf32> to vector<8x8xf32>
    %622 = vector.broadcast %620 : vector<1x8xf32> to vector<8x8xf32>
    %623 = arith.subf %621, %622 : vector<8x8xf32>
    %624 = math.absf %623 : vector<8x8xf32>
    %625 = arith.addf %618, %624 : vector<8x8xf32>
    %626 = vector.extract_strided_slice %4 {offsets = [0, 77], sizes = [8, 1], strides = [1, 1]} : vector<8x128xf32> to vector<8x1xf32>
    %627 = vector.extract_strided_slice %3 {offsets = [77, 0], sizes = [1, 8], strides = [1, 1]} : vector<128x8xf32> to vector<1x8xf32>
    %628 = vector.broadcast %626 : vector<8x1xf32> to vector<8x8xf32>
    %629 = vector.broadcast %627 : vector<1x8xf32> to vector<8x8xf32>
    %630 = arith.subf %628, %629 : vector<8x8xf32>
    %631 = math.absf %630 : vector<8x8xf32>
    %632 = arith.addf %625, %631 : vector<8x8xf32>
    %633 = vector.extract_strided_slice %4 {offsets = [0, 78], sizes = [8, 1], strides = [1, 1]} : vector<8x128xf32> to vector<8x1xf32>
    %634 = vector.extract_strided_slice %3 {offsets = [78, 0], sizes = [1, 8], strides = [1, 1]} : vector<128x8xf32> to vector<1x8xf32>
    %635 = vector.broadcast %633 : vector<8x1xf32> to vector<8x8xf32>
    %636 = vector.broadcast %634 : vector<1x8xf32> to vector<8x8xf32>
    %637 = arith.subf %635, %636 : vector<8x8xf32>
    %638 = math.absf %637 : vector<8x8xf32>
    %639 = arith.addf %632, %638 : vector<8x8xf32>
    %640 = vector.extract_strided_slice %4 {offsets = [0, 79], sizes = [8, 1], strides = [1, 1]} : vector<8x128xf32> to vector<8x1xf32>
    %641 = vector.extract_strided_slice %3 {offsets = [79, 0], sizes = [1, 8], strides = [1, 1]} : vector<128x8xf32> to vector<1x8xf32>
    %642 = vector.broadcast %640 : vector<8x1xf32> to vector<8x8xf32>
    %643 = vector.broadcast %641 : vector<1x8xf32> to vector<8x8xf32>
    %644 = arith.subf %642, %643 : vector<8x8xf32>
    %645 = math.absf %644 : vector<8x8xf32>
    %646 = arith.addf %639, %645 : vector<8x8xf32>
    %cst_59 = arith.constant -1.000000e+00 : f32
    %647 = vector.broadcast %cst_59 : f32 to vector<8x8xf32>
    %648 = arith.mulf %646, %647 : vector<8x8xf32>
    %649 = math.exp %648 : vector<8x8xf32>
    %c0_60 = arith.constant 0 : index
    %c9 = arith.constant 9 : index
    %650 = vector.load %arg7[%c0_60, %c9] : memref<8x16xf32, #tpu.memory_space<vmem>>, vector<8x1xf32>
    %cst_61 = arith.constant dense<0.000000e+00> : vector<8xf32>
    %651 = vector.multi_reduction <add>, %649, %cst_61 [1] : vector<8x8xf32> to vector<8xf32>
    %652 = vector.shape_cast %651 : vector<8xf32> to vector<8x1xf32>
    %653 = arith.addf %650, %652 : vector<8x1xf32>
    %c0_62 = arith.constant 0 : index
    %c9_63 = arith.constant 9 : index
    %654 = vector.load %arg7[%c0_62, %c9_63] : memref<8x16xf32, #tpu.memory_space<vmem>>, vector<8x1xf32>
    tpu.vector_store %arg7[%c0_62, %c9_63], %653 {strides = array<i32>} : memref<8x16xf32, #tpu.memory_space<vmem>>, vector<8x1xf32>,
    %cst_64 = arith.constant 0.000000e+00 : f32
    %655 = vector.broadcast %cst_64 : f32 to vector<8x8xf32>
    %656 = vector.extract_strided_slice %4 {offsets = [0, 80], sizes = [8, 1], strides = [1, 1]} : vector<8x128xf32> to vector<8x1xf32>
    %657 = vector.extract_strided_slice %3 {offsets = [80, 0], sizes = [1, 8], strides = [1, 1]} : vector<128x8xf32> to vector<1x8xf32>
    %658 = vector.broadcast %656 : vector<8x1xf32> to vector<8x8xf32>
    %659 = vector.broadcast %657 : vector<1x8xf32> to vector<8x8xf32>
    %660 = arith.subf %658, %659 : vector<8x8xf32>
    %661 = math.absf %660 : vector<8x8xf32>
    %662 = arith.addf %655, %661 : vector<8x8xf32>
    %663 = vector.extract_strided_slice %4 {offsets = [0, 81], sizes = [8, 1], strides = [1, 1]} : vector<8x128xf32> to vector<8x1xf32>
    %664 = vector.extract_strided_slice %3 {offsets = [81, 0], sizes = [1, 8], strides = [1, 1]} : vector<128x8xf32> to vector<1x8xf32>
    %665 = vector.broadcast %663 : vector<8x1xf32> to vector<8x8xf32>
    %666 = vector.broadcast %664 : vector<1x8xf32> to vector<8x8xf32>
    %667 = arith.subf %665, %666 : vector<8x8xf32>
    %668 = math.absf %667 : vector<8x8xf32>
    %669 = arith.addf %662, %668 : vector<8x8xf32>
    %670 = vector.extract_strided_slice %4 {offsets = [0, 82], sizes = [8, 1], strides = [1, 1]} : vector<8x128xf32> to vector<8x1xf32>
    %671 = vector.extract_strided_slice %3 {offsets = [82, 0], sizes = [1, 8], strides = [1, 1]} : vector<128x8xf32> to vector<1x8xf32>
    %672 = vector.broadcast %670 : vector<8x1xf32> to vector<8x8xf32>
    %673 = vector.broadcast %671 : vector<1x8xf32> to vector<8x8xf32>
    %674 = arith.subf %672, %673 : vector<8x8xf32>
    %675 = math.absf %674 : vector<8x8xf32>
    %676 = arith.addf %669, %675 : vector<8x8xf32>
    %677 = vector.extract_strided_slice %4 {offsets = [0, 83], sizes = [8, 1], strides = [1, 1]} : vector<8x128xf32> to vector<8x1xf32>
    %678 = vector.extract_strided_slice %3 {offsets = [83, 0], sizes = [1, 8], strides = [1, 1]} : vector<128x8xf32> to vector<1x8xf32>
    %679 = vector.broadcast %677 : vector<8x1xf32> to vector<8x8xf32>
    %680 = vector.broadcast %678 : vector<1x8xf32> to vector<8x8xf32>
    %681 = arith.subf %679, %680 : vector<8x8xf32>
    %682 = math.absf %681 : vector<8x8xf32>
    %683 = arith.addf %676, %682 : vector<8x8xf32>
    %684 = vector.extract_strided_slice %4 {offsets = [0, 84], sizes = [8, 1], strides = [1, 1]} : vector<8x128xf32> to vector<8x1xf32>
    %685 = vector.extract_strided_slice %3 {offsets = [84, 0], sizes = [1, 8], strides = [1, 1]} : vector<128x8xf32> to vector<1x8xf32>
    %686 = vector.broadcast %684 : vector<8x1xf32> to vector<8x8xf32>
    %687 = vector.broadcast %685 : vector<1x8xf32> to vector<8x8xf32>
    %688 = arith.subf %686, %687 : vector<8x8xf32>
    %689 = math.absf %688 : vector<8x8xf32>
    %690 = arith.addf %683, %689 : vector<8x8xf32>
    %691 = vector.extract_strided_slice %4 {offsets = [0, 85], sizes = [8, 1], strides = [1, 1]} : vector<8x128xf32> to vector<8x1xf32>
    %692 = vector.extract_strided_slice %3 {offsets = [85, 0], sizes = [1, 8], strides = [1, 1]} : vector<128x8xf32> to vector<1x8xf32>
    %693 = vector.broadcast %691 : vector<8x1xf32> to vector<8x8xf32>
    %694 = vector.broadcast %692 : vector<1x8xf32> to vector<8x8xf32>
    %695 = arith.subf %693, %694 : vector<8x8xf32>
    %696 = math.absf %695 : vector<8x8xf32>
    %697 = arith.addf %690, %696 : vector<8x8xf32>
    %698 = vector.extract_strided_slice %4 {offsets = [0, 86], sizes = [8, 1], strides = [1, 1]} : vector<8x128xf32> to vector<8x1xf32>
    %699 = vector.extract_strided_slice %3 {offsets = [86, 0], sizes = [1, 8], strides = [1, 1]} : vector<128x8xf32> to vector<1x8xf32>
    %700 = vector.broadcast %698 : vector<8x1xf32> to vector<8x8xf32>
    %701 = vector.broadcast %699 : vector<1x8xf32> to vector<8x8xf32>
    %702 = arith.subf %700, %701 : vector<8x8xf32>
    %703 = math.absf %702 : vector<8x8xf32>
    %704 = arith.addf %697, %703 : vector<8x8xf32>
    %705 = vector.extract_strided_slice %4 {offsets = [0, 87], sizes = [8, 1], strides = [1, 1]} : vector<8x128xf32> to vector<8x1xf32>
    %706 = vector.extract_strided_slice %3 {offsets = [87, 0], sizes = [1, 8], strides = [1, 1]} : vector<128x8xf32> to vector<1x8xf32>
    %707 = vector.broadcast %705 : vector<8x1xf32> to vector<8x8xf32>
    %708 = vector.broadcast %706 : vector<1x8xf32> to vector<8x8xf32>
    %709 = arith.subf %707, %708 : vector<8x8xf32>
    %710 = math.absf %709 : vector<8x8xf32>
    %711 = arith.addf %704, %710 : vector<8x8xf32>
    %cst_65 = arith.constant -1.000000e+00 : f32
    %712 = vector.broadcast %cst_65 : f32 to vector<8x8xf32>
    %713 = arith.mulf %711, %712 : vector<8x8xf32>
    %714 = math.exp %713 : vector<8x8xf32>
    %c0_66 = arith.constant 0 : index
    %c10 = arith.constant 10 : index
    %715 = vector.load %arg7[%c0_66, %c10] : memref<8x16xf32, #tpu.memory_space<vmem>>, vector<8x1xf32>
    %cst_67 = arith.constant dense<0.000000e+00> : vector<8xf32>
    %716 = vector.multi_reduction <add>, %714, %cst_67 [1] : vector<8x8xf32> to vector<8xf32>
    %717 = vector.shape_cast %716 : vector<8xf32> to vector<8x1xf32>
    %718 = arith.addf %715, %717 : vector<8x1xf32>
    %c0_68 = arith.constant 0 : index
    %c10_69 = arith.constant 10 : index
    %719 = vector.load %arg7[%c0_68, %c10_69] : memref<8x16xf32, #tpu.memory_space<vmem>>, vector<8x1xf32>
    tpu.vector_store %arg7[%c0_68, %c10_69], %718 {strides = array<i32>} : memref<8x16xf32, #tpu.memory_space<vmem>>, vector<8x1xf32>,
    %cst_70 = arith.constant 0.000000e+00 : f32
    %720 = vector.broadcast %cst_70 : f32 to vector<8x8xf32>
    %721 = vector.extract_strided_slice %4 {offsets = [0, 88], sizes = [8, 1], strides = [1, 1]} : vector<8x128xf32> to vector<8x1xf32>
    %722 = vector.extract_strided_slice %3 {offsets = [88, 0], sizes = [1, 8], strides = [1, 1]} : vector<128x8xf32> to vector<1x8xf32>
    %723 = vector.broadcast %721 : vector<8x1xf32> to vector<8x8xf32>
    %724 = vector.broadcast %722 : vector<1x8xf32> to vector<8x8xf32>
    %725 = arith.subf %723, %724 : vector<8x8xf32>
    %726 = math.absf %725 : vector<8x8xf32>
    %727 = arith.addf %720, %726 : vector<8x8xf32>
    %728 = vector.extract_strided_slice %4 {offsets = [0, 89], sizes = [8, 1], strides = [1, 1]} : vector<8x128xf32> to vector<8x1xf32>
    %729 = vector.extract_strided_slice %3 {offsets = [89, 0], sizes = [1, 8], strides = [1, 1]} : vector<128x8xf32> to vector<1x8xf32>
    %730 = vector.broadcast %728 : vector<8x1xf32> to vector<8x8xf32>
    %731 = vector.broadcast %729 : vector<1x8xf32> to vector<8x8xf32>
    %732 = arith.subf %730, %731 : vector<8x8xf32>
    %733 = math.absf %732 : vector<8x8xf32>
    %734 = arith.addf %727, %733 : vector<8x8xf32>
    %735 = vector.extract_strided_slice %4 {offsets = [0, 90], sizes = [8, 1], strides = [1, 1]} : vector<8x128xf32> to vector<8x1xf32>
    %736 = vector.extract_strided_slice %3 {offsets = [90, 0], sizes = [1, 8], strides = [1, 1]} : vector<128x8xf32> to vector<1x8xf32>
    %737 = vector.broadcast %735 : vector<8x1xf32> to vector<8x8xf32>
    %738 = vector.broadcast %736 : vector<1x8xf32> to vector<8x8xf32>
    %739 = arith.subf %737, %738 : vector<8x8xf32>
    %740 = math.absf %739 : vector<8x8xf32>
    %741 = arith.addf %734, %740 : vector<8x8xf32>
    %742 = vector.extract_strided_slice %4 {offsets = [0, 91], sizes = [8, 1], strides = [1, 1]} : vector<8x128xf32> to vector<8x1xf32>
    %743 = vector.extract_strided_slice %3 {offsets = [91, 0], sizes = [1, 8], strides = [1, 1]} : vector<128x8xf32> to vector<1x8xf32>
    %744 = vector.broadcast %742 : vector<8x1xf32> to vector<8x8xf32>
    %745 = vector.broadcast %743 : vector<1x8xf32> to vector<8x8xf32>
    %746 = arith.subf %744, %745 : vector<8x8xf32>
    %747 = math.absf %746 : vector<8x8xf32>
    %748 = arith.addf %741, %747 : vector<8x8xf32>
    %749 = vector.extract_strided_slice %4 {offsets = [0, 92], sizes = [8, 1], strides = [1, 1]} : vector<8x128xf32> to vector<8x1xf32>
    %750 = vector.extract_strided_slice %3 {offsets = [92, 0], sizes = [1, 8], strides = [1, 1]} : vector<128x8xf32> to vector<1x8xf32>
    %751 = vector.broadcast %749 : vector<8x1xf32> to vector<8x8xf32>
    %752 = vector.broadcast %750 : vector<1x8xf32> to vector<8x8xf32>
    %753 = arith.subf %751, %752 : vector<8x8xf32>
    %754 = math.absf %753 : vector<8x8xf32>
    %755 = arith.addf %748, %754 : vector<8x8xf32>
    %756 = vector.extract_strided_slice %4 {offsets = [0, 93], sizes = [8, 1], strides = [1, 1]} : vector<8x128xf32> to vector<8x1xf32>
    %757 = vector.extract_strided_slice %3 {offsets = [93, 0], sizes = [1, 8], strides = [1, 1]} : vector<128x8xf32> to vector<1x8xf32>
    %758 = vector.broadcast %756 : vector<8x1xf32> to vector<8x8xf32>
    %759 = vector.broadcast %757 : vector<1x8xf32> to vector<8x8xf32>
    %760 = arith.subf %758, %759 : vector<8x8xf32>
    %761 = math.absf %760 : vector<8x8xf32>
    %762 = arith.addf %755, %761 : vector<8x8xf32>
    %763 = vector.extract_strided_slice %4 {offsets = [0, 94], sizes = [8, 1], strides = [1, 1]} : vector<8x128xf32> to vector<8x1xf32>
    %764 = vector.extract_strided_slice %3 {offsets = [94, 0], sizes = [1, 8], strides = [1, 1]} : vector<128x8xf32> to vector<1x8xf32>
    %765 = vector.broadcast %763 : vector<8x1xf32> to vector<8x8xf32>
    %766 = vector.broadcast %764 : vector<1x8xf32> to vector<8x8xf32>
    %767 = arith.subf %765, %766 : vector<8x8xf32>
    %768 = math.absf %767 : vector<8x8xf32>
    %769 = arith.addf %762, %768 : vector<8x8xf32>
    %770 = vector.extract_strided_slice %4 {offsets = [0, 95], sizes = [8, 1], strides = [1, 1]} : vector<8x128xf32> to vector<8x1xf32>
    %771 = vector.extract_strided_slice %3 {offsets = [95, 0], sizes = [1, 8], strides = [1, 1]} : vector<128x8xf32> to vector<1x8xf32>
    %772 = vector.broadcast %770 : vector<8x1xf32> to vector<8x8xf32>
    %773 = vector.broadcast %771 : vector<1x8xf32> to vector<8x8xf32>
    %774 = arith.subf %772, %773 : vector<8x8xf32>
    %775 = math.absf %774 : vector<8x8xf32>
    %776 = arith.addf %769, %775 : vector<8x8xf32>
    %cst_71 = arith.constant -1.000000e+00 : f32
    %777 = vector.broadcast %cst_71 : f32 to vector<8x8xf32>
    %778 = arith.mulf %776, %777 : vector<8x8xf32>
    %779 = math.exp %778 : vector<8x8xf32>
    %c0_72 = arith.constant 0 : index
    %c11 = arith.constant 11 : index
    %780 = vector.load %arg7[%c0_72, %c11] : memref<8x16xf32, #tpu.memory_space<vmem>>, vector<8x1xf32>
    %cst_73 = arith.constant dense<0.000000e+00> : vector<8xf32>
    %781 = vector.multi_reduction <add>, %779, %cst_73 [1] : vector<8x8xf32> to vector<8xf32>
    %782 = vector.shape_cast %781 : vector<8xf32> to vector<8x1xf32>
    %783 = arith.addf %780, %782 : vector<8x1xf32>
    %c0_74 = arith.constant 0 : index
    %c11_75 = arith.constant 11 : index
    %784 = vector.load %arg7[%c0_74, %c11_75] : memref<8x16xf32, #tpu.memory_space<vmem>>, vector<8x1xf32>
    tpu.vector_store %arg7[%c0_74, %c11_75], %783 {strides = array<i32>} : memref<8x16xf32, #tpu.memory_space<vmem>>, vector<8x1xf32>,
    %cst_76 = arith.constant 0.000000e+00 : f32
    %785 = vector.broadcast %cst_76 : f32 to vector<8x8xf32>
    %786 = vector.extract_strided_slice %4 {offsets = [0, 96], sizes = [8, 1], strides = [1, 1]} : vector<8x128xf32> to vector<8x1xf32>
    %787 = vector.extract_strided_slice %3 {offsets = [96, 0], sizes = [1, 8], strides = [1, 1]} : vector<128x8xf32> to vector<1x8xf32>
    %788 = vector.broadcast %786 : vector<8x1xf32> to vector<8x8xf32>
    %789 = vector.broadcast %787 : vector<1x8xf32> to vector<8x8xf32>
    %790 = arith.subf %788, %789 : vector<8x8xf32>
    %791 = math.absf %790 : vector<8x8xf32>
    %792 = arith.addf %785, %791 : vector<8x8xf32>
    %793 = vector.extract_strided_slice %4 {offsets = [0, 97], sizes = [8, 1], strides = [1, 1]} : vector<8x128xf32> to vector<8x1xf32>
    %794 = vector.extract_strided_slice %3 {offsets = [97, 0], sizes = [1, 8], strides = [1, 1]} : vector<128x8xf32> to vector<1x8xf32>
    %795 = vector.broadcast %793 : vector<8x1xf32> to vector<8x8xf32>
    %796 = vector.broadcast %794 : vector<1x8xf32> to vector<8x8xf32>
    %797 = arith.subf %795, %796 : vector<8x8xf32>
    %798 = math.absf %797 : vector<8x8xf32>
    %799 = arith.addf %792, %798 : vector<8x8xf32>
    %800 = vector.extract_strided_slice %4 {offsets = [0, 98], sizes = [8, 1], strides = [1, 1]} : vector<8x128xf32> to vector<8x1xf32>
    %801 = vector.extract_strided_slice %3 {offsets = [98, 0], sizes = [1, 8], strides = [1, 1]} : vector<128x8xf32> to vector<1x8xf32>
    %802 = vector.broadcast %800 : vector<8x1xf32> to vector<8x8xf32>
    %803 = vector.broadcast %801 : vector<1x8xf32> to vector<8x8xf32>
    %804 = arith.subf %802, %803 : vector<8x8xf32>
    %805 = math.absf %804 : vector<8x8xf32>
    %806 = arith.addf %799, %805 : vector<8x8xf32>
    %807 = vector.extract_strided_slice %4 {offsets = [0, 99], sizes = [8, 1], strides = [1, 1]} : vector<8x128xf32> to vector<8x1xf32>
    %808 = vector.extract_strided_slice %3 {offsets = [99, 0], sizes = [1, 8], strides = [1, 1]} : vector<128x8xf32> to vector<1x8xf32>
    %809 = vector.broadcast %807 : vector<8x1xf32> to vector<8x8xf32>
    %810 = vector.broadcast %808 : vector<1x8xf32> to vector<8x8xf32>
    %811 = arith.subf %809, %810 : vector<8x8xf32>
    %812 = math.absf %811 : vector<8x8xf32>
    %813 = arith.addf %806, %812 : vector<8x8xf32>
    %814 = vector.extract_strided_slice %4 {offsets = [0, 100], sizes = [8, 1], strides = [1, 1]} : vector<8x128xf32> to vector<8x1xf32>
    %815 = vector.extract_strided_slice %3 {offsets = [100, 0], sizes = [1, 8], strides = [1, 1]} : vector<128x8xf32> to vector<1x8xf32>
    %816 = vector.broadcast %814 : vector<8x1xf32> to vector<8x8xf32>
    %817 = vector.broadcast %815 : vector<1x8xf32> to vector<8x8xf32>
    %818 = arith.subf %816, %817 : vector<8x8xf32>
    %819 = math.absf %818 : vector<8x8xf32>
    %820 = arith.addf %813, %819 : vector<8x8xf32>
    %821 = vector.extract_strided_slice %4 {offsets = [0, 101], sizes = [8, 1], strides = [1, 1]} : vector<8x128xf32> to vector<8x1xf32>
    %822 = vector.extract_strided_slice %3 {offsets = [101, 0], sizes = [1, 8], strides = [1, 1]} : vector<128x8xf32> to vector<1x8xf32>
    %823 = vector.broadcast %821 : vector<8x1xf32> to vector<8x8xf32>
    %824 = vector.broadcast %822 : vector<1x8xf32> to vector<8x8xf32>
    %825 = arith.subf %823, %824 : vector<8x8xf32>
    %826 = math.absf %825 : vector<8x8xf32>
    %827 = arith.addf %820, %826 : vector<8x8xf32>
    %828 = vector.extract_strided_slice %4 {offsets = [0, 102], sizes = [8, 1], strides = [1, 1]} : vector<8x128xf32> to vector<8x1xf32>
    %829 = vector.extract_strided_slice %3 {offsets = [102, 0], sizes = [1, 8], strides = [1, 1]} : vector<128x8xf32> to vector<1x8xf32>
    %830 = vector.broadcast %828 : vector<8x1xf32> to vector<8x8xf32>
    %831 = vector.broadcast %829 : vector<1x8xf32> to vector<8x8xf32>
    %832 = arith.subf %830, %831 : vector<8x8xf32>
    %833 = math.absf %832 : vector<8x8xf32>
    %834 = arith.addf %827, %833 : vector<8x8xf32>
    %835 = vector.extract_strided_slice %4 {offsets = [0, 103], sizes = [8, 1], strides = [1, 1]} : vector<8x128xf32> to vector<8x1xf32>
    %836 = vector.extract_strided_slice %3 {offsets = [103, 0], sizes = [1, 8], strides = [1, 1]} : vector<128x8xf32> to vector<1x8xf32>
    %837 = vector.broadcast %835 : vector<8x1xf32> to vector<8x8xf32>
    %838 = vector.broadcast %836 : vector<1x8xf32> to vector<8x8xf32>
    %839 = arith.subf %837, %838 : vector<8x8xf32>
    %840 = math.absf %839 : vector<8x8xf32>
    %841 = arith.addf %834, %840 : vector<8x8xf32>
    %cst_77 = arith.constant -1.000000e+00 : f32
    %842 = vector.broadcast %cst_77 : f32 to vector<8x8xf32>
    %843 = arith.mulf %841, %842 : vector<8x8xf32>
    %844 = math.exp %843 : vector<8x8xf32>
    %c0_78 = arith.constant 0 : index
    %c12 = arith.constant 12 : index
    %845 = vector.load %arg7[%c0_78, %c12] : memref<8x16xf32, #tpu.memory_space<vmem>>, vector<8x1xf32>
    %cst_79 = arith.constant dense<0.000000e+00> : vector<8xf32>
    %846 = vector.multi_reduction <add>, %844, %cst_79 [1] : vector<8x8xf32> to vector<8xf32>
    %847 = vector.shape_cast %846 : vector<8xf32> to vector<8x1xf32>
    %848 = arith.addf %845, %847 : vector<8x1xf32>
    %c0_80 = arith.constant 0 : index
    %c12_81 = arith.constant 12 : index
    %849 = vector.load %arg7[%c0_80, %c12_81] : memref<8x16xf32, #tpu.memory_space<vmem>>, vector<8x1xf32>
    tpu.vector_store %arg7[%c0_80, %c12_81], %848 {strides = array<i32>} : memref<8x16xf32, #tpu.memory_space<vmem>>, vector<8x1xf32>,
    %cst_82 = arith.constant 0.000000e+00 : f32
    %850 = vector.broadcast %cst_82 : f32 to vector<8x8xf32>
    %851 = vector.extract_strided_slice %4 {offsets = [0, 104], sizes = [8, 1], strides = [1, 1]} : vector<8x128xf32> to vector<8x1xf32>
    %852 = vector.extract_strided_slice %3 {offsets = [104, 0], sizes = [1, 8], strides = [1, 1]} : vector<128x8xf32> to vector<1x8xf32>
    %853 = vector.broadcast %851 : vector<8x1xf32> to vector<8x8xf32>
    %854 = vector.broadcast %852 : vector<1x8xf32> to vector<8x8xf32>
    %855 = arith.subf %853, %854 : vector<8x8xf32>
    %856 = math.absf %855 : vector<8x8xf32>
    %857 = arith.addf %850, %856 : vector<8x8xf32>
    %858 = vector.extract_strided_slice %4 {offsets = [0, 105], sizes = [8, 1], strides = [1, 1]} : vector<8x128xf32> to vector<8x1xf32>
    %859 = vector.extract_strided_slice %3 {offsets = [105, 0], sizes = [1, 8], strides = [1, 1]} : vector<128x8xf32> to vector<1x8xf32>
    %860 = vector.broadcast %858 : vector<8x1xf32> to vector<8x8xf32>
    %861 = vector.broadcast %859 : vector<1x8xf32> to vector<8x8xf32>
    %862 = arith.subf %860, %861 : vector<8x8xf32>
    %863 = math.absf %862 : vector<8x8xf32>
    %864 = arith.addf %857, %863 : vector<8x8xf32>
    %865 = vector.extract_strided_slice %4 {offsets = [0, 106], sizes = [8, 1], strides = [1, 1]} : vector<8x128xf32> to vector<8x1xf32>
    %866 = vector.extract_strided_slice %3 {offsets = [106, 0], sizes = [1, 8], strides = [1, 1]} : vector<128x8xf32> to vector<1x8xf32>
    %867 = vector.broadcast %865 : vector<8x1xf32> to vector<8x8xf32>
    %868 = vector.broadcast %866 : vector<1x8xf32> to vector<8x8xf32>
    %869 = arith.subf %867, %868 : vector<8x8xf32>
    %870 = math.absf %869 : vector<8x8xf32>
    %871 = arith.addf %864, %870 : vector<8x8xf32>
    %872 = vector.extract_strided_slice %4 {offsets = [0, 107], sizes = [8, 1], strides = [1, 1]} : vector<8x128xf32> to vector<8x1xf32>
    %873 = vector.extract_strided_slice %3 {offsets = [107, 0], sizes = [1, 8], strides = [1, 1]} : vector<128x8xf32> to vector<1x8xf32>
    %874 = vector.broadcast %872 : vector<8x1xf32> to vector<8x8xf32>
    %875 = vector.broadcast %873 : vector<1x8xf32> to vector<8x8xf32>
    %876 = arith.subf %874, %875 : vector<8x8xf32>
    %877 = math.absf %876 : vector<8x8xf32>
    %878 = arith.addf %871, %877 : vector<8x8xf32>
    %879 = vector.extract_strided_slice %4 {offsets = [0, 108], sizes = [8, 1], strides = [1, 1]} : vector<8x128xf32> to vector<8x1xf32>
    %880 = vector.extract_strided_slice %3 {offsets = [108, 0], sizes = [1, 8], strides = [1, 1]} : vector<128x8xf32> to vector<1x8xf32>
    %881 = vector.broadcast %879 : vector<8x1xf32> to vector<8x8xf32>
    %882 = vector.broadcast %880 : vector<1x8xf32> to vector<8x8xf32>
    %883 = arith.subf %881, %882 : vector<8x8xf32>
    %884 = math.absf %883 : vector<8x8xf32>
    %885 = arith.addf %878, %884 : vector<8x8xf32>
    %886 = vector.extract_strided_slice %4 {offsets = [0, 109], sizes = [8, 1], strides = [1, 1]} : vector<8x128xf32> to vector<8x1xf32>
    %887 = vector.extract_strided_slice %3 {offsets = [109, 0], sizes = [1, 8], strides = [1, 1]} : vector<128x8xf32> to vector<1x8xf32>
    %888 = vector.broadcast %886 : vector<8x1xf32> to vector<8x8xf32>
    %889 = vector.broadcast %887 : vector<1x8xf32> to vector<8x8xf32>
    %890 = arith.subf %888, %889 : vector<8x8xf32>
    %891 = math.absf %890 : vector<8x8xf32>
    %892 = arith.addf %885, %891 : vector<8x8xf32>
    %893 = vector.extract_strided_slice %4 {offsets = [0, 110], sizes = [8, 1], strides = [1, 1]} : vector<8x128xf32> to vector<8x1xf32>
    %894 = vector.extract_strided_slice %3 {offsets = [110, 0], sizes = [1, 8], strides = [1, 1]} : vector<128x8xf32> to vector<1x8xf32>
    %895 = vector.broadcast %893 : vector<8x1xf32> to vector<8x8xf32>
    %896 = vector.broadcast %894 : vector<1x8xf32> to vector<8x8xf32>
    %897 = arith.subf %895, %896 : vector<8x8xf32>
    %898 = math.absf %897 : vector<8x8xf32>
    %899 = arith.addf %892, %898 : vector<8x8xf32>
    %900 = vector.extract_strided_slice %4 {offsets = [0, 111], sizes = [8, 1], strides = [1, 1]} : vector<8x128xf32> to vector<8x1xf32>
    %901 = vector.extract_strided_slice %3 {offsets = [111, 0], sizes = [1, 8], strides = [1, 1]} : vector<128x8xf32> to vector<1x8xf32>
    %902 = vector.broadcast %900 : vector<8x1xf32> to vector<8x8xf32>
    %903 = vector.broadcast %901 : vector<1x8xf32> to vector<8x8xf32>
    %904 = arith.subf %902, %903 : vector<8x8xf32>
    %905 = math.absf %904 : vector<8x8xf32>
    %906 = arith.addf %899, %905 : vector<8x8xf32>
    %cst_83 = arith.constant -1.000000e+00 : f32
    %907 = vector.broadcast %cst_83 : f32 to vector<8x8xf32>
    %908 = arith.mulf %906, %907 : vector<8x8xf32>
    %909 = math.exp %908 : vector<8x8xf32>
    %c0_84 = arith.constant 0 : index
    %c13 = arith.constant 13 : index
    %910 = vector.load %arg7[%c0_84, %c13] : memref<8x16xf32, #tpu.memory_space<vmem>>, vector<8x1xf32>
    %cst_85 = arith.constant dense<0.000000e+00> : vector<8xf32>
    %911 = vector.multi_reduction <add>, %909, %cst_85 [1] : vector<8x8xf32> to vector<8xf32>
    %912 = vector.shape_cast %911 : vector<8xf32> to vector<8x1xf32>
    %913 = arith.addf %910, %912 : vector<8x1xf32>
    %c0_86 = arith.constant 0 : index
    %c13_87 = arith.constant 13 : index
    %914 = vector.load %arg7[%c0_86, %c13_87] : memref<8x16xf32, #tpu.memory_space<vmem>>, vector<8x1xf32>
    tpu.vector_store %arg7[%c0_86, %c13_87], %913 {strides = array<i32>} : memref<8x16xf32, #tpu.memory_space<vmem>>, vector<8x1xf32>,
    %cst_88 = arith.constant 0.000000e+00 : f32
    %915 = vector.broadcast %cst_88 : f32 to vector<8x8xf32>
    %916 = vector.extract_strided_slice %4 {offsets = [0, 112], sizes = [8, 1], strides = [1, 1]} : vector<8x128xf32> to vector<8x1xf32>
    %917 = vector.extract_strided_slice %3 {offsets = [112, 0], sizes = [1, 8], strides = [1, 1]} : vector<128x8xf32> to vector<1x8xf32>
    %918 = vector.broadcast %916 : vector<8x1xf32> to vector<8x8xf32>
    %919 = vector.broadcast %917 : vector<1x8xf32> to vector<8x8xf32>
    %920 = arith.subf %918, %919 : vector<8x8xf32>
    %921 = math.absf %920 : vector<8x8xf32>
    %922 = arith.addf %915, %921 : vector<8x8xf32>
    %923 = vector.extract_strided_slice %4 {offsets = [0, 113], sizes = [8, 1], strides = [1, 1]} : vector<8x128xf32> to vector<8x1xf32>
    %924 = vector.extract_strided_slice %3 {offsets = [113, 0], sizes = [1, 8], strides = [1, 1]} : vector<128x8xf32> to vector<1x8xf32>
    %925 = vector.broadcast %923 : vector<8x1xf32> to vector<8x8xf32>
    %926 = vector.broadcast %924 : vector<1x8xf32> to vector<8x8xf32>
    %927 = arith.subf %925, %926 : vector<8x8xf32>
    %928 = math.absf %927 : vector<8x8xf32>
    %929 = arith.addf %922, %928 : vector<8x8xf32>
    %930 = vector.extract_strided_slice %4 {offsets = [0, 114], sizes = [8, 1], strides = [1, 1]} : vector<8x128xf32> to vector<8x1xf32>
    %931 = vector.extract_strided_slice %3 {offsets = [114, 0], sizes = [1, 8], strides = [1, 1]} : vector<128x8xf32> to vector<1x8xf32>
    %932 = vector.broadcast %930 : vector<8x1xf32> to vector<8x8xf32>
    %933 = vector.broadcast %931 : vector<1x8xf32> to vector<8x8xf32>
    %934 = arith.subf %932, %933 : vector<8x8xf32>
    %935 = math.absf %934 : vector<8x8xf32>
    %936 = arith.addf %929, %935 : vector<8x8xf32>
    %937 = vector.extract_strided_slice %4 {offsets = [0, 115], sizes = [8, 1], strides = [1, 1]} : vector<8x128xf32> to vector<8x1xf32>
    %938 = vector.extract_strided_slice %3 {offsets = [115, 0], sizes = [1, 8], strides = [1, 1]} : vector<128x8xf32> to vector<1x8xf32>
    %939 = vector.broadcast %937 : vector<8x1xf32> to vector<8x8xf32>
    %940 = vector.broadcast %938 : vector<1x8xf32> to vector<8x8xf32>
    %941 = arith.subf %939, %940 : vector<8x8xf32>
    %942 = math.absf %941 : vector<8x8xf32>
    %943 = arith.addf %936, %942 : vector<8x8xf32>
    %944 = vector.extract_strided_slice %4 {offsets = [0, 116], sizes = [8, 1], strides = [1, 1]} : vector<8x128xf32> to vector<8x1xf32>
    %945 = vector.extract_strided_slice %3 {offsets = [116, 0], sizes = [1, 8], strides = [1, 1]} : vector<128x8xf32> to vector<1x8xf32>
    %946 = vector.broadcast %944 : vector<8x1xf32> to vector<8x8xf32>
    %947 = vector.broadcast %945 : vector<1x8xf32> to vector<8x8xf32>
    %948 = arith.subf %946, %947 : vector<8x8xf32>
    %949 = math.absf %948 : vector<8x8xf32>
    %950 = arith.addf %943, %949 : vector<8x8xf32>
    %951 = vector.extract_strided_slice %4 {offsets = [0, 117], sizes = [8, 1], strides = [1, 1]} : vector<8x128xf32> to vector<8x1xf32>
    %952 = vector.extract_strided_slice %3 {offsets = [117, 0], sizes = [1, 8], strides = [1, 1]} : vector<128x8xf32> to vector<1x8xf32>
    %953 = vector.broadcast %951 : vector<8x1xf32> to vector<8x8xf32>
    %954 = vector.broadcast %952 : vector<1x8xf32> to vector<8x8xf32>
    %955 = arith.subf %953, %954 : vector<8x8xf32>
    %956 = math.absf %955 : vector<8x8xf32>
    %957 = arith.addf %950, %956 : vector<8x8xf32>
    %958 = vector.extract_strided_slice %4 {offsets = [0, 118], sizes = [8, 1], strides = [1, 1]} : vector<8x128xf32> to vector<8x1xf32>
    %959 = vector.extract_strided_slice %3 {offsets = [118, 0], sizes = [1, 8], strides = [1, 1]} : vector<128x8xf32> to vector<1x8xf32>
    %960 = vector.broadcast %958 : vector<8x1xf32> to vector<8x8xf32>
    %961 = vector.broadcast %959 : vector<1x8xf32> to vector<8x8xf32>
    %962 = arith.subf %960, %961 : vector<8x8xf32>
    %963 = math.absf %962 : vector<8x8xf32>
    %964 = arith.addf %957, %963 : vector<8x8xf32>
    %965 = vector.extract_strided_slice %4 {offsets = [0, 119], sizes = [8, 1], strides = [1, 1]} : vector<8x128xf32> to vector<8x1xf32>
    %966 = vector.extract_strided_slice %3 {offsets = [119, 0], sizes = [1, 8], strides = [1, 1]} : vector<128x8xf32> to vector<1x8xf32>
    %967 = vector.broadcast %965 : vector<8x1xf32> to vector<8x8xf32>
    %968 = vector.broadcast %966 : vector<1x8xf32> to vector<8x8xf32>
    %969 = arith.subf %967, %968 : vector<8x8xf32>
    %970 = math.absf %969 : vector<8x8xf32>
    %971 = arith.addf %964, %970 : vector<8x8xf32>
    %cst_89 = arith.constant -1.000000e+00 : f32
    %972 = vector.broadcast %cst_89 : f32 to vector<8x8xf32>
    %973 = arith.mulf %971, %972 : vector<8x8xf32>
    %974 = math.exp %973 : vector<8x8xf32>
    %c0_90 = arith.constant 0 : index
    %c14 = arith.constant 14 : index
    %975 = vector.load %arg7[%c0_90, %c14] : memref<8x16xf32, #tpu.memory_space<vmem>>, vector<8x1xf32>
    %cst_91 = arith.constant dense<0.000000e+00> : vector<8xf32>
    %976 = vector.multi_reduction <add>, %974, %cst_91 [1] : vector<8x8xf32> to vector<8xf32>
    %977 = vector.shape_cast %976 : vector<8xf32> to vector<8x1xf32>
    %978 = arith.addf %975, %977 : vector<8x1xf32>
    %c0_92 = arith.constant 0 : index
    %c14_93 = arith.constant 14 : index
    %979 = vector.load %arg7[%c0_92, %c14_93] : memref<8x16xf32, #tpu.memory_space<vmem>>, vector<8x1xf32>
    tpu.vector_store %arg7[%c0_92, %c14_93], %978 {strides = array<i32>} : memref<8x16xf32, #tpu.memory_space<vmem>>, vector<8x1xf32>,
    %cst_94 = arith.constant 0.000000e+00 : f32
    %980 = vector.broadcast %cst_94 : f32 to vector<8x8xf32>
    %981 = vector.extract_strided_slice %4 {offsets = [0, 120], sizes = [8, 1], strides = [1, 1]} : vector<8x128xf32> to vector<8x1xf32>
    %982 = vector.extract_strided_slice %3 {offsets = [120, 0], sizes = [1, 8], strides = [1, 1]} : vector<128x8xf32> to vector<1x8xf32>
    %983 = vector.broadcast %981 : vector<8x1xf32> to vector<8x8xf32>
    %984 = vector.broadcast %982 : vector<1x8xf32> to vector<8x8xf32>
    %985 = arith.subf %983, %984 : vector<8x8xf32>
    %986 = math.absf %985 : vector<8x8xf32>
    %987 = arith.addf %980, %986 : vector<8x8xf32>
    %988 = vector.extract_strided_slice %4 {offsets = [0, 121], sizes = [8, 1], strides = [1, 1]} : vector<8x128xf32> to vector<8x1xf32>
    %989 = vector.extract_strided_slice %3 {offsets = [121, 0], sizes = [1, 8], strides = [1, 1]} : vector<128x8xf32> to vector<1x8xf32>
    %990 = vector.broadcast %988 : vector<8x1xf32> to vector<8x8xf32>
    %991 = vector.broadcast %989 : vector<1x8xf32> to vector<8x8xf32>
    %992 = arith.subf %990, %991 : vector<8x8xf32>
    %993 = math.absf %992 : vector<8x8xf32>
    %994 = arith.addf %987, %993 : vector<8x8xf32>
    %995 = vector.extract_strided_slice %4 {offsets = [0, 122], sizes = [8, 1], strides = [1, 1]} : vector<8x128xf32> to vector<8x1xf32>
    %996 = vector.extract_strided_slice %3 {offsets = [122, 0], sizes = [1, 8], strides = [1, 1]} : vector<128x8xf32> to vector<1x8xf32>
    %997 = vector.broadcast %995 : vector<8x1xf32> to vector<8x8xf32>
    %998 = vector.broadcast %996 : vector<1x8xf32> to vector<8x8xf32>
    %999 = arith.subf %997, %998 : vector<8x8xf32>
    %1000 = math.absf %999 : vector<8x8xf32>
    %1001 = arith.addf %994, %1000 : vector<8x8xf32>
    %1002 = vector.extract_strided_slice %4 {offsets = [0, 123], sizes = [8, 1], strides = [1, 1]} : vector<8x128xf32> to vector<8x1xf32>
    %1003 = vector.extract_strided_slice %3 {offsets = [123, 0], sizes = [1, 8], strides = [1, 1]} : vector<128x8xf32> to vector<1x8xf32>
    %1004 = vector.broadcast %1002 : vector<8x1xf32> to vector<8x8xf32>
    %1005 = vector.broadcast %1003 : vector<1x8xf32> to vector<8x8xf32>
    %1006 = arith.subf %1004, %1005 : vector<8x8xf32>
    %1007 = math.absf %1006 : vector<8x8xf32>
    %1008 = arith.addf %1001, %1007 : vector<8x8xf32>
    %1009 = vector.extract_strided_slice %4 {offsets = [0, 124], sizes = [8, 1], strides = [1, 1]} : vector<8x128xf32> to vector<8x1xf32>
    %1010 = vector.extract_strided_slice %3 {offsets = [124, 0], sizes = [1, 8], strides = [1, 1]} : vector<128x8xf32> to vector<1x8xf32>
    %1011 = vector.broadcast %1009 : vector<8x1xf32> to vector<8x8xf32>
    %1012 = vector.broadcast %1010 : vector<1x8xf32> to vector<8x8xf32>
    %1013 = arith.subf %1011, %1012 : vector<8x8xf32>
    %1014 = math.absf %1013 : vector<8x8xf32>
    %1015 = arith.addf %1008, %1014 : vector<8x8xf32>
    %1016 = vector.extract_strided_slice %4 {offsets = [0, 125], sizes = [8, 1], strides = [1, 1]} : vector<8x128xf32> to vector<8x1xf32>
    %1017 = vector.extract_strided_slice %3 {offsets = [125, 0], sizes = [1, 8], strides = [1, 1]} : vector<128x8xf32> to vector<1x8xf32>
    %1018 = vector.broadcast %1016 : vector<8x1xf32> to vector<8x8xf32>
    %1019 = vector.broadcast %1017 : vector<1x8xf32> to vector<8x8xf32>
    %1020 = arith.subf %1018, %1019 : vector<8x8xf32>
    %1021 = math.absf %1020 : vector<8x8xf32>
    %1022 = arith.addf %1015, %1021 : vector<8x8xf32>
    %1023 = vector.extract_strided_slice %4 {offsets = [0, 126], sizes = [8, 1], strides = [1, 1]} : vector<8x128xf32> to vector<8x1xf32>
    %1024 = vector.extract_strided_slice %3 {offsets = [126, 0], sizes = [1, 8], strides = [1, 1]} : vector<128x8xf32> to vector<1x8xf32>
    %1025 = vector.broadcast %1023 : vector<8x1xf32> to vector<8x8xf32>
    %1026 = vector.broadcast %1024 : vector<1x8xf32> to vector<8x8xf32>
    %1027 = arith.subf %1025, %1026 : vector<8x8xf32>
    %1028 = math.absf %1027 : vector<8x8xf32>
    %1029 = arith.addf %1022, %1028 : vector<8x8xf32>
    %1030 = vector.extract_strided_slice %4 {offsets = [0, 127], sizes = [8, 1], strides = [1, 1]} : vector<8x128xf32> to vector<8x1xf32>
    %1031 = vector.extract_strided_slice %3 {offsets = [127, 0], sizes = [1, 8], strides = [1, 1]} : vector<128x8xf32> to vector<1x8xf32>
    %1032 = vector.broadcast %1030 : vector<8x1xf32> to vector<8x8xf32>
    %1033 = vector.broadcast %1031 : vector<1x8xf32> to vector<8x8xf32>
    %1034 = arith.subf %1032, %1033 : vector<8x8xf32>
    %1035 = math.absf %1034 : vector<8x8xf32>
    %1036 = arith.addf %1029, %1035 : vector<8x8xf32>
    %cst_95 = arith.constant -1.000000e+00 : f32
    %1037 = vector.broadcast %cst_95 : f32 to vector<8x8xf32>
    %1038 = arith.mulf %1036, %1037 : vector<8x8xf32>
    %1039 = math.exp %1038 : vector<8x8xf32>
    %c0_96 = arith.constant 0 : index
    %c15 = arith.constant 15 : index
    %1040 = vector.load %arg7[%c0_96, %c15] : memref<8x16xf32, #tpu.memory_space<vmem>>, vector<8x1xf32>
    %cst_97 = arith.constant dense<0.000000e+00> : vector<8xf32>
    %1041 = vector.multi_reduction <add>, %1039, %cst_97 [1] : vector<8x8xf32> to vector<8xf32>
    %1042 = vector.shape_cast %1041 : vector<8xf32> to vector<8x1xf32>
    %1043 = arith.addf %1040, %1042 : vector<8x1xf32>
    %c0_98 = arith.constant 0 : index
    %c15_99 = arith.constant 15 : index
    %1044 = vector.load %arg7[%c0_98, %c15_99] : memref<8x16xf32, #tpu.memory_space<vmem>>, vector<8x1xf32>
    tpu.vector_store %arg7[%c0_98, %c15_99], %1043 {strides = array<i32>} : memref<8x16xf32, #tpu.memory_space<vmem>>, vector<8x1xf32>,
    %c0_i32_100 = arith.constant 0 : i32
    %1045 = arith.cmpi eq, %arg1, %c0_i32_100 : i32
    %1046 = arith.extui %1045 : i1 to i32
    %c0_i32_101 = arith.constant 0 : i32
    %1047 = arith.cmpi ne, %1046, %c0_i32_101 : i32
    scf.if %1047 {
      %c0_102 = arith.constant 0 : index
      %c0_103 = arith.constant 0 : index
      %1048 = vector.load %arg7[%c0_102, %c0_103] : memref<8x16xf32, #tpu.memory_space<vmem>>, vector<8x16xf32>
      %cst_104 = arith.constant 1.000000e+00 : f32
      %1049 = vector.broadcast %cst_104 : f32 to vector<8x16xf32>
      %1050 = arith.subf %1048, %1049 : vector<8x16xf32>
      %c0_105 = arith.constant 0 : index
      %c0_106 = arith.constant 0 : index
      %1051 = vector.load %arg6[%c0_105, %c0_106] : memref<8x16xf32, #tpu.memory_space<vmem>>, vector<8x16xf32>
      tpu.vector_store %arg6[%c0_105, %c0_106], %1050 {strides = array<i32>} : memref<8x16xf32, #tpu.memory_space<vmem>>, vector<8x16xf32>,
    } else {
    }
    return
  }
  func.func @transform_0(%arg0: i32, %arg1: i32) -> (i32, i32) {
    %c0_i32 = arith.constant 0 : i32
    %c0_i32_0 = arith.constant 0 : i32
    return %arg0, %c0_i32 : i32, i32
  }
  func.func @transform_1(%arg0: i32, %arg1: i32) -> (i32, i32) {
    %c0_i32 = arith.constant 0 : i32
    %c0_i32_0 = arith.constant 0 : i32
    return %c0_i32, %arg1 : i32, i32
  }
  func.func @transform_2(%arg0: i32, %arg1: i32) -> (i32, i32) {
    %c0_i32 = arith.constant 0 : i32
    %c0_i32_0 = arith.constant 0 : i32
    return %arg0, %c0_i32 : i32, i32
  }
  func.func @transform_3(%arg0: i32, %arg1: i32) -> (i32, i32) {
    %c0_i32 = arith.constant 0 : i32
    %c0_i32_0 = arith.constant 0 : i32
    return %c0_i32, %arg1 : i32, i32
  }
  func.func @transform_4(%arg0: i32, %arg1: i32) -> (i32, i32) {
    %c0_i32 = arith.constant 0 : i32
    %c0_i32_0 = arith.constant 0 : i32
    return %arg0, %c0_i32 : i32, i32
  }
}

</mosaic_0001>

<bundles_post_ra>
// kernel: tpu_custom_call.1
= control target key start
LH: loop header
LB: loop body
LE: loop exit
PB: predicated region body
PF: predicated region fallthrough
CT: control target
= control target key end

     0   :  { %v1949_v1 = vmov 2   ;;  %v1950_v2 = vmov 0   ;;  %s2487_s0 = inlined_call_operand.vmem [shape: f32[8,128], index: 0, kind: input, shape index: {}]   ;;  %s2488_s1 = inlined_call_operand.vmem [shape: f32[128,8], index: 1, kind: input, shape index: {}]   ;;  %s2489_s2 = inlined_call_operand.vmem [shape: f32[8,16], index: 2, kind: input, shape index: {}]   ;;  %s2490_s3 = inlined_call_operand.vmem [shape: f32[16,8], index: 3, kind: input, shape index: {}]   ;;  %s2491_s4 = inlined_call_operand.hbm [shape: f32[8,16], index: 4, kind: output, shape index: {}]  }
   0x1   :  { %v2107_v0 = vld [vmem:[%s2487_s0] sm:$0xff]  ;;  %1765 = vset.pattern.permute.xlu1 %v1949_v1  ;;  %1763 = vset.pattern.permute.xlu0 %v1950_v2 }
   0x2   :  { %9 = vsyncpa [#allocation4], 0  ;;  %65 = vperm.xlu1 %1765, %v2107_v0   ;;  %43 = vperm.xlu0 %1763, %v2107_v0   ;;  %v1951_v3 = vmov 3   ;;  %v1952_v4 = vmov 1   ;;  %v1953_v5 = vmov 4   ;;  %v1954_v6 = vmov 5  }
   0x3   :  { %v1955_v7 = vmov 6   ;;  %v1956_v8 = vmov 17   ;;  %v1957_v9 = vmov 7   ;;  %v1958_v10 = vmov 24   ;;  %v24_v36 = vld [vmem:[%s2488_s1] sm:$0xff] }
   0x4   :  { %v1959_v11 = vmov 8   ;;  %v1960_v12 = vmov 25   ;;  %v1961_v13 = vmov 9   ;;  %v1962_v14 = vmov 26  }
   0x5   :  { %v1963_v15 = vmov 10   ;;  %v1964_v16 = vmov 28   ;;  %v1965_v17 = vmov 11   ;;  %v1966_v18 = vmov 29  }
   0x6   :  { %1766 = vset.pattern.permute.xlu1 %v1951_v3  ;;  %1764 = vset.pattern.permute.xlu0 %v1952_v4  ;;  %v1967_v19 = vmov 12   ;;  %v1968_v20 = vmov 13   ;;  %v1969_v21 = vmov 14   ;;  %v1970_v22 = vmov 15  }
   0x7   :  { %76 = vperm.xlu1 %1766, %v2107_v0   ;;  %54 = vperm.xlu0 %1764, %v2107_v0   ;;  %v1971_v23 = vmov 16   ;;  %v1972_v24 = vmov 18   ;;  %v1973_v25 = vmov 19   ;;  %v1974_v26 = vmov 20  }
   0x8   :  { %v1975_v27 = vmov 21   ;;  %v1976_v28 = vmov 22   ;;  %v1977_v29 = vmov 23   ;;  %v1978_v30 = vmov 27  }
   0x9   :  { %v1979_v31 = vmov 30   ;;  %v1980_v32 = vmov 31   ;;  %v46_v33 = vlaneseq  ;;  %v1981_v54 = vmov 32  }
   0xa   :  { %vm134_vm0 = vcmask 64512   ;;  %vm22_vm1 = vcmask 130048   ;;  %vm139_vm2 = vcmask 7168   ;;  %vm237_vm3 = vcmask 15368  }
   0xb   :  { %1767 = vset.pattern.permute.xlu1 %v1953_v5  ;;  %1768 = vset.pattern.permute.xlu0 %v1954_v6  ;;  %v47_v34 = vshrl.u32 %v46_v33, 7  ;;  %vm335_vm4 = vcmask 23568   ;;  %vm433_vm5 = vcmask 31768   ;;  %vm531_vm6 = vcmask 39968  }
   0xc   :  { %87 = vperm.xlu1 %1767, %v2107_v0   ;;  %98 = vperm.xlu0 %1768, %v2107_v0   ;;  %vm629_vm7 = vcmask 48168   ;;  %vm727_vm8 = vcmask 56368   ;;  %vm825_vm9 = vcmask 64568   ;;  %vm923_vm10 = vcmask 72768  }
   0xd   :  { %v2141_v35 = vsub.s32 0, %v47_v34  ;;  %v2146_v37 = vsub.s32 2, %v47_v34  ;;  %v2149_v39 = vsub.s32 1, %v47_v34  ;;  %v2151_v42 = vsub.s32 3, %v47_v34 }
   0xe   :  { %v2155_v46 = vsub.s32 4, %v47_v34  ;;  %v2157_v47 = vsub.s32 5, %v47_v34  ;;  %v2162_v59 = vsub.s32 6, %v47_v34  ;;  %vm1021_vm11 = vcmask 80968  }
   0xf   :  { %v49_v38 = vrot.slane %v24_v36, %v2141_v35  ;;  %v71_v43 = vrot.slane %v24_v36, %v2146_v37  ;;  %v60_v45 = vrot.slane %v24_v36, %v2149_v39  ;;  %v82_v48 = vrot.slane %v24_v36, %v2151_v42 }
  0x10   :  { %1769 = vset.pattern.permute.xlu1 %v1955_v7  ;;  %1780 = vset.pattern.permute.xlu0 %v1956_v8  ;;  %v93_v55 = vrot.slane %v24_v36, %v2155_v46  ;;  %v104_v56 = vrot.slane %v24_v36, %v2157_v47  ;;  %v115_v5 = vrot.slane %v24_v36, %v2162_v59  ;;  %v2165_v7 = vsub.s32 7, %v47_v34 }
  0x11   :  { %109 = vperm.xlu1 %1769, %v2107_v0   ;;  %251 = vperm.xlu0 %1780, %v2107_v0   ;;  %vm1119_vm12 = vcmask 89168   ;;  %vm1217_vm13 = vcmask 97368   ;;  %vm1315_vm14 = vcmask 105568   ;;  %vm1413_vm15 = vcmask 113768  }
  0x15   :  { %1770 = vset.pattern.permute.xlu1 %v1957_v9  ;;  %1787 = vset.pattern.permute.xlu0 %v1958_v10 }
  0x16   :  { %120 = vperm.xlu1 %1770, %v2107_v0   ;;  %338 = vperm.xlu0 %1787, %v2107_v0  }
  0x1a   :  { %1771 = vset.pattern.permute.xlu1 %v1959_v11  ;;  %1788 = vset.pattern.permute.xlu0 %v1960_v12 }
  0x1b   :  { %142 = vperm.xlu1 %1771, %v2107_v0   ;;  %349 = vperm.xlu0 %1788, %v2107_v0  }
  0x1f   :  { %1772 = vset.pattern.permute.xlu1 %v1961_v13  ;;  %1789 = vset.pattern.permute.xlu0 %v1962_v14  ;;  %v126_v13 = vrot.slane %v24_v36, %v2165_v7 }
  0x20   :  { %153 = vperm.xlu1 %1772, %v2107_v0   ;;  %360 = vperm.xlu0 %1789, %v2107_v0  }
  0x24   :  { %1773 = vset.pattern.permute.xlu1 %v1963_v15  ;;  %1791 = vset.pattern.permute.xlu0 %v1964_v16 }
  0x25   :  { %164 = vperm.xlu1 %1773, %v2107_v0   ;;  %382 = vperm.xlu0 %1791, %v2107_v0  }
  0x29   :  { %1774 = vset.pattern.permute.xlu1 %v1965_v17  ;;  %1792 = vset.pattern.permute.xlu0 %v1966_v18 }
  0x2a   :  { %175 = vperm.xlu1 %1774, %v2107_v0   ;;  %393 = vperm.xlu0 %1792, %v2107_v0  }
  0x2e   :  { %1775 = vset.pattern.permute.xlu1 %v1967_v19 }
  0x2f   :  { %186 = vperm.xlu1 %1775, %v2107_v0  }
  0x33   :  { %1776 = vset.pattern.permute.xlu1 %v1968_v20 }
  0x34   :  { %197 = vperm.xlu1 %1776, %v2107_v0  }
  0x38   :  { %1777 = vset.pattern.permute.xlu1 %v1969_v21 }
  0x39   :  { %208 = vperm.xlu1 %1777, %v2107_v0  }
  0x3d   :  { %1778 = vset.pattern.permute.xlu1 %v1970_v22 }
  0x3e   :  { %219 = vperm.xlu1 %1778, %v2107_v0  }
  0x42   :  { %1779 = vset.pattern.permute.xlu1 %v1971_v23 }
  0x43   :  { %240 = vperm.xlu1 %1779, %v2107_v0  }
  0x47   :  { %1781 = vset.pattern.permute.xlu1 %v1972_v24 }
  0x48   :  { %262 = vperm.xlu1 %1781, %v2107_v0  }
  0x4c   :  { %1782 = vset.pattern.permute.xlu1 %v1973_v25 }
  0x4d   :  { %273 = vperm.xlu1 %1782, %v2107_v0  }
  0x51   :  { %1783 = vset.pattern.permute.xlu1 %v1974_v26  ;;  %v25_v26 = vld [vmem:[%s2488_s1 + $0x8] sm:$0xff] }
  0x52   :  { %284 = vperm.xlu1 %1783, %v2107_v0   ;;  %v181_v34 = vrot.slane %v25_v26, %v2151_v42 }
  0x56   :  { %1784 = vset.pattern.permute.xlu1 %v1975_v27 }
  0x57   :  { %295 = vperm.xlu1 %1784, %v2107_v0  }
  0x5b   :  { %1785 = vset.pattern.permute.xlu1 %v1976_v28 }
  0x5c   :  { %306 = vperm.xlu1 %1785, %v2107_v0  }
  0x60   :  { %1786 = vset.pattern.permute.xlu1 %v1977_v29  ;;  %v159_v29 = vrot.slane %v25_v26, %v2149_v39 }
  0x61   :  { %317 = vperm.xlu1 %1786, %v2107_v0  }
  0x65   :  { %1790 = vset.pattern.permute.xlu1 %v1978_v30 }
  0x66   :  { %371 = vperm.xlu1 %1790, %v2107_v0  }
  0x6a   :  { %1793 = vset.pattern.permute.xlu1 %v1979_v31  ;;  %v148_v31 = vrot.slane %v25_v26, %v2141_v35 }
  0x6b   :  { %404 = vperm.xlu1 %1793, %v2107_v0  }
  0x6f   :  { %1794 = vset.pattern.permute.xlu1 %v1980_v32  ;;  %v170_v32 = vrot.slane %v25_v26, %v2146_v37 }
  0x70   :  { %415 = vperm.xlu1 %1794, %v2107_v0  }
  0x74   :  { %1795 = vset.pattern.permute.xlu1 %v1981_v54 }
  0x81   :  { %v66_v40 = vpop.permute.xlu1 %65  ;;  %v44_v41 = vpop.permute.xlu0 %43 }
  0x82   :  { %v50_v44 = vsub.f32 %v44_v41, %v49_v38  ;;  %v72_v51 = vsub.f32 %v66_v40, %v71_v43  ;;  %v192_v41 = vrot.slane %v25_v26, %v2155_v46 }
  0x84   :  { %v51_v52 = vand.u32 2147483647, %v50_v44  ;;  %v73_v60 = vand.u32 2147483647, %v72_v51 }
  0x86   :  { %v77_v49 = vpop.permute.xlu1 %76  ;;  %v55_v50 = vpop.permute.xlu0 %54 }
  0x87   :  { %v61_v53 = vsub.f32 %v55_v50, %v60_v45  ;;  %v83_v57 = vsub.f32 %v77_v49, %v82_v48  ;;  %v203_v45 = vrot.slane %v25_v26, %v2157_v47  ;;  %v1982_v48 = vmov 0.0  }
  0x88   :  { %23 = vst.msk [vmem:[#allocation2] sm:$0xff] %vm22_vm1, %v1982_v48 }
  0x89   :  { %v62_v58 = vand.u32 2147483647, %v61_v53  ;;  %v84_v3 = vand.u32 2147483647, %v83_v57  ;;  %v214_v53 = vrot.slane %v25_v26, %v2162_v59 }
  0x8b   :  { %v63_v61 = vadd.f32 %v62_v58, %v51_v52  ;;  %v88_v62 = vpop.permute.xlu1 %87  ;;  %v99_v63 = vpop.permute.xlu0 %98 }
  0x8c   :  { %v94_v1 = vsub.f32 %v88_v62, %v93_v55  ;;  %v105_v2 = vsub.f32 %v99_v63, %v104_v56 }
  0x8d   :  { %v74_v4 = vadd.f32 %v73_v60, %v63_v61 }
  0x8e   :  { %v95_v6 = vand.u32 2147483647, %v94_v1  ;;  %v106_v9 = vand.u32 2147483647, %v105_v2  ;;  %v225_v1 = vrot.slane %v25_v26, %v2165_v7 }
  0x8f   :  { %v85_v8 = vadd.f32 %v84_v3, %v74_v4 }
  0x90   :  { %v110_v10 = vpop.permute.xlu1 %109 }
  0x91   :  { %v96_v11 = vadd.f32 %v95_v6, %v85_v8  ;;  %v116_v12 = vsub.f32 %v110_v10, %v115_v5 }
  0x93   :  { %v107_v14 = vadd.f32 %v106_v9, %v96_v11  ;;  %v117_v15 = vand.u32 2147483647, %v116_v12 }
  0x95   :  { %v121_v16 = vpop.permute.xlu1 %120  ;;  %v118_v18 = vadd.f32 %v117_v15, %v107_v14  ;;  %v252_v14 = vpop.permute.xlu0 %251 }
  0x96   :  { %v127_v17 = vsub.f32 %v121_v16, %v126_v13  ;;  %v26_v16 = vld [vmem:[%s2488_s1 + $0x10] sm:$0xff] }
  0x97   :  { %v312_v48 = vrot.slane %v26_v16, %v2162_v59 }
  0x98   :  { %v128_v19 = vand.u32 2147483647, %v127_v17 }
  0x99   :  { %v339_v17 = vpop.permute.xlu0 %338 }
  0x9a   :  { %v129_v20 = vadd.f32 %v128_v19, %v118_v18  ;;  %v143_v21 = vpop.permute.xlu1 %142  ;;  %v246_v19 = vrot.slane %v26_v16, %v2141_v35 }
  0x9b   :  { %v149_v38 = vsub.f32 %v143_v21, %v148_v31  ;;  %v268_v21 = vrot.slane %v26_v16, %v2146_v37  ;;  %v2193_v31 = vld [vmem:[%s2488_s1 + $0x18] sm:$0xff] }
  0x9c   :  { %v130_v22 = vmul.f32 -1.0, %v129_v20  ;;  %v257_v20 = vrot.slane %v26_v16, %v2149_v39 }
  0x9d   :  { %v150_v50 = vand.u32 2147483647, %v149_v38  ;;  %v350_v26 = vpop.permute.xlu0 %349 }
  0x9e   :  { %v131_v23 = vmul.f32 1.442695, %v130_v22 }
  0x9f   :  { %v154_v24 = vpop.permute.xlu1 %153 }
  0xa0   :  { %1891 = vpow2.f32 %v131_v23  ;;  %v160_v33 = vsub.f32 %v154_v24, %v159_v29  ;;  %v258_v23 = vsub.f32 %v252_v14, %v257_v20  ;;  %v279_v24 = vrot.slane %v26_v16, %v2151_v42 }
  0xa1   :  { %v290_v29 = vrot.slane %v26_v16, %v2155_v46  ;;  %v399_v14 = vrot.slane %v2193_v31, %v2157_v47 }
  0xa2   :  { %v161_v43 = vand.u32 2147483647, %v160_v33  ;;  %v259_v33 = vand.u32 2147483647, %v258_v23 }
  0xa4   :  { %v165_v25 = vpop.permute.xlu1 %164  ;;  %v162_v54 = vadd.f32 %v161_v43, %v150_v50 }
  0xa5   :  { %v171_v40 = vsub.f32 %v165_v25, %v170_v32 }
  0xa7   :  { %v172_v51 = vand.u32 2147483647, %v171_v40  ;;  %v344_v40 = vrot.slane %v2193_v31, %v2141_v35 }
  0xa9   :  { %v176_v27 = vpop.permute.xlu1 %175  ;;  %v173_v57 = vadd.f32 %v172_v51, %v162_v54  ;;  %v366_v54 = vrot.slane %v2193_v31, %v2146_v37 }
  0xaa   :  { %v1892_v28 = vpop.eup %1891  ;;  %v182_v44 = vsub.f32 %v176_v27, %v181_v34 }
  0xab   :  { %v135_v30 = vsel %vm134_vm0, %v1892_v28, 0.0 }
  0xac   :  { %136 = vadd.xlane.f32.xlu0 %v135_v30  ;;  %v183_v55 = vand.u32 2147483647, %v182_v44 }
  0xae   :  { %v187_v36 = vpop.permute.xlu1 %186  ;;  %v184_v62 = vadd.f32 %v183_v55, %v173_v57 }
  0xaf   :  { %v193_v52 = vsub.f32 %v187_v36, %v192_v41  ;;  %v301_v36 = vrot.slane %v26_v16, %v2157_v47  ;;  %v355_v41 = vrot.slane %v2193_v31, %v2149_v39 }
  0xb1   :  { %v194_v58 = vand.u32 2147483647, %v193_v52  ;;  %v345_v52 = vsub.f32 %v339_v17, %v344_v40 }
  0xb3   :  { %v198_v49 = vpop.permute.xlu1 %197  ;;  %v195_v2 = vadd.f32 %v194_v58, %v184_v62  ;;  %v323_v62 = vrot.slane %v26_v16, %v2165_v7 }
  0xb4   :  { %v204_v56 = vsub.f32 %v198_v49, %v203_v45  ;;  %v361_v45 = vpop.permute.xlu0 %360 }
  0xb6   :  { %v205_v63 = vand.u32 2147483647, %v204_v56 }
  0xb8   :  { %v209_v60 = vpop.permute.xlu1 %208  ;;  %v206_v5 = vadd.f32 %v205_v63, %v195_v2  ;;  %v383_v63 = vpop.permute.xlu0 %382 }
  0xb9   :  { %v215_v61 = vsub.f32 %v209_v60, %v214_v53  ;;  %v356_v53 = vsub.f32 %v350_v26, %v355_v41 }
  0xbb   :  { %v216_v3 = vand.u32 2147483647, %v215_v61  ;;  %v357_v2 = vand.u32 2147483647, %v356_v53 }
  0xbc   :  { %v394_v17 = vpop.permute.xlu0 %393 }
  0xbd   :  { %v220_v4 = vpop.permute.xlu1 %219  ;;  %v217_v8 = vadd.f32 %v216_v3, %v206_v5  ;;  %v367_v3 = vsub.f32 %v361_v45, %v366_v54  ;;  %v400_v23 = vsub.f32 %v394_v17, %v399_v14 }
  0xbe   :  { %v226_v6 = vsub.f32 %v220_v4, %v225_v1  ;;  %v346_v1 = vand.u32 2147483647, %v345_v52 }
  0xc0   :  { %v227_v9 = vand.u32 2147483647, %v226_v6 }
  0xc2   :  { %v228_v10 = vadd.f32 %v227_v9, %v217_v8  ;;  %v241_v11 = vpop.permute.xlu1 %240  ;;  %v388_v8 = vrot.slane %v2193_v31, %v2155_v46 }
  0xc3   :  { %v247_v22 = vsub.f32 %v241_v11, %v246_v19  ;;  %v358_v11 = vadd.f32 %v357_v2, %v346_v1  ;;  %v1990_v2 = vmov 40  }
  0xc4   :  { %v229_v12 = vmul.f32 -1.0, %v228_v10 }
  0xc5   :  { %v248_v32 = vand.u32 2147483647, %v247_v22 }
  0xc6   :  { %v230_v13 = vmul.f32 1.442695, %v229_v12  ;;  %v368_v12 = vand.u32 2147483647, %v367_v3  ;;  %v1991_v3 = vmov 41  }
  0xc7   :  { %v263_v15 = vpop.permute.xlu1 %262  ;;  %v260_v49 = vadd.f32 %v259_v33, %v248_v32  ;;  %v401_v32 = vand.u32 2147483647, %v400_v23  ;;  %1804 = vset.pattern.permute.xlu0 %v1991_v3  ;;  %v28_v23 = vld [vmem:[%s2488_s1 + $0x20] sm:$0xff] }
  0xc8   :  { %1893 = vpow2.f32 %v230_v13  ;;  %v269_v28 = vsub.f32 %v263_v15, %v268_v21  ;;  %v377_v13 = vrot.slane %v2193_v31, %v2151_v42  ;;  %v369_v21 = vadd.f32 %v368_v12, %v358_v11 }
  0xca   :  { %v270_v43 = vand.u32 2147483647, %v269_v28 }
  0xcc   :  { %v274_v18 = vpop.permute.xlu1 %273  ;;  %v271_v55 = vadd.f32 %v270_v43, %v260_v49 }
  0xcd   :  { %v280_v34 = vsub.f32 %v274_v18, %v279_v24  ;;  %v389_v18 = vsub.f32 %v383_v63, %v388_v8  ;;  %v1995_v8 = vmov 45  }
  0xcf   :  { %v281_v50 = vand.u32 2147483647, %v280_v34 }
  0xd1   :  { %v285_v25 = vpop.permute.xlu1 %284  ;;  %v282_v60 = vadd.f32 %v281_v50, %v271_v55  ;;  %v1984_v55 = vmov 34  }
  0xd2   :  { %v1894_v27 = vpop.eup %1893  ;;  %v291_v44 = vsub.f32 %v285_v25, %v290_v29  ;;  %v410_v25 = vrot.slane %v2193_v31, %v2162_v59 }
  0xd3   :  { %v233_v30 = vsel %vm134_vm0, %v1894_v27, 0.0  ;;  %v390_v27 = vand.u32 2147483647, %v389_v18 }
  0xd4   :  { %234 = vadd.xlane.f32.xlu0 %v233_v30  ;;  %v292_v56 = vand.u32 2147483647, %v291_v44 }
  0xd6   :  { %v296_v38 = vpop.permute.xlu1 %295  ;;  %v293_v4 = vadd.f32 %v292_v56, %v282_v60  ;;  %v1985_v56 = vmov 35   ;;  %v1988_v60 = vmov 38  }
  0xd7   :  { %v302_v51 = vsub.f32 %v296_v38, %v301_v36  ;;  %v421_v36 = vrot.slane %v2193_v31, %v2165_v7  ;;  %v1983_v31 = vmov 33  }
  0xd9   :  { %v303_v61 = vand.u32 2147483647, %v302_v51 }
  0xdb   :  { %v307_v57 = vpop.permute.xlu1 %306  ;;  %v304_v9 = vadd.f32 %v303_v61, %v293_v4  ;;  %v1989_v61 = vmov 39   ;;  %v1992_v4 = vmov 42  }
  0xdc   :  { %v313_v58 = vsub.f32 %v307_v57, %v312_v48  ;;  %v1986_v57 = vmov 36  }
  0xde   :  { %v314_v5 = vand.u32 2147483647, %v313_v58  ;;  %v1987_v58 = vmov 37  }
  0xe0   :  { %v318_v6 = vpop.permute.xlu1 %317  ;;  %v315_v15 = vadd.f32 %v314_v5, %v304_v9  ;;  %v1993_v5 = vmov 43   ;;  %v1996_v9 = vmov 46  }
  0xe1   :  { %v324_v10 = vsub.f32 %v318_v6, %v323_v62  ;;  %v133_v62 = vld [vmem:[#allocation2] sm:$0xff]  ;;  %v1994_v6 = vmov 44  }
  0xe3   :  { %v325_v16 = vand.u32 2147483647, %v324_v10 }
  0xe5   :  { %v326_v19 = vadd.f32 %v325_v16, %v315_v15  ;;  %v372_v20 = vpop.permute.xlu1 %371 }
  0xe6   :  { %v378_v22 = vsub.f32 %v372_v20, %v377_v13  ;;  %v1997_v13 = vmov 47  }
  0xe7   :  { %v327_v24 = vmul.f32 -1.0, %v326_v19 }
  0xe8   :  { %v379_v26 = vand.u32 2147483647, %v378_v22 }
  0xe9   :  { %v328_v28 = vmul.f32 1.442695, %v327_v24 }
  0xea   :  { %v380_v29 = vadd.f32 %v379_v26, %v369_v21  ;;  %v405_v30 = vpop.permute.xlu1 %404  ;;  %v442_v26 = vrot.slane %v28_v23, %v2141_v35 }
  0xeb   :  { %1895 = vpow2.f32 %v328_v28  ;;  %v411_v33 = vsub.f32 %v405_v30, %v410_v25  ;;  %v453_v25 = vrot.slane %v28_v23, %v2149_v39 }
  0xec   :  { %v391_v34 = vadd.f32 %v390_v27, %v380_v29  ;;  %v464_v27 = vrot.slane %v28_v23, %v2146_v37  ;;  %v475_v29 = vrot.slane %v28_v23, %v2151_v42 }
  0xed   :  { %v412_v38 = vand.u32 2147483647, %v411_v33 }
  0xee   :  { %v402_v40 = vadd.f32 %v401_v32, %v391_v34  ;;  %v486_v34 = vrot.slane %v28_v23, %v2155_v46 }
  0xef   :  { %v416_v41 = vpop.permute.xlu1 %415 }
  0xf0   :  { %v413_v43 = vadd.f32 %v412_v38, %v402_v40  ;;  %v422_v44 = vsub.f32 %v416_v41, %v421_v36  ;;  %v497_v40 = vrot.slane %v28_v23, %v2157_v47 }
  0xf2   :  { %v423_v45 = vand.u32 2147483647, %v422_v44 }
  0xf4   :  { %v424_v48 = vadd.f32 %v423_v45, %v413_v43 }
  0xf5   :  { %v1896_v49 = vpop.eup %1895 }
  0xf6   :  { %v425_v50 = vmul.f32 -1.0, %v424_v48  ;;  %v331_v51 = vsel %vm134_vm0, %v1896_v49, 0.0  ;;  %v508_v48 = vrot.slane %v28_v23, %v2162_v59 }
  0xf7   :  { %332 = vadd.xlane.f32.xlu1 %v331_v51 }
  0xf8   :  { %v426_v52 = vmul.f32 1.442695, %v425_v50 }
  0xfa   :  { %1897 = vpow2.f32 %v426_v52 }
 0x104   :  { %v1898_v53 = vpop.eup %1897 }
 0x105   :  { %v429_v54 = vsel %vm134_vm0, %v1898_v53, 0.0 }
 0x106   :  { %430 = vadd.xlane.f32.xlu0 %v429_v54 }
 0x108   :  { %436 = vperm.xlu1 %1795, %v2107_v0  }
 0x10c   :  { %1796 = vset.pattern.permute.xlu1 %v1983_v31 }
 0x10d   :  { %447 = vperm.xlu1 %1796, %v2107_v0  }
 0x111   :  { %1797 = vset.pattern.permute.xlu1 %v1984_v55 }
 0x112   :  { %458 = vperm.xlu1 %1797, %v2107_v0  }
 0x116   :  { %1798 = vset.pattern.permute.xlu1 %v1985_v56 }
 0x117   :  { %469 = vperm.xlu1 %1798, %v2107_v0  }
 0x11b   :  { %1799 = vset.pattern.permute.xlu1 %v1986_v57  ;;  %v519_v57 = vrot.slane %v28_v23, %v2165_v7 }
 0x11c   :  { %480 = vperm.xlu1 %1799, %v2107_v0  }
 0x120   :  { %1800 = vset.pattern.permute.xlu1 %v1987_v58 }
 0x121   :  { %491 = vperm.xlu1 %1800, %v2107_v0  }
 0x125   :  { %1801 = vset.pattern.permute.xlu1 %v1988_v60 }
 0x126   :  { %502 = vperm.xlu1 %1801, %v2107_v0  }
 0x12a   :  { %1802 = vset.pattern.permute.xlu1 %v1989_v61 }
 0x12b   :  { %513 = vperm.xlu1 %1802, %v2107_v0  }
 0x12f   :  { %1803 = vset.pattern.permute.xlu1 %v1990_v2 }
 0x130   :  { %534 = vperm.xlu1 %1803, %v2107_v0  }
 0x134   :  { %1805 = vset.pattern.permute.xlu1 %v1992_v4 }
 0x135   :  { %556 = vperm.xlu1 %1805, %v2107_v0  }
 0x139   :  { %v137_v63 = vpop.xlane.xlu0 %136  ;;  %1806 = vset.pattern.permute.xlu1 %v1993_v5 }
 0x13a   :  { %v138_v1 = vadd.f32 %v137_v63, %v133_v62  ;;  %567 = vperm.xlu1 %1806, %v2107_v0  }
 0x13c   :  { %140 = vst.msk [vmem:[#allocation2] sm:$0xff] %vm139_vm2, %v138_v1  ;;  %vm1511_vm2 = vcmask 121968  }
 0x13e   :  { %1807 = vset.pattern.permute.xlu1 %v1994_v6 }
 0x13f   :  { %578 = vperm.xlu1 %1807, %v2107_v0  }
 0x143   :  { %1808 = vset.pattern.permute.xlu1 %v1995_v8  ;;  %v232_v11 = vld [vmem:[#allocation2] sm:$0xff] }
 0x144   :  { %589 = vperm.xlu1 %1808, %v2107_v0  }
 0x148   :  { %1809 = vset.pattern.permute.xlu1 %v1996_v9  ;;  %v1998_v9 = vmov 48  }
 0x149   :  { %600 = vperm.xlu1 %1809, %v2107_v0  }
 0x14d   :  { %1810 = vset.pattern.permute.xlu1 %v1997_v13  ;;  %v2002_v13 = vmov 52  }
 0x14e   :  { %611 = vperm.xlu1 %1810, %v2107_v0  }
 0x161   :  { %v235_v10 = vpop.xlane.xlu0 %234 }
 0x162   :  { %v236_v12 = vadd.f32 %v235_v10, %v232_v11  ;;  %v1999_v10 = vmov 49   ;;  %v2000_v11 = vmov 50  }
 0x164   :  { %238 = vst.msk [vmem:[#allocation2] sm:$0xff] %vm237_vm3, %v236_v12  ;;  %v2001_v12 = vmov 51   ;;  %vm1609_vm3 = vcmask 130168  }
 0x165   :  { %1814 = vset.pattern.permute.xlu1 %v2001_v12  ;;  %v2009_v12 = vmov 58  }
 0x16b   :  { %v330_v15 = vld [vmem:[#allocation2] sm:$0xff] }
 0x184   :  { %v333_v14 = vpop.xlane.xlu1 %332 }
 0x185   :  { %v334_v16 = vadd.f32 %v333_v14, %v330_v15  ;;  %v2003_v14 = vmov 53   ;;  %v2004_v15 = vmov 55  }
 0x187   :  { %336 = vst.msk [vmem:[#allocation2] sm:$0xff] %vm335_vm4, %v334_v16 }
 0x188   :  { %v437_v17 = vpop.permute.xlu1 %436 }
 0x189   :  { %v443_v32 = vsub.f32 %v437_v17, %v442_v26 }
 0x18b   :  { %v444_v43 = vand.u32 2147483647, %v443_v32 }
 0x18c   :  { %v448_v18 = vpop.permute.xlu1 %447 }
 0x18d   :  { %v454_v28 = vsub.f32 %v448_v18, %v453_v25 }
 0x18e   :  { %v428_v21 = vld [vmem:[#allocation2] sm:$0xff] }
 0x18f   :  { %v455_v36 = vand.u32 2147483647, %v454_v28 }
 0x191   :  { %v459_v19 = vpop.permute.xlu1 %458  ;;  %v456_v49 = vadd.f32 %v455_v36, %v444_v43 }
 0x192   :  { %v465_v33 = vsub.f32 %v459_v19, %v464_v27 }
 0x193   :  { %v431_v20 = vpop.xlane.xlu0 %430 }
 0x194   :  { %v432_v22 = vadd.f32 %v431_v20, %v428_v21  ;;  %v466_v44 = vand.u32 2147483647, %v465_v33  ;;  %v29_v20 = vld [vmem:[%s2488_s1 + $0x28] sm:$0xff] }
 0x195   :  { %v540_v25 = vrot.slane %v29_v20, %v2141_v35  ;;  %v562_v26 = vrot.slane %v29_v20, %v2146_v37  ;;  %v551_v27 = vrot.slane %v29_v20, %v2149_v39  ;;  %v595_v43 = vrot.slane %v29_v20, %v2157_v47 }
 0x196   :  { %434 = vst.msk [vmem:[#allocation2] sm:$0xff] %vm433_vm5, %v432_v22  ;;  %v470_v24 = vpop.permute.xlu1 %469  ;;  %v467_v52 = vadd.f32 %v466_v44, %v456_v49  ;;  %v606_v49 = vrot.slane %v29_v20, %v2162_v59 }
 0x197   :  { %v476_v38 = vsub.f32 %v470_v24, %v475_v29  ;;  %v573_v29 = vrot.slane %v29_v20, %v2151_v42 }
 0x199   :  { %v477_v50 = vand.u32 2147483647, %v476_v38 }
 0x19b   :  { %v481_v30 = vpop.permute.xlu1 %480  ;;  %v478_v55 = vadd.f32 %v477_v50, %v467_v52  ;;  %v617_v50 = vrot.slane %v29_v20, %v2165_v7 }
 0x19c   :  { %v487_v45 = vsub.f32 %v481_v30, %v486_v34  ;;  %v584_v34 = vrot.slane %v29_v20, %v2155_v46 }
 0x19d   :  { %v526_v22 = vld [vmem:[#allocation2] sm:$0xff] }
 0x19e   :  { %v488_v53 = vand.u32 2147483647, %v487_v45 }
 0x1a0   :  { %v492_v41 = vpop.permute.xlu1 %491  ;;  %v489_v58 = vadd.f32 %v488_v53, %v478_v55 }
 0x1a1   :  { %v498_v51 = vsub.f32 %v492_v41, %v497_v40 }
 0x1a3   :  { %v499_v56 = vand.u32 2147483647, %v498_v51 }
 0x1a5   :  { %v503_v54 = vpop.permute.xlu1 %502  ;;  %v500_v62 = vadd.f32 %v499_v56, %v489_v58 }
 0x1a6   :  { %v509_v31 = vsub.f32 %v503_v54, %v508_v48 }
 0x1a8   :  { %v510_v60 = vand.u32 2147483647, %v509_v31 }
 0x1aa   :  { %v514_v61 = vpop.permute.xlu1 %513  ;;  %v511_v1 = vadd.f32 %v510_v60, %v500_v62 }
 0x1ab   :  { %v520_v63 = vsub.f32 %v514_v61, %v519_v57 }
 0x1ad   :  { %v521_v2 = vand.u32 2147483647, %v520_v63 }
 0x1af   :  { %v522_v3 = vadd.f32 %v521_v2, %v511_v1  ;;  %v535_v16 = vpop.permute.xlu1 %534 }
 0x1b0   :  { %v541_v28 = vsub.f32 %v535_v16, %v540_v25 }
 0x1b1   :  { %v523_v4 = vmul.f32 -1.0, %v522_v3 }
 0x1b2   :  { %v542_v38 = vand.u32 2147483647, %v541_v28 }
 0x1b3   :  { %v524_v5 = vmul.f32 1.442695, %v523_v4 }
 0x1b4   :  { %v557_v17 = vpop.permute.xlu1 %556 }
 0x1b5   :  { %1899 = vpow2.f32 %v524_v5  ;;  %v563_v30 = vsub.f32 %v557_v17, %v562_v26 }
 0x1b7   :  { %v564_v44 = vand.u32 2147483647, %v563_v30 }
 0x1b9   :  { %v568_v18 = vpop.permute.xlu1 %567 }
 0x1ba   :  { %v574_v40 = vsub.f32 %v568_v18, %v573_v29  ;;  %v30_v18 = vld [vmem:[%s2488_s1 + $0x30] sm:$0xff] }
 0x1bb   :  { %v638_v20 = vrot.slane %v30_v18, %v2141_v35  ;;  %v660_v25 = vrot.slane %v30_v18, %v2146_v37  ;;  %v682_v30 = vrot.slane %v30_v18, %v2155_v46 }
 0x1bc   :  { %v575_v52 = vand.u32 2147483647, %v574_v40 }
 0x1be   :  { %v579_v19 = vpop.permute.xlu1 %578 }
 0x1bf   :  { %v1900_v6 = vpop.eup %1899  ;;  %v585_v45 = vsub.f32 %v579_v19, %v584_v34  ;;  %v671_v34 = vrot.slane %v30_v18, %v2151_v42 }
 0x1c0   :  { %v527_v8 = vsel %vm134_vm0, %v1900_v6, 0.0 }
 0x1c1   :  { %528 = vadd.xlane.f32.xlu0 %v527_v8  ;;  %v586_v31 = vand.u32 2147483647, %v585_v45  ;;  %v2005_v8 = vmov 54  }
 0x1c3   :  { %v590_v24 = vpop.permute.xlu1 %589 }
 0x1c4   :  { %v596_v54 = vsub.f32 %v590_v24, %v595_v43 }
 0x1c6   :  { %v597_v60 = vand.u32 2147483647, %v596_v54 }
 0x1c8   :  { %v601_v33 = vpop.permute.xlu1 %600 }
 0x1c9   :  { %v607_v56 = vsub.f32 %v601_v33, %v606_v49  ;;  %v715_v49 = vrot.slane %v30_v18, %v2165_v7 }
 0x1cb   :  { %v608_v62 = vand.u32 2147483647, %v607_v56 }
 0x1cd   :  { %v612_v51 = vpop.permute.xlu1 %611 }
 0x1ce   :  { %v618_v57 = vsub.f32 %v612_v51, %v617_v50 }
 0x1d0   :  { %v619_v63 = vand.u32 2147483647, %v618_v57 }
 0x1d7   :  { %545 = vperm.xlu0 %1804, %v2107_v0  }
 0x1db   :  { %1811 = vset.pattern.permute.xlu0 %v1998_v9  ;;  %v2006_v9 = vmov 56  }
 0x1dc   :  { %632 = vperm.xlu0 %1811, %v2107_v0  }
 0x1e0   :  { %1812 = vset.pattern.permute.xlu0 %v1999_v10  ;;  %v2007_v10 = vmov 57  }
 0x1e1   :  { %643 = vperm.xlu0 %1812, %v2107_v0  }
 0x1e5   :  { %1813 = vset.pattern.permute.xlu0 %v2000_v11  ;;  %v2008_v11 = vmov 60  }
 0x1e6   :  { %654 = vperm.xlu0 %1813, %v2107_v0  }
 0x1ea   :  { %1815 = vset.pattern.permute.xlu0 %v2002_v13  ;;  %v2010_v13 = vmov 59  }
 0x1eb   :  { %676 = vperm.xlu0 %1815, %v2107_v0  }
 0x1ef   :  { %1816 = vset.pattern.permute.xlu0 %v2003_v14  ;;  %v2011_v14 = vmov 61  }
 0x1f0   :  { %687 = vperm.xlu0 %1816, %v2107_v0  }
 0x1f4   :  { %1818 = vset.pattern.permute.xlu0 %v2004_v15  ;;  %v2012_v15 = vmov 62  }
 0x1f5   :  { %709 = vperm.xlu0 %1818, %v2107_v0  }
 0x1f9   :  { %1819 = vset.pattern.permute.xlu0 %v2006_v9  ;;  %v2014_v9 = vmov 64  }
 0x1fa   :  { %730 = vperm.xlu0 %1819, %v2107_v0  }
 0x1fe   :  { %1820 = vset.pattern.permute.xlu0 %v2007_v10  ;;  %v2015_v10 = vmov 65  }
 0x1ff   :  { %741 = vperm.xlu0 %1820, %v2107_v0  }
 0x203   :  { %1821 = vset.pattern.permute.xlu0 %v2009_v12  ;;  %v2017_v12 = vmov 67  }
 0x204   :  { %752 = vperm.xlu0 %1821, %v2107_v0  }
 0x208   :  { %1822 = vset.pattern.permute.xlu0 %v2010_v13  ;;  %v2018_v13 = vmov 68  }
 0x209   :  { %763 = vperm.xlu0 %1822, %v2107_v0  }
 0x20d   :  { %1824 = vset.pattern.permute.xlu0 %v2011_v14  ;;  %v2019_v14 = vmov 69  }
 0x20e   :  { %785 = vperm.xlu0 %1824, %v2107_v0  }
 0x212   :  { %1825 = vset.pattern.permute.xlu0 %v2012_v15  ;;  %v2020_v15 = vmov 70  }
 0x213   :  { %796 = vperm.xlu0 %1825, %v2107_v0  }
 0x24e   :  { %v529_v21 = vpop.xlane.xlu0 %528 }
 0x24f   :  { %v530_v23 = vadd.f32 %v529_v21, %v526_v22  ;;  %v649_v21 = vrot.slane %v30_v18, %v2149_v39 }
 0x251   :  { %532 = vst.msk [vmem:[#allocation2] sm:$0xff] %vm531_vm6, %v530_v23 }
 0x256   :  { %v546_v32 = vpop.permute.xlu0 %545 }
 0x257   :  { %v552_v36 = vsub.f32 %v546_v32, %v551_v27 }
 0x258   :  { %v624_v29 = vld [vmem:[#allocation2] sm:$0xff] }
 0x259   :  { %v553_v41 = vand.u32 2147483647, %v552_v36  ;;  %v693_v36 = vrot.slane %v30_v18, %v2157_v47 }
 0x25b   :  { %v554_v48 = vadd.f32 %v553_v41, %v542_v38  ;;  %v633_v16 = vpop.permute.xlu0 %632 }
 0x25c   :  { %v639_v23 = vsub.f32 %v633_v16, %v638_v20  ;;  %v2021_v16 = vmov 71   ;;  %v2025_v20 = vmov 75  }
 0x25d   :  { %v565_v53 = vadd.f32 %v564_v44, %v554_v48  ;;  %v704_v48 = vrot.slane %v30_v18, %v2162_v59  ;;  %v2023_v18 = vmov 73  }
 0x25e   :  { %v640_v26 = vand.u32 2147483647, %v639_v23  ;;  %1836 = vset.pattern.permute.xlu0 %v2023_v18  ;;  %v2028_v23 = vmov 78   ;;  %v32_v18 = vld [vmem:[%s2488_s1 + $0x40] sm:$0xff] }
 0x25f   :  { %v576_v55 = vadd.f32 %v575_v52, %v565_v53 }
 0x260   :  { %v644_v17 = vpop.permute.xlu0 %643 }
 0x261   :  { %v587_v58 = vadd.f32 %v586_v31, %v576_v55  ;;  %v650_v24 = vsub.f32 %v644_v17, %v649_v21  ;;  %v2022_v17 = vmov 72   ;;  %v2026_v21 = vmov 76  }
 0x263   :  { %v598_v61 = vadd.f32 %v597_v60, %v587_v58  ;;  %v651_v27 = vand.u32 2147483647, %v650_v24 }
 0x265   :  { %v609_v1 = vadd.f32 %v608_v62, %v598_v61  ;;  %v655_v19 = vpop.permute.xlu0 %654  ;;  %v652_v38 = vadd.f32 %v651_v27, %v640_v26  ;;  %v31_v27 = vld [vmem:[%s2488_s1 + $0x38] sm:$0xff] }
 0x266   :  { %v661_v28 = vsub.f32 %v655_v19, %v660_v25  ;;  %v2024_v19 = vmov 74   ;;  %v2029_v25 = vmov 79  }
 0x267   :  { %v620_v2 = vadd.f32 %v619_v63, %v609_v1 }
 0x268   :  { %v662_v40 = vand.u32 2147483647, %v661_v28  ;;  %v736_v28 = vrot.slane %v31_v27, %v2141_v35 }
 0x269   :  { %v621_v3 = vmul.f32 -1.0, %v620_v2 }
 0x26a   :  { %v677_v22 = vpop.permute.xlu0 %676  ;;  %v663_v51 = vadd.f32 %v662_v40, %v652_v38 }
 0x26b   :  { %v622_v4 = vmul.f32 1.442695, %v621_v3  ;;  %v683_v41 = vsub.f32 %v677_v22, %v682_v30  ;;  %v2027_v22 = vmov 77  }
 0x26d   :  { %1901 = vpow2.f32 %v622_v4  ;;  %v684_v53 = vand.u32 2147483647, %v683_v41  ;;  %v769_v41 = vrot.slane %v31_v27, %v2151_v42 }
 0x26f   :  { %v688_v32 = vpop.permute.xlu0 %687 }
 0x270   :  { %v694_v45 = vsub.f32 %v688_v32, %v693_v36 }
 0x272   :  { %v695_v55 = vand.u32 2147483647, %v694_v45 }
 0x274   :  { %v710_v50 = vpop.permute.xlu0 %709 }
 0x275   :  { %v716_v57 = vsub.f32 %v710_v50, %v715_v49  ;;  %v791_v49 = vrot.slane %v31_v27, %v2157_v47 }
 0x277   :  { %v1902_v5 = vpop.eup %1901  ;;  %v717_v62 = vand.u32 2147483647, %v716_v57 }
 0x278   :  { %v625_v6 = vsel %vm134_vm0, %v1902_v5, 0.0 }
 0x279   :  { %626 = vadd.xlane.f32.xlu1 %v625_v6  ;;  %v2285_v6 = vld [vmem:[%s2487_s0] sm:$0xff]  ;;  %v731_v24 = vpop.permute.xlu0 %730 }
 0x27a   :  { %v737_v30 = vsub.f32 %v731_v24, %v736_v28 }
 0x27c   :  { %v738_v36 = vand.u32 2147483647, %v737_v30 }
 0x27e   :  { %v742_v26 = vpop.permute.xlu0 %741 }
 0x28a   :  { %665 = vperm.xlu1 %1814, %v2107_v0  }
 0x28e   :  { %1817 = vset.pattern.permute.xlu1 %v2005_v8  ;;  %v2013_v8 = vmov 63  }
 0x28f   :  { %698 = vperm.xlu1 %1817, %v2107_v0  }
 0x293   :  { %1823 = vset.pattern.permute.xlu1 %v2008_v11  ;;  %v2016_v11 = vmov 66  }
 0x306   :  { %v627_v0 = vpop.xlane.xlu1 %626 }
 0x307   :  { %v628_v33 = vadd.f32 %v627_v0, %v624_v29  ;;  %v747_v0 = vrot.slane %v31_v27, %v2149_v39  ;;  %v753_v29 = vpop.permute.xlu0 %752 }
 0x309   :  { %630 = vst.msk [vmem:[#allocation2] sm:$0xff] %vm629_vm7, %v628_v33  ;;  %v748_v32 = vsub.f32 %v742_v26, %v747_v0  ;;  %v758_v33 = vrot.slane %v31_v27, %v2146_v37  ;;  %v867_v26 = vrot.slane %v32_v18, %v2151_v42 }
 0x30a   :  { %v666_v43 = vpop.permute.xlu1 %665 }
 0x30b   :  { %v672_v44 = vsub.f32 %v666_v43, %v671_v34  ;;  %v764_v34 = vpop.permute.xlu0 %763  ;;  %v749_v38 = vand.u32 2147483647, %v748_v32  ;;  %v759_v40 = vsub.f32 %v753_v29, %v758_v33  ;;  %v878_v29 = vrot.slane %v32_v18, %v2155_v46 }
 0x30c   :  { %v889_v33 = vrot.slane %v32_v18, %v2157_v47 }
 0x30d   :  { %v673_v52 = vand.u32 2147483647, %v672_v44  ;;  %v750_v43 = vadd.f32 %v749_v38, %v738_v36  ;;  %v760_v44 = vand.u32 2147483647, %v759_v40 }
 0x30e   :  { %v699_v54 = vpop.permute.xlu1 %698 }
 0x30f   :  { %v674_v31 = vadd.f32 %v673_v52, %v663_v51  ;;  %v705_v56 = vsub.f32 %v699_v54, %v704_v48  ;;  %v786_v45 = vpop.permute.xlu0 %785  ;;  %v770_v48 = vsub.f32 %v764_v34, %v769_v41  ;;  %v761_v50 = vadd.f32 %v760_v44, %v750_v43 }
 0x310   :  { %v722_v52 = vld [vmem:[#allocation2] sm:$0xff]  ;;  %v792_v57 = vsub.f32 %v786_v45, %v791_v49  ;;  %v900_v41 = vrot.slane %v32_v18, %v2162_v59 }
 0x311   :  { %v685_v58 = vadd.f32 %v684_v53, %v674_v31  ;;  %v706_v60 = vand.u32 2147483647, %v705_v56  ;;  %v771_v54 = vand.u32 2147483647, %v770_v48  ;;  %v780_v31 = vrot.slane %v31_v27, %v2155_v46 }
 0x313   :  { %v696_v61 = vadd.f32 %v695_v55, %v685_v58  ;;  %v802_v55 = vrot.slane %v31_v27, %v2162_v59  ;;  %v797_v56 = vpop.permute.xlu0 %796 }
 0x315   :  { %v707_v63 = vadd.f32 %v706_v60, %v696_v61  ;;  %v772_v60 = vadd.f32 %v771_v54, %v761_v50  ;;  %v911_v54 = vrot.slane %v32_v18, %v2165_v7 }
 0x317   :  { %v718_v1 = vadd.f32 %v717_v62, %v707_v63  ;;  %v813_v62 = vrot.slane %v31_v27, %v2165_v7  ;;  %v803_v63 = vsub.f32 %v797_v56, %v802_v55 }
 0x319   :  { %v719_v2 = vmul.f32 -1.0, %v718_v1 }
 0x31b   :  { %v720_v3 = vmul.f32 1.442695, %v719_v2  ;;  %v793_v2 = vand.u32 2147483647, %v792_v57 }
 0x31d   :  { %1903 = vpow2.f32 %v720_v3 }
 0x327   :  { %v1904_v4 = vpop.eup %1903 }
 0x328   :  { %v723_v5 = vsel %vm134_vm0, %v1904_v4, 0.0 }
 0x329   :  { %724 = vadd.xlane.f32.xlu1 %v723_v5 }
 0x33a   :  { %774 = vperm.xlu1 %1823, %v2285_v6  }
 0x33e   :  { %1826 = vset.pattern.permute.xlu1 %v2013_v8  ;;  %v804_v8 = vand.u32 2147483647, %v803_v63 }
 0x33f   :  { %807 = vperm.xlu1 %1826, %v2285_v6  }
 0x343   :  { %1827 = vset.pattern.permute.xlu1 %v2014_v9 }
 0x344   :  { %828 = vperm.xlu1 %1827, %v2285_v6  }
 0x348   :  { %1828 = vset.pattern.permute.xlu1 %v2015_v10 }
 0x349   :  { %839 = vperm.xlu1 %1828, %v2285_v6  }
 0x34d   :  { %1829 = vset.pattern.permute.xlu1 %v2016_v11 }
 0x34e   :  { %850 = vperm.xlu1 %1829, %v2285_v6  }
 0x352   :  { %1830 = vset.pattern.permute.xlu1 %v2017_v12 }
 0x353   :  { %861 = vperm.xlu1 %1830, %v2285_v6  }
 0x357   :  { %1831 = vset.pattern.permute.xlu1 %v2018_v13 }
 0x358   :  { %872 = vperm.xlu1 %1831, %v2285_v6  }
 0x35c   :  { %1832 = vset.pattern.permute.xlu1 %v2019_v14 }
 0x35d   :  { %883 = vperm.xlu1 %1832, %v2285_v6  }
 0x361   :  { %1833 = vset.pattern.permute.xlu1 %v2020_v15 }
 0x362   :  { %894 = vperm.xlu1 %1833, %v2285_v6  }
 0x366   :  { %1834 = vset.pattern.permute.xlu1 %v2021_v16 }
 0x367   :  { %905 = vperm.xlu1 %1834, %v2285_v6  }
 0x36b   :  { %1835 = vset.pattern.permute.xlu1 %v2022_v17 }
 0x36c   :  { %926 = vperm.xlu1 %1835, %v2285_v6  }
 0x370   :  { %1837 = vset.pattern.permute.xlu1 %v2024_v19 }
 0x371   :  { %948 = vperm.xlu1 %1837, %v2285_v6  }
 0x375   :  { %1838 = vset.pattern.permute.xlu1 %v2025_v20  ;;  %v845_v20 = vrot.slane %v32_v18, %v2149_v39 }
 0x376   :  { %959 = vperm.xlu1 %1838, %v2285_v6  }
 0x37a   :  { %1839 = vset.pattern.permute.xlu1 %v2026_v21 }
 0x37b   :  { %970 = vperm.xlu1 %1839, %v2285_v6  }
 0x37f   :  { %1840 = vset.pattern.permute.xlu1 %v2027_v22  ;;  %v834_v22 = vrot.slane %v32_v18, %v2141_v35 }
 0x380   :  { %981 = vperm.xlu1 %1840, %v2285_v6  }
 0x384   :  { %1841 = vset.pattern.permute.xlu1 %v2028_v23  ;;  %v856_v23 = vrot.slane %v32_v18, %v2146_v37 }
 0x385   :  { %992 = vperm.xlu1 %1841, %v2285_v6  }
 0x389   :  { %1842 = vset.pattern.permute.xlu1 %v2029_v25 }
 0x38a   :  { %1003 = vperm.xlu1 %1842, %v2285_v6  }
 0x3b6   :  { %v725_v51 = vpop.xlane.xlu1 %724 }
 0x3b7   :  { %v726_v53 = vadd.f32 %v725_v51, %v722_v52 }
 0x3b9   :  { %728 = vst.msk [vmem:[#allocation2] sm:$0xff] %vm727_vm8, %v726_v53 }
 0x3ba   :  { %v775_v58 = vpop.permute.xlu1 %774 }
 0x3bb   :  { %v781_v61 = vsub.f32 %v775_v58, %v780_v31 }
 0x3bd   :  { %v782_v1 = vand.u32 2147483647, %v781_v61 }
 0x3be   :  { %v808_v3 = vpop.permute.xlu1 %807 }
 0x3bf   :  { %v783_v4 = vadd.f32 %v782_v1, %v772_v60  ;;  %v814_v5 = vsub.f32 %v808_v3, %v813_v62 }
 0x3c1   :  { %v794_v9 = vadd.f32 %v793_v2, %v783_v4  ;;  %v815_v10 = vand.u32 2147483647, %v814_v5  ;;  %v2030_v4 = vmov 80   ;;  %v2031_v5 = vmov 81  }
 0x3c3   :  { %v805_v11 = vadd.f32 %v804_v8, %v794_v9  ;;  %v829_v12 = vpop.permute.xlu1 %828  ;;  %v2032_v8 = vmov 82   ;;  %v2033_v9 = vmov 83  }
 0x3c4   :  { %v835_v28 = vsub.f32 %v829_v12, %v834_v22  ;;  %1846 = vset.pattern.permute.xlu1 %v2033_v9  ;;  %v2038_v9 = vmov 88  }
 0x3c5   :  { %v816_v13 = vadd.f32 %v815_v10, %v805_v11  ;;  %v2034_v10 = vmov 84   ;;  %v2035_v11 = vmov 85  }
 0x3c6   :  { %v836_v36 = vand.u32 2147483647, %v835_v28 }
 0x3c7   :  { %v817_v14 = vmul.f32 -1.0, %v816_v13  ;;  %v820_v13 = vld [vmem:[#allocation2] sm:$0xff] }
 0x3c8   :  { %v840_v15 = vpop.permute.xlu1 %839 }
 0x3c9   :  { %v818_v16 = vmul.f32 1.442695, %v817_v14  ;;  %v846_v25 = vsub.f32 %v840_v15, %v845_v20 }
 0x3cb   :  { %1905 = vpow2.f32 %v818_v16  ;;  %v847_v30 = vand.u32 2147483647, %v846_v25 }
 0x3cd   :  { %v851_v17 = vpop.permute.xlu1 %850  ;;  %v848_v43 = vadd.f32 %v847_v30, %v836_v36 }
 0x3ce   :  { %v857_v0 = vsub.f32 %v851_v17, %v856_v23 }
 0x3d0   :  { %v858_v38 = vand.u32 2147483647, %v857_v0 }
 0x3d2   :  { %v862_v19 = vpop.permute.xlu1 %861  ;;  %v859_v48 = vadd.f32 %v858_v38, %v848_v43 }
 0x3d3   :  { %v868_v32 = vsub.f32 %v862_v19, %v867_v26  ;;  %v33_v19 = vld [vmem:[%s2488_s1 + $0x48] sm:$0xff] }
 0x3d4   :  { %v954_v25 = vrot.slane %v33_v19, %v2146_v37  ;;  %v943_v26 = vrot.slane %v33_v19, %v2149_v39  ;;  %v965_v28 = vrot.slane %v33_v19, %v2151_v42 }
 0x3d5   :  { %v1906_v21 = vpop.eup %1905  ;;  %v869_v44 = vand.u32 2147483647, %v868_v32  ;;  %v976_v32 = vrot.slane %v33_v19, %v2155_v46 }
 0x3d6   :  { %v821_v24 = vsel %vm134_vm0, %v1906_v21, 0.0 }
 0x3d7   :  { %v873_v27 = vpop.permute.xlu1 %872  ;;  %822 = vadd.xlane.f32.xlu0 %v821_v24  ;;  %v870_v52 = vadd.f32 %v869_v44, %v859_v48  ;;  %v932_v24 = vrot.slane %v33_v19, %v2141_v35  ;;  %v1009_v48 = vrot.slane %v33_v19, %v2165_v7 }
 0x3d8   :  { %v879_v40 = vsub.f32 %v873_v27, %v878_v29 }
 0x3da   :  { %v880_v49 = vand.u32 2147483647, %v879_v40  ;;  %v987_v40 = vrot.slane %v33_v19, %v2157_v47 }
 0x3dc   :  { %v884_v34 = vpop.permute.xlu1 %883  ;;  %v881_v31 = vadd.f32 %v880_v49, %v870_v52 }
 0x3dd   :  { %v890_v45 = vsub.f32 %v884_v34, %v889_v33 }
 0x3df   :  { %v891_v53 = vand.u32 2147483647, %v890_v45  ;;  %v998_v45 = vrot.slane %v33_v19, %v2162_v59  ;;  %v34_v19 = vld [vmem:[%s2488_s1 + $0x50] sm:$0xff] }
 0x3e1   :  { %v895_v50 = vpop.permute.xlu1 %894  ;;  %v892_v57 = vadd.f32 %v891_v53, %v881_v31 }
 0x3e2   :  { %v901_v51 = vsub.f32 %v895_v50, %v900_v41 }
 0x3e4   :  { %v902_v55 = vand.u32 2147483647, %v901_v51 }
 0x3e6   :  { %v906_v56 = vpop.permute.xlu1 %905  ;;  %v903_v60 = vadd.f32 %v902_v55, %v892_v57 }
 0x3e7   :  { %v912_v58 = vsub.f32 %v906_v56, %v911_v54 }
 0x3e9   :  { %v913_v61 = vand.u32 2147483647, %v912_v58 }
 0x3eb   :  { %v914_v62 = vadd.f32 %v913_v61, %v903_v60  ;;  %v927_v15 = vpop.permute.xlu1 %926 }
 0x3ec   :  { %v933_v27 = vsub.f32 %v927_v15, %v932_v24  ;;  %v2044_v15 = vmov 93  }
 0x3ed   :  { %v915_v63 = vmul.f32 -1.0, %v914_v62 }
 0x3ee   :  { %v934_v34 = vand.u32 2147483647, %v933_v27 }
 0x3ef   :  { %v916_v1 = vmul.f32 1.442695, %v915_v63 }
 0x3f0   :  { %v949_v16 = vpop.permute.xlu1 %948 }
 0x3f1   :  { %1907 = vpow2.f32 %v916_v1  ;;  %v955_v0 = vsub.f32 %v949_v16, %v954_v25  ;;  %v2045_v16 = vmov 94   ;;  %v1052_v25 = vrot.slane %v34_v19, %v2146_v37 }
 0x3f3   :  { %v956_v41 = vand.u32 2147483647, %v955_v0 }
 0x3f5   :  { %v960_v17 = vpop.permute.xlu1 %959 }
 0x3f6   :  { %v966_v36 = vsub.f32 %v960_v17, %v965_v28 }
 0x3f8   :  { %v967_v50 = vand.u32 2147483647, %v966_v36  ;;  %v1085_v36 = vrot.slane %v34_v19, %v2157_v47 }
 0x3fa   :  { %v971_v18 = vpop.permute.xlu1 %970 }
 0x3fb   :  { %v1908_v2 = vpop.eup %1907  ;;  %v977_v43 = vsub.f32 %v971_v18, %v976_v32 }
 0x3fc   :  { %v919_v3 = vsel %vm134_vm0, %v1908_v2, 0.0 }
 0x3fd   :  { %920 = vadd.xlane.f32.xlu0 %v919_v3  ;;  %v978_v53 = vand.u32 2147483647, %v977_v43 }
 0x3ff   :  { %v982_v23 = vpop.permute.xlu1 %981 }
 0x400   :  { %v988_v52 = vsub.f32 %v982_v23, %v987_v40 }
 0x402   :  { %v989_v57 = vand.u32 2147483647, %v988_v52 }
 0x404   :  { %v993_v30 = vpop.permute.xlu1 %992 }
 0x405   :  { %v999_v31 = vsub.f32 %v993_v30, %v998_v45 }
 0x407   :  { %v1000_v60 = vand.u32 2147483647, %v999_v31 }
 0x409   :  { %v1004_v49 = vpop.permute.xlu1 %1003 }
 0x40a   :  { %v1010_v55 = vsub.f32 %v1004_v49, %v1009_v48  ;;  %v1096_v48 = vrot.slane %v34_v19, %v2162_v59 }
 0x40c   :  { %v1011_v61 = vand.u32 2147483647, %v1010_v55 }
 0x413   :  { %937 = vperm.xlu0 %1836, %v2285_v6  }
 0x417   :  { %1843 = vset.pattern.permute.xlu0 %v2030_v4 }
 0x418   :  { %1024 = vperm.xlu0 %1843, %v2285_v6  }
 0x41c   :  { %1844 = vset.pattern.permute.xlu0 %v2031_v5  ;;  %v2036_v5 = vmov 86  }
 0x41d   :  { %1035 = vperm.xlu0 %1844, %v2285_v6  }
 0x421   :  { %1845 = vset.pattern.permute.xlu0 %v2032_v8  ;;  %v2037_v8 = vmov 87  }
 0x422   :  { %1046 = vperm.xlu0 %1845, %v2285_v6  }
 0x426   :  { %1847 = vset.pattern.permute.xlu0 %v2034_v10  ;;  %v2039_v10 = vmov 89  }
 0x427   :  { %1068 = vperm.xlu0 %1847, %v2285_v6  }
 0x42b   :  { %1848 = vset.pattern.permute.xlu0 %v2035_v11  ;;  %v2040_v11 = vmov 90  }
 0x42c   :  { %1079 = vperm.xlu0 %1848, %v2285_v6  }
 0x464   :  { %v823_v12 = vpop.xlane.xlu0 %822 }
 0x465   :  { %v824_v14 = vadd.f32 %v823_v12, %v820_v13  ;;  %v2041_v12 = vmov 91   ;;  %v2042_v13 = vmov 95  }
 0x466   :  { %1858 = vset.pattern.permute.xlu0 %v2042_v13 }
 0x467   :  { %826 = vst.msk [vmem:[#allocation2] sm:$0xff] %vm825_vm9, %v824_v14  ;;  %v2043_v14 = vmov 92  }
 0x46e   :  { %v918_v21 = vld [vmem:[#allocation2] sm:$0xff] }
 0x48a   :  { %v921_v20 = vpop.xlane.xlu0 %920 }
 0x48b   :  { %v922_v22 = vadd.f32 %v921_v20, %v918_v21  ;;  %v1030_v20 = vrot.slane %v34_v19, %v2141_v35  ;;  %v1041_v21 = vrot.slane %v34_v19, %v2149_v39 }
 0x48d   :  { %924 = vst.msk [vmem:[#allocation2] sm:$0xff] %vm923_vm10, %v922_v22 }
 0x492   :  { %v938_v29 = vpop.permute.xlu0 %937 }
 0x493   :  { %v944_v33 = vsub.f32 %v938_v29, %v943_v26 }
 0x494   :  { %v1016_v30 = vld [vmem:[#allocation2] sm:$0xff] }
 0x495   :  { %v945_v38 = vand.u32 2147483647, %v944_v33  ;;  %v1063_v33 = vrot.slane %v34_v19, %v2151_v42 }
 0x497   :  { %v946_v44 = vadd.f32 %v945_v38, %v934_v34  ;;  %v1025_v17 = vpop.permute.xlu0 %1024  ;;  %v1074_v34 = vrot.slane %v34_v19, %v2155_v46 }
 0x498   :  { %v1031_v23 = vsub.f32 %v1025_v17, %v1030_v20 }
 0x499   :  { %v957_v51 = vadd.f32 %v956_v41, %v946_v44 }
 0x49a   :  { %v1032_v27 = vand.u32 2147483647, %v1031_v23 }
 0x49b   :  { %v968_v54 = vadd.f32 %v967_v50, %v957_v51 }
 0x49c   :  { %v1036_v18 = vpop.permute.xlu0 %1035 }
 0x49d   :  { %v979_v56 = vadd.f32 %v978_v53, %v968_v54  ;;  %v1042_v24 = vsub.f32 %v1036_v18, %v1041_v21 }
 0x49f   :  { %v990_v58 = vadd.f32 %v989_v57, %v979_v56  ;;  %v1043_v28 = vand.u32 2147483647, %v1042_v24  ;;  %v1107_v56 = vrot.slane %v34_v19, %v2165_v7 }
 0x4a1   :  { %v1001_v62 = vadd.f32 %v1000_v60, %v990_v58  ;;  %v1047_v22 = vpop.permute.xlu0 %1046  ;;  %v1044_v40 = vadd.f32 %v1043_v28, %v1032_v27 }
 0x4a2   :  { %v1053_v0 = vsub.f32 %v1047_v22, %v1052_v25 }
 0x4a3   :  { %v1012_v63 = vadd.f32 %v1011_v61, %v1001_v62 }
 0x4a4   :  { %v1054_v41 = vand.u32 2147483647, %v1053_v0 }
 0x4a5   :  { %v1013_v1 = vmul.f32 -1.0, %v1012_v63 }
 0x4a6   :  { %v1069_v26 = vpop.permute.xlu0 %1068  ;;  %v1055_v50 = vadd.f32 %v1054_v41, %v1044_v40 }
 0x4a7   :  { %v1014_v2 = vmul.f32 1.442695, %v1013_v1  ;;  %v1075_v45 = vsub.f32 %v1069_v26, %v1074_v34 }
 0x4a9   :  { %1909 = vpow2.f32 %v1014_v2  ;;  %v1076_v54 = vand.u32 2147483647, %v1075_v45 }
 0x4ab   :  { %v1080_v38 = vpop.permute.xlu0 %1079 }
 0x4ac   :  { %v1086_v49 = vsub.f32 %v1080_v38, %v1085_v36 }
 0x4ae   :  { %v1087_v55 = vand.u32 2147483647, %v1086_v49 }
 0x4b3   :  { %v1910_v3 = vpop.eup %1909 }
 0x4b4   :  { %v1017_v4 = vsel %vm134_vm0, %v1910_v3, 0.0 }
 0x4b5   :  { %1018 = vadd.xlane.f32.xlu1 %v1017_v4 }
 0x4c6   :  { %1057 = vperm.xlu1 %1846, %v2285_v6  }
 0x4ca   :  { %1849 = vset.pattern.permute.xlu1 %v2036_v5 }
 0x4cb   :  { %1090 = vperm.xlu1 %1849, %v2285_v6  }
 0x4cf   :  { %1850 = vset.pattern.permute.xlu1 %v2037_v8 }
 0x4d0   :  { %1101 = vperm.xlu1 %1850, %v2285_v6  }
 0x4d4   :  { %1851 = vset.pattern.permute.xlu1 %v2038_v9  ;;  %v2046_v9 = vmov 97  }
 0x4d5   :  { %1122 = vperm.xlu1 %1851, %v2285_v6  }
 0x4d9   :  { %1852 = vset.pattern.permute.xlu1 %v2039_v10  ;;  %v2047_v10 = vmov 96  }
 0x4da   :  { %1133 = vperm.xlu1 %1852, %v2285_v6  }
 0x4de   :  { %1853 = vset.pattern.permute.xlu1 %v2040_v11  ;;  %v2048_v11 = vmov 98  }
 0x4df   :  { %1144 = vperm.xlu1 %1853, %v2285_v6  }
 0x4e3   :  { %1854 = vset.pattern.permute.xlu1 %v2041_v12  ;;  %v2049_v12 = vmov 101  }
 0x4e4   :  { %1155 = vperm.xlu1 %1854, %v2285_v6  }
 0x4e8   :  { %1855 = vset.pattern.permute.xlu1 %v2043_v14 }
 0x4e9   :  { %1166 = vperm.xlu1 %1855, %v2285_v6  }
 0x4ed   :  { %1856 = vset.pattern.permute.xlu1 %v2044_v15  ;;  %v35_v15 = vld [vmem:[%s2488_s1 + $0x58] sm:$0xff] }
 0x4ee   :  { %1177 = vperm.xlu1 %1856, %v2285_v6   ;;  %v1128_v17 = vrot.slane %v35_v15, %v2141_v35  ;;  %v1139_v18 = vrot.slane %v35_v15, %v2149_v39  ;;  %v1150_v22 = vrot.slane %v35_v15, %v2146_v37  ;;  %v1161_v26 = vrot.slane %v35_v15, %v2151_v42 }
 0x4ef   :  { %v1183_v38 = vrot.slane %v35_v15, %v2157_v47 }
 0x4f2   :  { %1857 = vset.pattern.permute.xlu1 %v2045_v16 }
 0x4f3   :  { %1188 = vperm.xlu1 %1857, %v2285_v6  }
 0x4f7   :  { %1859 = vset.pattern.permute.xlu1 %v2047_v10  ;;  %v2055_v10 = vmov 105  }
 0x542   :  { %v1019_v29 = vpop.xlane.xlu1 %1018 }
 0x543   :  { %v1020_v32 = vadd.f32 %v1019_v29, %v1016_v30  ;;  %v1172_v30 = vrot.slane %v35_v15, %v2155_v46 }
 0x545   :  { %1022 = vst.msk [vmem:[#allocation2] sm:$0xff] %vm1021_vm11, %v1020_v32 }
 0x546   :  { %v1058_v43 = vpop.permute.xlu1 %1057 }
 0x547   :  { %v1064_v44 = vsub.f32 %v1058_v43, %v1063_v33 }
 0x549   :  { %v1065_v51 = vand.u32 2147483647, %v1064_v44  ;;  %v1194_v44 = vrot.slane %v35_v15, %v2162_v59 }
 0x54a   :  { %v1091_v52 = vpop.permute.xlu1 %1090 }
 0x54b   :  { %v1066_v53 = vadd.f32 %v1065_v51, %v1055_v50  ;;  %v1097_v31 = vsub.f32 %v1091_v52, %v1096_v48 }
 0x54c   :  { %v1114_v49 = vld [vmem:[#allocation2] sm:$0xff] }
 0x54d   :  { %v1077_v57 = vadd.f32 %v1076_v54, %v1066_v53  ;;  %v1098_v58 = vand.u32 2147483647, %v1097_v31  ;;  %v1205_v54 = vrot.slane %v35_v15, %v2165_v7  ;;  %v2060_v15 = vmov 110  }
 0x54f   :  { %v1088_v60 = vadd.f32 %v1087_v55, %v1077_v57  ;;  %v1102_v61 = vpop.permute.xlu1 %1101 }
 0x550   :  { %v1108_v62 = vsub.f32 %v1102_v61, %v1107_v56 }
 0x551   :  { %v1099_v63 = vadd.f32 %v1098_v58, %v1088_v60 }
 0x552   :  { %v1109_v1 = vand.u32 2147483647, %v1108_v62 }
 0x554   :  { %v1110_v2 = vadd.f32 %v1109_v1, %v1099_v63  ;;  %v1123_v13 = vpop.permute.xlu1 %1122 }
 0x555   :  { %v1129_v20 = vsub.f32 %v1123_v13, %v1128_v17  ;;  %v2058_v13 = vmov 108   ;;  %v2062_v17 = vmov 113  }
 0x556   :  { %v1111_v3 = vmul.f32 -1.0, %v1110_v2 }
 0x557   :  { %v1130_v23 = vand.u32 2147483647, %v1129_v20  ;;  %v2065_v20 = vmov 115  }
 0x558   :  { %v1112_v4 = vmul.f32 1.442695, %v1111_v3  ;;  %v2050_v3 = vmov 99  }
 0x559   :  { %v1134_v14 = vpop.permute.xlu1 %1133 }
 0x55a   :  { %1911 = vpow2.f32 %v1112_v4  ;;  %v1140_v21 = vsub.f32 %v1134_v14, %v1139_v18  ;;  %v2051_v4 = vmov 100   ;;  %v2059_v14 = vmov 109  }
 0x55b   :  { %v2063_v18 = vmov 111  }
 0x55c   :  { %v1141_v24 = vand.u32 2147483647, %v1140_v21  ;;  %v2066_v21 = vmov 116  }
 0x55e   :  { %v1145_v16 = vpop.permute.xlu1 %1144  ;;  %v1142_v28 = vadd.f32 %v1141_v24, %v1130_v23  ;;  %v2068_v23 = vmov 118   ;;  %v2069_v24 = vmov 120  }
 0x55f   :  { %v1151_v25 = vsub.f32 %v1145_v16, %v1150_v22  ;;  %v2061_v16 = vmov 112   ;;  %v2067_v22 = vmov 117  }
 0x561   :  { %v1152_v0 = vand.u32 2147483647, %v1151_v25  ;;  %v2070_v25 = vmov 121  }
 0x563   :  { %v1156_v19 = vpop.permute.xlu1 %1155  ;;  %v1153_v33 = vadd.f32 %v1152_v0, %v1142_v28  ;;  %v2073_v28 = vmov 123   ;;  %v36_v0 = vld [vmem:[%s2488_s1 + $0x60] sm:$0xff] }
 0x564   :  { %v1912_v5 = vpop.eup %1911  ;;  %v1162_v29 = vsub.f32 %v1156_v19, %v1161_v26  ;;  %v2064_v19 = vmov 114   ;;  %v2071_v26 = vmov 119  }
 0x565   :  { %v1115_v8 = vsel %vm134_vm0, %v1912_v5, 0.0  ;;  %v2052_v5 = vmov 102  }
 0x566   :  { %1116 = vadd.xlane.f32.xlu0 %v1115_v8  ;;  %v1163_v34 = vand.u32 2147483647, %v1162_v29  ;;  %v2053_v8 = vmov 103  }
 0x568   :  { %v1167_v27 = vpop.permute.xlu1 %1166  ;;  %v1164_v40 = vadd.f32 %v1163_v34, %v1153_v33 }
 0x569   :  { %v1173_v36 = vsub.f32 %v1167_v27, %v1172_v30  ;;  %v2072_v27 = vmov 122   ;;  %v2074_v30 = vmov 125  }
 0x56b   :  { %v1174_v41 = vand.u32 2147483647, %v1173_v36  ;;  %v1248_v36 = vrot.slane %v36_v0, %v2146_v37 }
 0x56d   :  { %v1178_v32 = vpop.permute.xlu1 %1177  ;;  %v1175_v51 = vadd.f32 %v1174_v41, %v1164_v40 }
 0x56e   :  { %v1184_v43 = vsub.f32 %v1178_v32, %v1183_v38  ;;  %v1237_v32 = vrot.slane %v36_v0, %v2149_v39  ;;  %v2075_v38 = vmov 126  }
 0x570   :  { %v1185_v52 = vand.u32 2147483647, %v1184_v43  ;;  %v1226_v43 = vrot.slane %v36_v0, %v2141_v35 }
 0x572   :  { %v1189_v45 = vpop.permute.xlu1 %1188  ;;  %v1186_v31 = vadd.f32 %v1185_v52, %v1175_v51  ;;  %v1259_v51 = vrot.slane %v36_v0, %v2151_v42 }
 0x573   :  { %v1195_v53 = vsub.f32 %v1189_v45, %v1194_v44 }
 0x575   :  { %v1196_v55 = vand.u32 2147483647, %v1195_v53 }
 0x577   :  { %v1197_v58 = vadd.f32 %v1196_v55, %v1186_v31 }
 0x57c   :  { %1199 = vperm.xlu0 %1858, %v2285_v6  }
 0x580   :  { %1860 = vset.pattern.permute.xlu0 %v2046_v9  ;;  %v2054_v9 = vmov 104  }
 0x581   :  { %1231 = vperm.xlu0 %1860, %v2285_v6  }
 0x585   :  { %1861 = vset.pattern.permute.xlu0 %v2048_v11  ;;  %v2056_v11 = vmov 106  }
 0x586   :  { %1242 = vperm.xlu0 %1861, %v2285_v6  }
 0x58a   :  { %1864 = vset.pattern.permute.xlu0 %v2049_v12  ;;  %v2057_v12 = vmov 107  }
 0x58b   :  { %1275 = vperm.xlu0 %1864, %v2285_v6  }
 0x58f   :  { %1875 = vset.pattern.permute.xlu0 %v2062_v17 }
 0x5f3   :  { %v1117_v48 = vpop.xlane.xlu0 %1116 }
 0x5f4   :  { %v1118_v50 = vadd.f32 %v1117_v48, %v1114_v49 }
 0x5f6   :  { %1120 = vst.msk [vmem:[#allocation2] sm:$0xff] %vm1119_vm12, %v1118_v50 }
 0x5fb   :  { %v1200_v56 = vpop.permute.xlu0 %1199 }
 0x5fc   :  { %v1206_v57 = vsub.f32 %v1200_v56, %v1205_v54  ;;  %v1270_v56 = vrot.slane %v36_v0, %v2155_v46 }
 0x5fd   :  { %v1212_v34 = vld [vmem:[#allocation2] sm:$0xff] }
 0x5fe   :  { %v1207_v60 = vand.u32 2147483647, %v1206_v57  ;;  %v1281_v57 = vrot.slane %v36_v0, %v2157_v47 }
 0x600   :  { %v1208_v61 = vadd.f32 %v1207_v60, %v1197_v58  ;;  %v1232_v29 = vpop.permute.xlu0 %1231 }
 0x601   :  { %v1238_v41 = vsub.f32 %v1232_v29, %v1237_v32 }
 0x602   :  { %v1209_v62 = vmul.f32 -1.0, %v1208_v61 }
 0x603   :  { %v1239_v49 = vand.u32 2147483647, %v1238_v41 }
 0x604   :  { %v1210_v63 = vmul.f32 1.442695, %v1209_v62 }
 0x605   :  { %v1243_v44 = vpop.permute.xlu0 %1242 }
 0x606   :  { %1913 = vpow2.f32 %v1210_v63  ;;  %v1249_v48 = vsub.f32 %v1243_v44, %v1248_v36 }
 0x608   :  { %v1250_v53 = vand.u32 2147483647, %v1249_v48 }
 0x60a   :  { %v1276_v58 = vpop.permute.xlu0 %1275 }
 0x60b   :  { %v1282_v63 = vsub.f32 %v1276_v58, %v1281_v57 }
 0x610   :  { %v1914_v1 = vpop.eup %1913 }
 0x611   :  { %v1213_v2 = vsel %vm134_vm0, %v1914_v1, 0.0  ;;  %v1292_v1 = vrot.slane %v36_v0, %v2162_v59 }
 0x612   :  { %1214 = vadd.xlane.f32.xlu1 %v1213_v2 }
 0x623   :  { %1220 = vperm.xlu1 %1859, %v2285_v6  }
 0x627   :  { %1862 = vset.pattern.permute.xlu1 %v2050_v3 }
 0x628   :  { %1253 = vperm.xlu1 %1862, %v2285_v6  }
 0x62c   :  { %1863 = vset.pattern.permute.xlu1 %v2051_v4 }
 0x62d   :  { %1264 = vperm.xlu1 %1863, %v2285_v6  }
 0x631   :  { %1865 = vset.pattern.permute.xlu1 %v2052_v5  ;;  %v1283_v5 = vand.u32 2147483647, %v1282_v63 }
 0x632   :  { %1286 = vperm.xlu1 %1865, %v2285_v6  }
 0x636   :  { %1866 = vset.pattern.permute.xlu1 %v2053_v8 }
 0x637   :  { %1297 = vperm.xlu1 %1866, %v2285_v6  }
 0x63b   :  { %1867 = vset.pattern.permute.xlu1 %v2054_v9 }
 0x63c   :  { %1318 = vperm.xlu1 %1867, %v2285_v6  }
 0x640   :  { %1868 = vset.pattern.permute.xlu1 %v2055_v10  ;;  %v1303_v10 = vrot.slane %v36_v0, %v2165_v7 }
 0x641   :  { %1329 = vperm.xlu1 %1868, %v2285_v6  }
 0x645   :  { %1869 = vset.pattern.permute.xlu1 %v2056_v11 }
 0x646   :  { %1340 = vperm.xlu1 %1869, %v2285_v6  }
 0x64a   :  { %1870 = vset.pattern.permute.xlu1 %v2057_v12 }
 0x64b   :  { %1351 = vperm.xlu1 %1870, %v2285_v6  }
 0x64f   :  { %1871 = vset.pattern.permute.xlu1 %v2058_v13 }
 0x650   :  { %1362 = vperm.xlu1 %1871, %v2285_v6  }
 0x654   :  { %1872 = vset.pattern.permute.xlu1 %v2059_v14 }
 0x655   :  { %1373 = vperm.xlu1 %1872, %v2285_v6  }
 0x659   :  { %1873 = vset.pattern.permute.xlu1 %v2060_v15 }
 0x65a   :  { %1384 = vperm.xlu1 %1873, %v2285_v6  }
 0x65e   :  { %1874 = vset.pattern.permute.xlu1 %v2061_v16 }
 0x65f   :  { %1416 = vperm.xlu1 %1874, %v2285_v6  }
 0x663   :  { %1876 = vset.pattern.permute.xlu1 %v2063_v18 }
 0x664   :  { %1395 = vperm.xlu1 %1876, %v2285_v6  }
 0x668   :  { %1877 = vset.pattern.permute.xlu1 %v2064_v19 }
 0x669   :  { %1438 = vperm.xlu1 %1877, %v2285_v6  }
 0x66d   :  { %1878 = vset.pattern.permute.xlu1 %v2065_v20 }
 0x66e   :  { %1449 = vperm.xlu1 %1878, %v2285_v6  }
 0x672   :  { %1879 = vset.pattern.permute.xlu1 %v2066_v21 }
 0x673   :  { %1460 = vperm.xlu1 %1879, %v2285_v6  }
 0x677   :  { %1880 = vset.pattern.permute.xlu1 %v2067_v22  ;;  %v37_v22 = vld [vmem:[%s2488_s1 + $0x68] sm:$0xff] }
 0x678   :  { %1471 = vperm.xlu1 %1880, %v2285_v6   ;;  %v1368_v44 = vrot.slane %v37_v22, %v2155_v46 }
 0x67c   :  { %1881 = vset.pattern.permute.xlu1 %v2068_v23  ;;  %v1324_v23 = vrot.slane %v37_v22, %v2141_v35 }
 0x67d   :  { %1482 = vperm.xlu1 %1881, %v2285_v6  }
 0x681   :  { %1882 = vset.pattern.permute.xlu1 %v2069_v24  ;;  %v1335_v24 = vrot.slane %v37_v22, %v2149_v39 }
 0x682   :  { %1514 = vperm.xlu1 %1882, %v2285_v6  }
 0x686   :  { %1883 = vset.pattern.permute.xlu1 %v2070_v25 }
 0x687   :  { %1525 = vperm.xlu1 %1883, %v2285_v6  }
 0x68b   :  { %1884 = vset.pattern.permute.xlu1 %v2071_v26 }
 0x68c   :  { %1493 = vperm.xlu1 %1884, %v2285_v6  }
 0x690   :  { %1885 = vset.pattern.permute.xlu1 %v2072_v27 }
 0x691   :  { %1536 = vperm.xlu1 %1885, %v2285_v6  }
 0x695   :  { %1886 = vset.pattern.permute.xlu1 %v2073_v28  ;;  %v1346_v28 = vrot.slane %v37_v22, %v2146_v37 }
 0x696   :  { %1547 = vperm.xlu1 %1886, %v2285_v6  }
 0x69a   :  { %1888 = vset.pattern.permute.xlu1 %v2074_v30  ;;  %v1357_v30 = vrot.slane %v37_v22, %v2151_v42 }
 0x69b   :  { %1569 = vperm.xlu1 %1888, %v2285_v6  }
 0x69f   :  { %v1215_v33 = vpop.xlane.xlu1 %1214  ;;  %1889 = vset.pattern.permute.xlu1 %v2075_v38 }
 0x6a0   :  { %v1216_v40 = vadd.f32 %v1215_v33, %v1212_v34  ;;  %1580 = vperm.xlu1 %1889, %v2285_v6  }
 0x6a2   :  { %1218 = vst.msk [vmem:[#allocation2] sm:$0xff] %vm1217_vm13, %v1216_v40 }
 0x6a3   :  { %v1221_v45 = vpop.permute.xlu1 %1220 }
 0x6a4   :  { %v1227_v50 = vsub.f32 %v1221_v45, %v1226_v43 }
 0x6a6   :  { %v1228_v52 = vand.u32 2147483647, %v1227_v50  ;;  %v1379_v50 = vrot.slane %v37_v22, %v2157_v47 }
 0x6a7   :  { %v1254_v54 = vpop.permute.xlu1 %1253 }
 0x6a8   :  { %v1240_v31 = vadd.f32 %v1239_v49, %v1228_v52  ;;  %v1260_v55 = vsub.f32 %v1254_v54, %v1259_v51 }
 0x6aa   :  { %v1251_v60 = vadd.f32 %v1250_v53, %v1240_v31  ;;  %v1261_v61 = vand.u32 2147483647, %v1260_v55  ;;  %v1390_v31 = vrot.slane %v37_v22, %v2162_v59 }
 0x6ac   :  { %v1265_v6 = vpop.permute.xlu1 %1264  ;;  %v1262_v2 = vadd.f32 %v1261_v61, %v1251_v60 }
 0x6ad   :  { %v1271_v62 = vsub.f32 %v1265_v6, %v1270_v56 }
 0x6af   :  { %v1272_v3 = vand.u32 2147483647, %v1271_v62  ;;  %v1401_v62 = vrot.slane %v37_v22, %v2165_v7  ;;  %v2442_v22 = vld [vmem:[%s2488_s1 + $0x78] sm:$0xff] }
 0x6b1   :  { %v1273_v4 = vadd.f32 %v1272_v3, %v1262_v2  ;;  %v1287_v8 = vpop.permute.xlu1 %1286 }
 0x6b2   :  { %v1293_v9 = vsub.f32 %v1287_v8, %v1292_v1  ;;  %v1924_v1 = vld [vmem:[%s2487_s0] sm:$0xff] }
 0x6b3   :  { %v1284_v11 = vadd.f32 %v1283_v5, %v1273_v4  ;;  %v2076_v5 = vmov 124  }
 0x6b4   :  { %v1294_v12 = vand.u32 2147483647, %v1293_v9 }
 0x6b6   :  { %v1298_v13 = vpop.permute.xlu1 %1297  ;;  %v1295_v15 = vadd.f32 %v1294_v12, %v1284_v11  ;;  %v2077_v11 = vmov 127  }
 0x6b7   :  { %v1304_v14 = vsub.f32 %v1298_v13, %v1303_v10 }
 0x6b9   :  { %v1305_v16 = vand.u32 2147483647, %v1304_v14 }
 0x6bb   :  { %v1306_v17 = vadd.f32 %v1305_v16, %v1295_v15  ;;  %v1319_v18 = vpop.permute.xlu1 %1318 }
 0x6bc   :  { %v1325_v26 = vsub.f32 %v1319_v18, %v1324_v23 }
 0x6bd   :  { %v1307_v19 = vmul.f32 -1.0, %v1306_v17 }
 0x6be   :  { %v1326_v32 = vand.u32 2147483647, %v1325_v26  ;;  %v38_v26 = vld [vmem:[%s2488_s1 + $0x70] sm:$0xff]  ;;  %s2078_s1 = smov [#allocation3]  }
 0x6bf   :  { %v1308_v20 = vmul.f32 1.442695, %v1307_v19  ;;  %s1624_s22 = sshll.u32 %s2078_s1, 4  ;;  %s1625_s22 = int_to_ptr.vmem [resolvable:$true] %s1624_s22 }
 0x6c0   :  { %v1330_v21 = vpop.permute.xlu1 %1329  ;;  %s1925_s23 = scalar_lea.vmem %s1625_s22, 128  ;;  %p1930_p1 = scmp.lt.s32.totalorder %s1625_s22, %s1625_s22 }
 0x6c1   :  { %1915 = vpow2.f32 %v1308_v20  ;;  %v1336_v27 = vsub.f32 %v1330_v21, %v1335_v24  ;;  %v1520_v24 = vrot.slane %v2442_v22, %v2141_v35  ;;  %p1926_p0 = scmp.ne.s32.totalorder %s1625_s22, %s1925_s23  ;;  %p1931_p2 = scmp.lt.s32.totalorder %s1925_s23, %s1925_s23 }
 0x6c3   :  { %v1337_v33 = vand.u32 2147483647, %v1336_v27  ;;  %p1932_p3 = por %p1931_p2, %p1930_p1 }
 0x6c5   :  { %v1341_v25 = vpop.permute.xlu1 %1340  ;;  %v1338_v40 = vadd.f32 %v1337_v33, %v1326_v32  ;;  %p1933_p4 = pnand %p1932_p3, %p1926_p0 }
 0x6c6   :  { %v1347_v34 = vsub.f32 %v1341_v25, %v1346_v28  ;;  %v1531_v25 = vrot.slane %v2442_v22, %v2149_v39 }
 0x6c8   :  { %v1348_v41 = vand.u32 2147483647, %v1347_v34  ;;  %v1422_v34 = vrot.slane %v38_v26, %v2141_v35  ;;  %v1575_v35 = vrot.slane %v2442_v22, %v2157_v47 }
 0x6ca   :  { %v1352_v0 = vpop.permute.xlu1 %1351  ;;  %v1349_v45 = vadd.f32 %v1348_v41, %v1338_v40  ;;  %v1553_v41 = vrot.slane %v2442_v22, %v2151_v42 }
 0x6cb   :  { %v1916_v29 = vpop.eup %1915  ;;  %v1358_v43 = vsub.f32 %v1352_v0, %v1357_v30  ;;  %v1542_v0 = vrot.slane %v2442_v22, %v2146_v37  ;;  %v1310_v30 = vld [vmem:[#allocation2] sm:$0xff] }
 0x6cc   :  { %v1311_v36 = vsel %vm134_vm0, %v1916_v29, 0.0 }
 0x6cd   :  { %1312 = vadd.xlane.f32.xlu0 %v1311_v36  ;;  %v1359_v48 = vand.u32 2147483647, %v1358_v43  ;;  %v1444_v43 = vrot.slane %v38_v26, %v2146_v37  ;;  %v1564_v37 = vrot.slane %v2442_v22, %v2155_v46 }
 0x6cf   :  { %v1363_v38 = vpop.permute.xlu1 %1362  ;;  %v1360_v52 = vadd.f32 %v1359_v48, %v1349_v45 }
 0x6d0   :  { %v1369_v49 = vsub.f32 %v1363_v38, %v1368_v44  ;;  %v1433_v44 = vrot.slane %v38_v26, %v2149_v39  ;;  %v1586_v39 = vrot.slane %v2442_v22, %v2162_v59 }
 0x6d2   :  { %v1370_v53 = vand.u32 2147483647, %v1369_v49  ;;  %v1455_v49 = vrot.slane %v38_v26, %v2151_v42  ;;  %v1477_v42 = vrot.slane %v38_v26, %v2157_v47  ;;  %v1597_v47 = vrot.slane %v2442_v22, %v2165_v7 }
 0x6d4   :  { %v1374_v51 = vpop.permute.xlu1 %1373  ;;  %v1371_v56 = vadd.f32 %v1370_v53, %v1360_v52 }
 0x6d5   :  { %v1380_v54 = vsub.f32 %v1374_v51, %v1379_v50 }
 0x6d7   :  { %v1381_v57 = vand.u32 2147483647, %v1380_v54 }
 0x6d9   :  { %v1385_v55 = vpop.permute.xlu1 %1384  ;;  %v1382_v61 = vadd.f32 %v1381_v57, %v1371_v56 }
 0x6da   :  { %v1391_v58 = vsub.f32 %v1385_v55, %v1390_v31  ;;  %v1466_v31 = vrot.slane %v38_v26, %v2155_v46  ;;  %v1499_v46 = vrot.slane %v38_v26, %v2165_v7 }
 0x6dc   :  { %v1392_v6 = vand.u32 2147483647, %v1391_v58 }
 0x6de   :  { %v1417_v60 = vpop.permute.xlu1 %1416  ;;  %v1393_v2 = vadd.f32 %v1392_v6, %v1382_v61 }
 0x6df   :  { %v1423_v48 = vsub.f32 %v1417_v60, %v1422_v34 }
 0x6e1   :  { %v1424_v56 = vand.u32 2147483647, %v1423_v48 }
 0x6e3   :  { %v1396_v63 = vpop.permute.xlu1 %1395  ;;  %1427 = vperm.xlu0 %1875, %v1924_v1  }
 0x6e4   :  { %v1402_v3 = vsub.f32 %v1396_v63, %v1401_v62 }
 0x6e6   :  { %v1403_v4 = vand.u32 2147483647, %v1402_v3 }
 0x6e7   :  { %1887 = vset.pattern.permute.xlu0 %v2076_v5 }
 0x6e8   :  { %v1404_v8 = vadd.f32 %v1403_v4, %v1393_v2  ;;  %1558 = vperm.xlu0 %1887, %v1924_v1   ;;  %v1439_v14 = vpop.permute.xlu1 %1438  ;;  %v1488_v2 = vrot.slane %v38_v26, %v2162_v59 }
 0x6e9   :  { %v1445_v54 = vsub.f32 %v1439_v14, %v1444_v43 }
 0x6ea   :  { %v1405_v9 = vmul.f32 -1.0, %v1404_v8 }
 0x6eb   :  { %v1446_v63 = vand.u32 2147483647, %v1445_v54 }
 0x6ec   :  { %v1406_v10 = vmul.f32 1.442695, %v1405_v9  ;;  %1890 = vset.pattern.permute.xlu0 %v2077_v11 }
 0x6ed   :  { %1591 = vperm.xlu0 %1890, %v1924_v1   ;;  %v1450_v15 = vpop.permute.xlu1 %1449 }
 0x6ee   :  { %1917 = vpow2.f32 %v1406_v10  ;;  %v1456_v57 = vsub.f32 %v1450_v15, %v1455_v49 }
 0x6f0   :  { %v1457_v9 = vand.u32 2147483647, %v1456_v57 }
 0x6f2   :  { %v1461_v16 = vpop.permute.xlu1 %1460 }
 0x6f3   :  { %v1467_v1 = vsub.f32 %v1461_v16, %v1466_v31 }
 0x6f5   :  { %v1468_v15 = vand.u32 2147483647, %v1467_v1 }
 0x6f7   :  { %v1472_v17 = vpop.permute.xlu1 %1471 }
 0x6f8   :  { %v1918_v12 = vpop.eup %1917  ;;  %v1478_v10 = vsub.f32 %v1472_v17, %v1477_v42 }
 0x6f9   :  { %v1409_v13 = vsel %vm134_vm0, %v1918_v12, 0.0 }
 0x6fa   :  { %1410 = vadd.xlane.f32.xlu1 %v1409_v13 }
 0x6fc   :  { %v1483_v18 = vpop.permute.xlu1 %1482 }
 0x701   :  { %v1515_v19 = vpop.permute.xlu1 %1514 }
 0x702   :  { %v1521_v27 = vsub.f32 %v1515_v19, %v1520_v24  ;;  %v1489_v19 = vsub.f32 %v1483_v18, %v1488_v2  ;;  %v1479_v24 = vand.u32 2147483647, %v1478_v10 }
 0x704   :  { %v1522_v36 = vand.u32 2147483647, %v1521_v27  ;;  %v1490_v17 = vand.u32 2147483647, %v1489_v19 }
 0x706   :  { %v1526_v20 = vpop.permute.xlu1 %1525 }
 0x707   :  { %v1532_v28 = vsub.f32 %v1526_v20, %v1531_v25 }
 0x709   :  { %v1533_v38 = vand.u32 2147483647, %v1532_v28 }
 0x70b   :  { %v2437_v21 = vpop.permute.xlu1 %1493  ;;  %v1534_v50 = vadd.f32 %v1533_v38, %v1522_v36 }
 0x70c   :  { %v1500_v25 = vsub.f32 %v2437_v21, %v1499_v46 }
 0x70e   :  { %v1501_v7 = vand.u32 2147483647, %v1500_v25 }
 0x710   :  { %v1537_v23 = vpop.permute.xlu1 %1536 }
 0x711   :  { %v1543_v40 = vsub.f32 %v1537_v23, %v1542_v0 }
 0x713   :  { %v1544_v51 = vand.u32 2147483647, %v1543_v40 }
 0x715   :  { %v1548_v33 = vpop.permute.xlu1 %1547  ;;  %v1545_v61 = vadd.f32 %v1544_v51, %v1534_v50 }
 0x716   :  { %v1554_v52 = vsub.f32 %v1548_v33, %v1553_v41 }
 0x718   :  { %v1555_v6 = vand.u32 2147483647, %v1554_v52 }
 0x71a   :  { %v1570_v45 = vpop.permute.xlu1 %1569  ;;  %v1556_v12 = vadd.f32 %v1555_v6, %v1545_v61 }
 0x71b   :  { %v1576_v62 = vsub.f32 %v1570_v45, %v1575_v35 }
 0x71d   :  { %v1577_v13 = vand.u32 2147483647, %v1576_v62 }
 0x71f   :  { %v1581_v60 = vpop.permute.xlu1 %1580 }
 0x720   :  { %v1587_v8 = vsub.f32 %v1581_v60, %v1586_v39 }
 0x722   :  { %v1588_v59 = vand.u32 2147483647, %v1587_v8 }
 0x75a   :  { %v1313_v29 = vpop.xlane.xlu0 %1312 }
 0x75b   :  { %v1314_v32 = vadd.f32 %v1313_v29, %v1310_v30 }
 0x75d   :  { %1316 = vst.msk [vmem:[#allocation2] sm:$0xff] %vm1315_vm14, %v1314_v32 }
 0x762   :  { %v1428_v53 = vpop.permute.xlu0 %1427 }
 0x763   :  { %v1434_v55 = vsub.f32 %v1428_v53, %v1433_v44 }
 0x764   :  { %v1408_v45 = vld [vmem:[#allocation2] sm:$0xff] }
 0x765   :  { %v1435_v58 = vand.u32 2147483647, %v1434_v55 }
 0x767   :  { %v1436_v3 = vadd.f32 %v1435_v58, %v1424_v56  ;;  %v1559_v4 = vpop.permute.xlu0 %1558 }
 0x768   :  { %v1565_v5 = vsub.f32 %v1559_v4, %v1564_v37 }
 0x769   :  { %v1447_v11 = vadd.f32 %v1446_v63, %v1436_v3 }
 0x76a   :  { %v1566_v14 = vand.u32 2147483647, %v1565_v5 }
 0x76b   :  { %v1458_v16 = vadd.f32 %v1457_v9, %v1447_v11 }
 0x76c   :  { %v1567_v20 = vadd.f32 %v1566_v14, %v1556_v12  ;;  %v1592_v23 = vpop.permute.xlu0 %1591 }
 0x76d   :  { %v1469_v26 = vadd.f32 %v1468_v15, %v1458_v16  ;;  %v1598_v27 = vsub.f32 %v1592_v23, %v1597_v47 }
 0x76e   :  { %v1578_v28 = vadd.f32 %v1577_v13, %v1567_v20 }
 0x76f   :  { %v1480_v0 = vadd.f32 %v1479_v24, %v1469_v26  ;;  %v1599_v29 = vand.u32 2147483647, %v1598_v27 }
 0x770   :  { %v1589_v30 = vadd.f32 %v1588_v59, %v1578_v28 }
 0x771   :  { %v1491_v22 = vadd.f32 %v1490_v17, %v1480_v0 }
 0x772   :  { %v1600_v32 = vadd.f32 %v1599_v29, %v1589_v30 }
 0x773   :  { %v1502_v33 = vadd.f32 %v1501_v7, %v1491_v22 }
 0x774   :  { %v1601_v34 = vmul.f32 -1.0, %v1600_v32 }
 0x775   :  { %v1503_v18 = vmul.f32 -1.0, %v1502_v33 }
 0x776   :  { %v1602_v36 = vmul.f32 1.442695, %v1601_v34 }
 0x777   :  { %v1504_v38 = vmul.f32 1.442695, %v1503_v18 }
 0x778   :  { %1919 = vpow2.f32 %v1602_v36 }
 0x779   :  { %1921 = vpow2.f32 %v1504_v38 }
 0x782   :  { %v1920_v40 = vpop.eup %1919 }
 0x783   :  { %v1922_v41 = vpop.eup %1921  ;;  %v1605_v21 = vsel %vm134_vm0, %v1920_v40, 0.0 }
 0x784   :  { %1606 = vadd.xlane.f32.xlu1 %v1605_v21  ;;  %v1507_v43 = vsel %vm134_vm0, %v1922_v41, 0.0 }
 0x785   :  { %1508 = vadd.xlane.f32.xlu0 %v1507_v43 }
 0x787   :  { %v1411_v44 = vpop.xlane.xlu1 %1410 }
 0x788   :  { %v1412_v48 = vadd.f32 %v1411_v44, %v1408_v45 }
 0x78a   :  { %1414 = vst.msk [vmem:[#allocation2] sm:$0xff] %vm1413_vm15, %v1412_v48 }
 0x791   :  { %v1506_v50 = vld [vmem:[#allocation2] sm:$0xff] }
 0x811   :  { %v1607_v52 = vpop.xlane.xlu1 %1606 }
 0x812   :  { %v1509_v49 = vpop.xlane.xlu0 %1508 }
 0x813   :  { %v1510_v51 = vadd.f32 %v1509_v49, %v1506_v50 }
 0x815   :  { %1512 = vst.msk [vmem:[#allocation2] sm:$0xff] %vm1511_vm2, %v1510_v51 }
 0x81c   :  { %v1604_v53 = vld [vmem:[#allocation2] sm:$0xff] }
 0x81d   :  { %v1608_v35 = vadd.f32 %v1607_v52, %v1604_v53 }
 0x81f   :  { %1610 = vst.msk [vmem:[#allocation2] sm:$0xff] %vm1609_vm3, %v1608_v35 }
 0x826   :  { %v1614_v54 = vld [vmem:[#allocation2] sm:$0xff] }
 0x827   :  { %v1632_v31 = vadd.f32 -1.0, %v1614_v54 }
 0x829   :  { %1617 = vst.msk [vmem:[#allocation3] sm:$0xff] %vm22_vm1, %v1632_v31 }
 0x82a   :  { %1936 = shalt.err (!%p1933_p4)
}
 0x82b   :  { %s1937_s26 = scalar_lea.hbm %s2491_s4, 128 }
 0x82c   :  { %p1938_p5 = scmp.ne.s32.totalorder %s2491_s4, %s1937_s26  ;;  %p1941_p6 = scmp.lt.u32.totalorder %s1937_s26, %s2491_s4 }
 0x82e   :  { %p1943_p7 = pnand %p1941_p6, %p1938_p5 }
 0x830   :  { %1946 = shalt.err (!%p1943_p7)
}
 0x831   :  { %1627 = dma.vmem_to_hbm [thread:$0]  %s1625_s22, 128, %s2491_s4, [#allocation4]  }
 0x832   :  { %1947 = dma.done.wait [#allocation4], 128  }
 0x833   :  { %1948 = vsyncadd [#allocation4], 4294967168 }
 0x834   :  { %1631 = vsyncpa [#allocation4], 1 }

</bundles_post_ra>
